<compile_context>
chip_gen: v6e
topology: v6e:2x2x1
jax: 0.10.0
libtpu: 0.0.40
codegen_flags: <defaults>
</compile_context>

<pallas_src>
from functools import partial

import jax
import jax.numpy as jnp
from jax.experimental import pallas as pl
from jax.experimental.pallas import tpu as pltpu

_LANE = 128


def _round_up(x, m):
    return (x + m - 1) // m * m


# ----------------------------------------------------------------------------
# VMEM budget helper (computed from actual buffer sizes, not a blanket constant)
# ----------------------------------------------------------------------------
def _tile_padded_bytes(shape, dtype):
    itemsize = jnp.dtype(dtype).itemsize
    shape = tuple(int(d) for d in shape)
    if len(shape) == 0:
        shape = (1, 1)
    elif len(shape) == 1:
        shape = (1, shape[0])
    sub = {4: 8, 2: 16, 1: 32}.get(itemsize, 8)
    lead = 1
    for d in shape[:-2]:
        lead *= d
    return lead * _round_up(shape[-2], sub) * _round_up(shape[-1], _LANE) * itemsize


def _vmem_limit_bytes(bufs):
    """bufs: iterable of (shape, dtype, n_copies).  2x margin for compiler temporaries,
    clamped to [32 MiB, 56 MiB]: always >= scoped defaults, <= v7x physical (64 MiB)."""
    need = sum(_tile_padded_bytes(s, d) * n for s, d, n in bufs)
    return int(min(max(2 * need + (2 << 20), 32 << 20), 56 << 20))


# ----------------------------------------------------------------------------
# Conv2d(k=4, s=2, p=1) as 16 in-kernel tap matmuls over a phase-packed input
# ----------------------------------------------------------------------------
def _phase_pack(x):
    """x: (B, H, W, C) NHWC activation -> (B, 4, Min, C) phase-packed, zero-padded.
    phase_flat[b, 2*hp+wp, hb*(Wo+1)+wb, c] == x_padded[b, 2*hb+hp, 2*wb+wp, c]."""
    B, H, W, C = x.shape
    Ho = (H - 2) // 2 + 1
    Wo = (W - 2) // 2 + 1
    hp, wp = 2 * (Ho + 1), 2 * (Wo + 1)
    xpad = jnp.pad(x, ((0, 0), (1, hp - H - 1), (1, wp - W - 1), (0, 0)))
    ph = xpad.reshape(B, Ho + 1, 2, Wo + 1, 2, C).transpose(0, 2, 4, 1, 3, 5)
    ph = ph.reshape(B, 4, (Ho + 1) * (Wo + 1), C)
    m_rows = _round_up((Ho + 1) * (Wo + 1), 8)        # output rows per batch (8-aligned)
    m_in = _round_up(m_rows + Wo + 2, 8)              # + max tap offset, 8-aligned
    ph = jnp.pad(ph, ((0, 0), (0, 0), (0, m_in - (Ho + 1) * (Wo + 1)), (0, 0)))
    return ph, Ho, Wo, m_rows


def _unpack_valid(y, Ho, Wo):
    """(B, m_rows, C) conv output (with boundary junk rows) -> valid (B, Ho, Wo, C)."""
    B, _, C = y.shape
    y = y[:, : (Ho + 1) * (Wo + 1), :].reshape(B, Ho + 1, Wo + 1, C)
    return y[:, :Ho, :Wo, :]


def _conv_tap_kernel(x_ref, w_ref, b_ref, o_ref, *, m_rows, wo1, act, compact):
    # x_ref: (4, Min, Cin) bf16   w_ref: (16, Cin, Cout) bf16   b_ref: (1, Cout) f32
    cout = w_ref.shape[-1]
    acc = jnp.zeros((m_rows, cout), jnp.float32)
    for t in range(16):                               # unrolled: 16 contiguous-slice taps
        kh, kw = t // 4, t % 4
        off = (kh // 2) * wo1 + (kw // 2)             # flat row offset (static)
        pc = (kh % 2) * 2 + (kw % 2)                  # phase index (static)
        x_t = x_ref[pc, off:off + m_rows, :]
        acc = acc + jnp.dot(x_t, w_ref[t], preferred_element_type=jnp.float32)
    acc = acc + b_ref[...]
    if act == "leaky_relu":
        acc = jnp.where(acc > 0, acc, jnp.float32(0.2) * acc)
    if compact is None:
        o_ref[...] = acc.astype(o_ref.dtype)
    else:                                             # keep only valid rows (NHWC order)
        ho_c, wo_c = compact
        for r in range(ho_c):
            o_ref[r * wo_c:(r + 1) * wo_c, :] = (
                acc[r * (wo_c + 1): r * (wo_c + 1) + wo_c, :].astype(o_ref.dtype))


def conv_k4s2p1(ph, w, b, *, m_rows, wo, act, compact=None):
    """ph: (B, 4, Min, Cin) bf16; w: (16, Cin, Cout) bf16; b: (1, Cout) f32."""
    B, _, m_in, cin = ph.shape
    cout = w.shape[-1]
    out_rows = m_rows if compact is None else compact[0] * compact[1]
    vmem = _vmem_limit_bytes([
        ((4, m_in, cin), ph.dtype, 2),
        (w.shape, w.dtype, 2),
        (b.shape, b.dtype, 2),
        ((out_rows, cout), jnp.bfloat16, 2),
        ((m_rows, cout), jnp.float32, 1),             # f32 accumulator value
    ])
    return pl.pallas_call(
        partial(_conv_tap_kernel, m_rows=m_rows, wo1=wo + 1, act=act, compact=compact),
        out_shape=jax.ShapeDtypeStruct((B, out_rows, cout), jnp.bfloat16),
        grid=(B,),
        in_specs=[
            pl.BlockSpec((None, 4, m_in, cin), lambda i: (i, 0, 0, 0)),
            pl.BlockSpec((16, cin, cout), lambda i: (0, 0, 0)),   # grid-invariant weight
            pl.BlockSpec((1, cout), lambda i: (0, 0)),            # grid-invariant bias
        ],
        out_specs=pl.BlockSpec((None, out_rows, cout), lambda i: (i, 0, 0)),
        compiler_params=pltpu.CompilerParams(
            dimension_semantics=("parallel",),        # batch-parallel -> v7x megacore
            vmem_limit_bytes=vmem,
        ),
    )(ph, w, b)


# ----------------------------------------------------------------------------
# Fused head: s_encoder + folded proj + (h_img @ proj) + fc MLP + turn_power
# ----------------------------------------------------------------------------
def _head_kernel(st_ref, hi_ref,
                 s0w, s0b, s1w, s1b, spw, ipw, ipb,
                 f0w, f0b, f1w, f1b, f2w, f2b, f3w, f3b,
                 o_ref, *, turn_power):
    def lin(h, w_ref, b_ref=None):
        r = jnp.dot(h.astype(jnp.bfloat16), w_ref[...],
                    preferred_element_type=jnp.float32)
        return r if b_ref is None else r + b_ref[...]

    def leaky(v):
        return jnp.where(v > 0, v, jnp.float32(0.2) * v)

    # Encoder.s_encoder: Linear -> LReLU -> Linear -> LReLU -> [senc2 folded into proj]
    s = leaky(lin(st_ref[...], s0w, s0b))
    s = leaky(lin(s, s1w, s1b))
    # proj(h_img + h_state) = h_img @ Wp_perm + s @ (senc2_w @ Wp) + (senc2_b @ Wp + pb)
    h = lin(hi_ref[...], ipw) + lin(s, spw) + ipb[...]
    h = jnp.maximum(lin(h, f0w, f0b), 0.0)
    h = jnp.maximum(lin(h, f1w, f1b), 0.0)
    h = jnp.maximum(lin(h, f2w, f2b), 0.0)
    a = lin(h, f3w, f3b)                              # (tb, 128) f32, lane-dense

    # a[..., 1] = a[..., 1] ** turn_power  (static int -> repeated multiply)
    a_pow = a
    for _ in range(int(turn_power) - 1):
        a_pow = a_pow * a
    col = jax.lax.broadcasted_iota(jnp.int32, a.shape, 1)
    o_ref[...] = jnp.where(col == 1, a_pow, a).astype(o_ref.dtype)


def policy_head(states_flat, h_img, kp, turn_power):
    assert int(turn_power) >= 1
    B, ns = states_flat.shape
    hsize = h_img.shape[1]
    na_p = kp["fc3_w"].shape[1]

    tb = min(128, _round_up(B, 8))                    # >=8 rows/step (unmasked sublanes)
    b_pad = _round_up(B, tb)
    if b_pad != B:
        states_flat = jnp.pad(states_flat, ((0, b_pad - B), (0, 0)))
        h_img = jnp.pad(h_img, ((0, b_pad - B), (0, 0)))
    grid_b = b_pad // tb

    weights = [
        kp["senc0_w"], kp["senc0_b"], kp["senc1_w"], kp["senc1_b"],
        kp["sproj_w"], kp["iproj_w"], kp["iproj_b"],
        kp["fc0_w"], kp["fc0_b"], kp["fc1_w"], kp["fc1_b"],
        kp["fc2_w"], kp["fc2_b"], kp["fc3_w"], kp["fc3_b"],
    ]
    in_specs = [pl.BlockSpec((tb, ns), lambda i: (i, 0)),
                pl.BlockSpec((tb, hsize), lambda i: (i, 0))]
    in_specs += [pl.BlockSpec(w.shape, lambda i: (0, 0)) for w in weights]

    vmem = _vmem_limit_bytes(
        [((tb, ns), jnp.bfloat16, 2), ((tb, hsize), jnp.bfloat16, 2),
         ((tb, na_p), jnp.float32, 2), ((tb, hsize), jnp.float32, 1)]
        + [(w.shape, w.dtype, 2) for w in weights])

    out = pl.pallas_call(
        partial(_head_kernel, turn_power=int(turn_power)),
        out_shape=jax.ShapeDtypeStruct((b_pad, na_p), jnp.float32),
        grid=(grid_b,),
        in_specs=in_specs,
        out_specs=pl.BlockSpec((tb, na_p), lambda i: (i, 0)),
        compiler_params=pltpu.CompilerParams(
            dimension_semantics=("parallel",),
            vmem_limit_bytes=vmem,
        ),
    )(states_flat, h_img, *weights)
    return out


# ----------------------------------------------------------------------------
# Parameter construction (PyTorch-default-style uniform init, logical layout)
# ----------------------------------------------------------------------------
def _uniform(key, shape, fan_in):
    bound = 1.0 / jnp.sqrt(jnp.float32(fan_in))
    return jax.random.uniform(key, shape, jnp.float32, -bound, bound)


def make_params(key, cfg):
    nf = cfg["n_feature"]
    fmaps = (nf // 4, nf // 2, nf)                    # Encoder feature_maps
    cin0 = cfg["n_cond"] * cfg["n_channels"]
    hsize = nf * cfg["h_height"] * cfg["h_width"]
    nh = cfg["n_hidden"]
    keys = iter(jax.random.split(key, 40))
    p = {}
    conv_cins = (cin0, fmaps[0], fmaps[1])
    for i, (ci, co) in enumerate(zip(conv_cins, fmaps)):
        fan = ci * 4 * 4
        p[f"conv{i}_w"] = _uniform(next(keys), (co, ci, 4, 4), fan)
        p[f"conv{i}_b"] = _uniform(next(keys), (co,), fan)
    s_dims = [(4 * cfg["n_cond"], nf), (nf, nf), (nf, hsize)]
    for i, (di, do) in enumerate(s_dims):
        p[f"senc{i}_w"] = _uniform(next(keys), (di, do), di)
        p[f"senc{i}_b"] = _uniform(next(keys), (do,), di)
    p["proj_w"] = _uniform(next(keys), (hsize, nh), hsize)
    p["proj_b"] = _uniform(next(keys), (nh,), hsize)
    fc_dims = [(nh, nh), (nh, nh), (nh, nh), (nh, cfg["n_actions"])]
    for i, (di, do) in enumerate(fc_dims):
        p[f"fc{i}_w"] = _uniform(next(keys), (di, do), di)
        p[f"fc{i}_b"] = _uniform(next(keys), (do,), di)
    return p


def prepare_kernel_params(p, cfg):
    """Kernel layout: conv weights as (16, Cin, Cout) bf16 (tap-major, no channel pad);
    proj folded through senc2; proj rows permuted NCHW-flatten -> NHWC-flatten; final fc
    output padded to 128 lanes; biases f32."""
    kp = {}
    for i in range(3):
        w, b = p[f"conv{i}_w"], p[f"conv{i}_b"]       # (co, ci, 4, 4), (co,)
        co, ci = w.shape[0], w.shape[1]
        kp[f"conv{i}_w"] = (w.transpose(2, 3, 1, 0)   # (kh, kw, ci, co)
                            .reshape(16, ci, co).astype(jnp.bfloat16))
        kp[f"conv{i}_b"] = b.astype(jnp.float32).reshape(1, co)

    for i in (0, 1):
        kp[f"senc{i}_w"] = p[f"senc{i}_w"].astype(jnp.bfloat16)
        kp[f"senc{i}_b"] = p[f"senc{i}_b"].astype(jnp.float32).reshape(1, -1)

    # Fold proj through s_encoder's final (linear, activation-free) layer.
    kp["sproj_w"] = (p["senc2_w"] @ p["proj_w"]).astype(jnp.bfloat16)          # (nf, nh)
    kp["iproj_b"] = (p["senc2_b"] @ p["proj_w"] + p["proj_b"]).astype(
        jnp.float32).reshape(1, -1)

    # proj on the image path: permute rows from NCHW flatten (c2,h,w) to NHWC (h,w,c2).
    c2, hh, hw = cfg["n_feature"], cfg["h_height"], cfg["h_width"]
    nh = cfg["n_hidden"]
    ipw = (p["proj_w"].reshape(c2, hh, hw, nh).transpose(1, 2, 0, 3)
           .reshape(hh * hw * c2, nh))
    kp["iproj_w"] = ipw.astype(jnp.bfloat16)

    for i in range(3):
        kp[f"fc{i}_w"] = p[f"fc{i}_w"].astype(jnp.bfloat16)
        kp[f"fc{i}_b"] = p[f"fc{i}_b"].astype(jnp.float32).reshape(1, -1)
    na = cfg["n_actions"]
    na_p = _round_up(na, _LANE)
    kp["fc3_w"] = jnp.pad(p["fc3_w"], ((0, 0), (0, na_p - na))).astype(jnp.bfloat16)
    kp["fc3_b"] = jnp.pad(p["fc3_b"], (0, na_p - na)).astype(jnp.float32).reshape(1, na_p)
    return kp


# ----------------------------------------------------------------------------
# Forward pass (mirrors DeterministicPolicy.forward with normalize_* = False)
# ----------------------------------------------------------------------------
def deterministic_policy_forward(kp, state_images, states, cfg):
    B = state_images.shape[0]
    x = state_images.reshape(B, cfg["n_cond"] * cfg["n_channels"],
                             cfg["height"], cfg["width"])
    x = x.astype(jnp.bfloat16).transpose(0, 2, 3, 1)   # cast BEFORE transpose; NHWC bf16

    # Encoder.f_encoder: conv -> LeakyReLU -> conv -> LeakyReLU -> conv
    for li in (0, 1):
        ph, Ho, Wo, m_rows = _phase_pack(x)
        y = conv_k4s2p1(ph, kp[f"conv{li}_w"], kp[f"conv{li}_b"],
                        m_rows=m_rows, wo=Wo, act="leaky_relu")
        x = _unpack_valid(y, Ho, Wo)

    ph, Ho, Wo, m_rows = _phase_pack(x)
    y = conv_k4s2p1(ph, kp["conv2_w"], kp["conv2_b"],
                    m_rows=m_rows, wo=Wo, act=None, compact=(Ho, Wo))
    h_img = y.reshape(B, Ho * Wo * y.shape[-1])        # free reshape, NHWC flatten

    # s_encoder + (h_img + h_state) + proj + fc MLP + turn_power: one fused kernel.
    states_flat = states.reshape(B, -1).astype(jnp.bfloat16)
    a_pad = policy_head(states_flat, h_img, kp, cfg["turn_power"])
    return a_pad[:B, :cfg["n_actions"]]


# ----------------------------------------------------------------------------
# Pure-JAX f32 reference (NCHW, un-folded weights) for numerical validation
# ----------------------------------------------------------------------------
def reference_forward(p, state_images, states, cfg):
    B = state_images.shape[0]
    x = state_images.reshape(B, cfg["n_cond"] * cfg["n_channels"],
                             cfg["height"], cfg["width"]).astype(jnp.float32)

    def conv(v, w, b):
        y = jax.lax.conv_general_dilated(v, w, (2, 2), ((1, 1), (1, 1)),
                                         dimension_numbers=("NCHW", "OIHW", "NCHW"))
        return y + b.reshape(1, -1, 1, 1)

    def lrelu(v):
        return jnp.where(v > 0, v, 0.2 * v)

    h = lrelu(conv(x, p["conv0_w"], p["conv0_b"]))
    h = lrelu(conv(h, p["conv1_w"], p["conv1_b"]))
    h = conv(h, p["conv2_w"], p["conv2_b"])
    h_img = h.reshape(B, -1)                           # NCHW flatten (c, h, w)

    s = states.reshape(B, -1).astype(jnp.float32)
    s = lrelu(s @ p["senc0_w"] + p["senc0_b"])
    s = lrelu(s @ p["senc1_w"] + p["senc1_b"])
    h_state = s @ p["senc2_w"] + p["senc2_b"]

    h = (h_img + h_state) @ p["proj_w"] + p["proj_b"]
    for i in range(3):
        h = jnp.maximum(h @ p[f"fc{i}_w"] + p[f"fc{i}_b"], 0.0)
    a = h @ p["fc3_w"] + p["fc3_b"]
    a = a.at[:, 1].set(a[:, 1] ** cfg["turn_power"])
    return a


# ----------------------------------------------------------------------------
if __name__ == "__main__":
    # Scaled-down config (structure identical to the PyTorch defaults).
    H, W = 32, 16                                      # 3x (k4, s2, p1) -> 4 x 2
    cfg = dict(
        n_cond=2, n_channels=4, n_feature=32, n_actions=2,
        n_hidden=32, turn_power=3, height=H, width=W,
        h_height=4, h_width=2,
    )
    B = 2

    key = jax.random.PRNGKey(0)
    k_img, k_st, k_par = jax.random.split(key, 3)
    state_images = jax.random.normal(
        k_img, (B, cfg["n_cond"], cfg["n_channels"], H, W), jnp.float32)
    states = jax.random.normal(k_st, (B, cfg["n_cond"], 4), jnp.float32)

    params = make_params(k_par, cfg)
    kparams = prepare_kernel_params(params, cfg)

    fwd = jax.jit(partial(deterministic_policy_forward, cfg=cfg))
    actions = fwd(kparams, state_images, states)
    jax.block_until_ready(actions)

    assert actions.shape == (B, cfg["n_actions"])
    assert bool(jnp.all(jnp.isfinite(actions)))

    ref = reference_forward(params, state_images, states, cfg)
    assert bool(jnp.allclose(actions, ref, rtol=1e-1, atol=5e-2)), (
        f"max abs err {float(jnp.max(jnp.abs(actions - ref)))}")
    print("KERNEL_OK")
</pallas_src>

<mosaic_0001>
module attributes {stable_mosaic.version = 11 : i64} {
  func.func @_conv_tap_kernel(%arg0: i32, %arg1: memref<1x4x176x8xbf16, #tpu.memory_space<vmem>>, %arg2: memref<16x8x8xbf16, #tpu.memory_space<vmem>>, %arg3: memref<1x8xf32, #tpu.memory_space<vmem>>, %arg4: memref<1x160x8xbf16, #tpu.memory_space<vmem>>) attributes {dimension_semantics = [#tpu.dimension_semantics<parallel>], iteration_bounds = array<i64: 2>, scalar_prefetch = 0 : i64, scratch_operands = 0 : i64, tpu.core_type = #tpu.core_type<tc>, window_params = [{transform_indices = @transform_0, window_bounds = array<i64: 1, 4, 176, 8>}, {pipeline_mode = #tpu.pipeline_mode<synchronous>, transform_indices = @transform_1, window_bounds = array<i64: 16, 8, 8>}, {pipeline_mode = #tpu.pipeline_mode<synchronous>, transform_indices = @transform_2, window_bounds = array<i64: 1, 8>}, {transform_indices = @transform_3, window_bounds = array<i64: 1, 160, 8>}]} {
    %cst = arith.constant 0.000000e+00 : f32
    %0 = vector.broadcast %cst : f32 to vector<160x8xf32>
    %c0 = arith.constant 0 : index
    %c0_0 = arith.constant 0 : index
    %c0_1 = arith.constant 0 : index
    %c0_2 = arith.constant 0 : index
    %1 = vector.load %arg1[%c0, %c0_0, %c0_1, %c0_2] : memref<1x4x176x8xbf16, #tpu.memory_space<vmem>>, vector<1x1x160x8xbf16>
    %2 = vector.shape_cast %1 : vector<1x1x160x8xbf16> to vector<160x8xbf16>
    %c0_3 = arith.constant 0 : index
    %c0_4 = arith.constant 0 : index
    %c0_5 = arith.constant 0 : index
    %3 = vector.load %arg2[%c0_3, %c0_4, %c0_5] : memref<16x8x8xbf16, #tpu.memory_space<vmem>>, vector<1x8x8xbf16>
    %4 = vector.shape_cast %3 : vector<1x8x8xbf16> to vector<8x8xbf16>
    %cst_6 = arith.constant dense<0.000000e+00> : vector<160x8xf32>
    %5 = tpu.matmul %2, %4, %cst_6 {dimension_numbers = #tpu.dot_dimension_numbers<[1], [0], [0], [1], [0, 0, 1, 1], [], []>} : vector<160x8xbf16>, vector<8x8xbf16>, vector<160x8xf32> -> vector<160x8xf32>
    %6 = arith.addf %0, %5 : vector<160x8xf32>
    %c0_7 = arith.constant 0 : index
    %c1 = arith.constant 1 : index
    %c0_8 = arith.constant 0 : index
    %c0_9 = arith.constant 0 : index
    %7 = vector.load %arg1[%c0_7, %c1, %c0_8, %c0_9] : memref<1x4x176x8xbf16, #tpu.memory_space<vmem>>, vector<1x1x160x8xbf16>
    %8 = vector.shape_cast %7 : vector<1x1x160x8xbf16> to vector<160x8xbf16>
    %c1_10 = arith.constant 1 : index
    %c0_11 = arith.constant 0 : index
    %c0_12 = arith.constant 0 : index
    %9 = vector.load %arg2[%c1_10, %c0_11, %c0_12] : memref<16x8x8xbf16, #tpu.memory_space<vmem>>, vector<1x8x8xbf16>
    %10 = vector.shape_cast %9 : vector<1x8x8xbf16> to vector<8x8xbf16>
    %cst_13 = arith.constant dense<0.000000e+00> : vector<160x8xf32>
    %11 = tpu.matmul %8, %10, %cst_13 {dimension_numbers = #tpu.dot_dimension_numbers<[1], [0], [0], [1], [0, 0, 1, 1], [], []>} : vector<160x8xbf16>, vector<8x8xbf16>, vector<160x8xf32> -> vector<160x8xf32>
    %12 = arith.addf %6, %11 : vector<160x8xf32>
    %c0_14 = arith.constant 0 : index
    %c0_15 = arith.constant 0 : index
    %c1_16 = arith.constant 1 : index
    %c0_17 = arith.constant 0 : index
    %13 = vector.load %arg1[%c0_14, %c0_15, %c1_16, %c0_17] : memref<1x4x176x8xbf16, #tpu.memory_space<vmem>>, vector<1x1x160x8xbf16>
    %14 = vector.shape_cast %13 : vector<1x1x160x8xbf16> to vector<160x8xbf16>
    %c2 = arith.constant 2 : index
    %c0_18 = arith.constant 0 : index
    %c0_19 = arith.constant 0 : index
    %15 = vector.load %arg2[%c2, %c0_18, %c0_19] : memref<16x8x8xbf16, #tpu.memory_space<vmem>>, vector<1x8x8xbf16>
    %16 = vector.shape_cast %15 : vector<1x8x8xbf16> to vector<8x8xbf16>
    %cst_20 = arith.constant dense<0.000000e+00> : vector<160x8xf32>
    %17 = tpu.matmul %14, %16, %cst_20 {dimension_numbers = #tpu.dot_dimension_numbers<[1], [0], [0], [1], [0, 0, 1, 1], [], []>} : vector<160x8xbf16>, vector<8x8xbf16>, vector<160x8xf32> -> vector<160x8xf32>
    %18 = arith.addf %12, %17 : vector<160x8xf32>
    %c0_21 = arith.constant 0 : index
    %c1_22 = arith.constant 1 : index
    %c1_23 = arith.constant 1 : index
    %c0_24 = arith.constant 0 : index
    %19 = vector.load %arg1[%c0_21, %c1_22, %c1_23, %c0_24] : memref<1x4x176x8xbf16, #tpu.memory_space<vmem>>, vector<1x1x160x8xbf16>
    %20 = vector.shape_cast %19 : vector<1x1x160x8xbf16> to vector<160x8xbf16>
    %c3 = arith.constant 3 : index
    %c0_25 = arith.constant 0 : index
    %c0_26 = arith.constant 0 : index
    %21 = vector.load %arg2[%c3, %c0_25, %c0_26] : memref<16x8x8xbf16, #tpu.memory_space<vmem>>, vector<1x8x8xbf16>
    %22 = vector.shape_cast %21 : vector<1x8x8xbf16> to vector<8x8xbf16>
    %cst_27 = arith.constant dense<0.000000e+00> : vector<160x8xf32>
    %23 = tpu.matmul %20, %22, %cst_27 {dimension_numbers = #tpu.dot_dimension_numbers<[1], [0], [0], [1], [0, 0, 1, 1], [], []>} : vector<160x8xbf16>, vector<8x8xbf16>, vector<160x8xf32> -> vector<160x8xf32>
    %24 = arith.addf %18, %23 : vector<160x8xf32>
    %c0_28 = arith.constant 0 : index
    %c2_29 = arith.constant 2 : index
    %c0_30 = arith.constant 0 : index
    %c0_31 = arith.constant 0 : index
    %25 = vector.load %arg1[%c0_28, %c2_29, %c0_30, %c0_31] : memref<1x4x176x8xbf16, #tpu.memory_space<vmem>>, vector<1x1x160x8xbf16>
    %26 = vector.shape_cast %25 : vector<1x1x160x8xbf16> to vector<160x8xbf16>
    %c4 = arith.constant 4 : index
    %c0_32 = arith.constant 0 : index
    %c0_33 = arith.constant 0 : index
    %27 = vector.load %arg2[%c4, %c0_32, %c0_33] : memref<16x8x8xbf16, #tpu.memory_space<vmem>>, vector<1x8x8xbf16>
    %28 = vector.shape_cast %27 : vector<1x8x8xbf16> to vector<8x8xbf16>
    %cst_34 = arith.constant dense<0.000000e+00> : vector<160x8xf32>
    %29 = tpu.matmul %26, %28, %cst_34 {dimension_numbers = #tpu.dot_dimension_numbers<[1], [0], [0], [1], [0, 0, 1, 1], [], []>} : vector<160x8xbf16>, vector<8x8xbf16>, vector<160x8xf32> -> vector<160x8xf32>
    %30 = arith.addf %24, %29 : vector<160x8xf32>
    %c0_35 = arith.constant 0 : index
    %c3_36 = arith.constant 3 : index
    %c0_37 = arith.constant 0 : index
    %c0_38 = arith.constant 0 : index
    %31 = vector.load %arg1[%c0_35, %c3_36, %c0_37, %c0_38] : memref<1x4x176x8xbf16, #tpu.memory_space<vmem>>, vector<1x1x160x8xbf16>
    %32 = vector.shape_cast %31 : vector<1x1x160x8xbf16> to vector<160x8xbf16>
    %c5 = arith.constant 5 : index
    %c0_39 = arith.constant 0 : index
    %c0_40 = arith.constant 0 : index
    %33 = vector.load %arg2[%c5, %c0_39, %c0_40] : memref<16x8x8xbf16, #tpu.memory_space<vmem>>, vector<1x8x8xbf16>
    %34 = vector.shape_cast %33 : vector<1x8x8xbf16> to vector<8x8xbf16>
    %cst_41 = arith.constant dense<0.000000e+00> : vector<160x8xf32>
    %35 = tpu.matmul %32, %34, %cst_41 {dimension_numbers = #tpu.dot_dimension_numbers<[1], [0], [0], [1], [0, 0, 1, 1], [], []>} : vector<160x8xbf16>, vector<8x8xbf16>, vector<160x8xf32> -> vector<160x8xf32>
    %36 = arith.addf %30, %35 : vector<160x8xf32>
    %c0_42 = arith.constant 0 : index
    %c2_43 = arith.constant 2 : index
    %c1_44 = arith.constant 1 : index
    %c0_45 = arith.constant 0 : index
    %37 = vector.load %arg1[%c0_42, %c2_43, %c1_44, %c0_45] : memref<1x4x176x8xbf16, #tpu.memory_space<vmem>>, vector<1x1x160x8xbf16>
    %38 = vector.shape_cast %37 : vector<1x1x160x8xbf16> to vector<160x8xbf16>
    %c6 = arith.constant 6 : index
    %c0_46 = arith.constant 0 : index
    %c0_47 = arith.constant 0 : index
    %39 = vector.load %arg2[%c6, %c0_46, %c0_47] : memref<16x8x8xbf16, #tpu.memory_space<vmem>>, vector<1x8x8xbf16>
    %40 = vector.shape_cast %39 : vector<1x8x8xbf16> to vector<8x8xbf16>
    %cst_48 = arith.constant dense<0.000000e+00> : vector<160x8xf32>
    %41 = tpu.matmul %38, %40, %cst_48 {dimension_numbers = #tpu.dot_dimension_numbers<[1], [0], [0], [1], [0, 0, 1, 1], [], []>} : vector<160x8xbf16>, vector<8x8xbf16>, vector<160x8xf32> -> vector<160x8xf32>
    %42 = arith.addf %36, %41 : vector<160x8xf32>
    %c0_49 = arith.constant 0 : index
    %c3_50 = arith.constant 3 : index
    %c1_51 = arith.constant 1 : index
    %c0_52 = arith.constant 0 : index
    %43 = vector.load %arg1[%c0_49, %c3_50, %c1_51, %c0_52] : memref<1x4x176x8xbf16, #tpu.memory_space<vmem>>, vector<1x1x160x8xbf16>
    %44 = vector.shape_cast %43 : vector<1x1x160x8xbf16> to vector<160x8xbf16>
    %c7 = arith.constant 7 : index
    %c0_53 = arith.constant 0 : index
    %c0_54 = arith.constant 0 : index
    %45 = vector.load %arg2[%c7, %c0_53, %c0_54] : memref<16x8x8xbf16, #tpu.memory_space<vmem>>, vector<1x8x8xbf16>
    %46 = vector.shape_cast %45 : vector<1x8x8xbf16> to vector<8x8xbf16>
    %cst_55 = arith.constant dense<0.000000e+00> : vector<160x8xf32>
    %47 = tpu.matmul %44, %46, %cst_55 {dimension_numbers = #tpu.dot_dimension_numbers<[1], [0], [0], [1], [0, 0, 1, 1], [], []>} : vector<160x8xbf16>, vector<8x8xbf16>, vector<160x8xf32> -> vector<160x8xf32>
    %48 = arith.addf %42, %47 : vector<160x8xf32>
    %c0_56 = arith.constant 0 : index
    %c0_57 = arith.constant 0 : index
    %c9 = arith.constant 9 : index
    %c0_58 = arith.constant 0 : index
    %49 = vector.load %arg1[%c0_56, %c0_57, %c9, %c0_58] : memref<1x4x176x8xbf16, #tpu.memory_space<vmem>>, vector<1x1x160x8xbf16>
    %50 = vector.shape_cast %49 : vector<1x1x160x8xbf16> to vector<160x8xbf16>
    %c8 = arith.constant 8 : index
    %c0_59 = arith.constant 0 : index
    %c0_60 = arith.constant 0 : index
    %51 = vector.load %arg2[%c8, %c0_59, %c0_60] : memref<16x8x8xbf16, #tpu.memory_space<vmem>>, vector<1x8x8xbf16>
    %52 = vector.shape_cast %51 : vector<1x8x8xbf16> to vector<8x8xbf16>
    %cst_61 = arith.constant dense<0.000000e+00> : vector<160x8xf32>
    %53 = tpu.matmul %50, %52, %cst_61 {dimension_numbers = #tpu.dot_dimension_numbers<[1], [0], [0], [1], [0, 0, 1, 1], [], []>} : vector<160x8xbf16>, vector<8x8xbf16>, vector<160x8xf32> -> vector<160x8xf32>
    %54 = arith.addf %48, %53 : vector<160x8xf32>
    %c0_62 = arith.constant 0 : index
    %c1_63 = arith.constant 1 : index
    %c9_64 = arith.constant 9 : index
    %c0_65 = arith.constant 0 : index
    %55 = vector.load %arg1[%c0_62, %c1_63, %c9_64, %c0_65] : memref<1x4x176x8xbf16, #tpu.memory_space<vmem>>, vector<1x1x160x8xbf16>
    %56 = vector.shape_cast %55 : vector<1x1x160x8xbf16> to vector<160x8xbf16>
    %c9_66 = arith.constant 9 : index
    %c0_67 = arith.constant 0 : index
    %c0_68 = arith.constant 0 : index
    %57 = vector.load %arg2[%c9_66, %c0_67, %c0_68] : memref<16x8x8xbf16, #tpu.memory_space<vmem>>, vector<1x8x8xbf16>
    %58 = vector.shape_cast %57 : vector<1x8x8xbf16> to vector<8x8xbf16>
    %cst_69 = arith.constant dense<0.000000e+00> : vector<160x8xf32>
    %59 = tpu.matmul %56, %58, %cst_69 {dimension_numbers = #tpu.dot_dimension_numbers<[1], [0], [0], [1], [0, 0, 1, 1], [], []>} : vector<160x8xbf16>, vector<8x8xbf16>, vector<160x8xf32> -> vector<160x8xf32>
    %60 = arith.addf %54, %59 : vector<160x8xf32>
    %c0_70 = arith.constant 0 : index
    %c0_71 = arith.constant 0 : index
    %c10 = arith.constant 10 : index
    %c0_72 = arith.constant 0 : index
    %61 = vector.load %arg1[%c0_70, %c0_71, %c10, %c0_72] : memref<1x4x176x8xbf16, #tpu.memory_space<vmem>>, vector<1x1x160x8xbf16>
    %62 = vector.shape_cast %61 : vector<1x1x160x8xbf16> to vector<160x8xbf16>
    %c10_73 = arith.constant 10 : index
    %c0_74 = arith.constant 0 : index
    %c0_75 = arith.constant 0 : index
    %63 = vector.load %arg2[%c10_73, %c0_74, %c0_75] : memref<16x8x8xbf16, #tpu.memory_space<vmem>>, vector<1x8x8xbf16>
    %64 = vector.shape_cast %63 : vector<1x8x8xbf16> to vector<8x8xbf16>
    %cst_76 = arith.constant dense<0.000000e+00> : vector<160x8xf32>
    %65 = tpu.matmul %62, %64, %cst_76 {dimension_numbers = #tpu.dot_dimension_numbers<[1], [0], [0], [1], [0, 0, 1, 1], [], []>} : vector<160x8xbf16>, vector<8x8xbf16>, vector<160x8xf32> -> vector<160x8xf32>
    %66 = arith.addf %60, %65 : vector<160x8xf32>
    %c0_77 = arith.constant 0 : index
    %c1_78 = arith.constant 1 : index
    %c10_79 = arith.constant 10 : index
    %c0_80 = arith.constant 0 : index
    %67 = vector.load %arg1[%c0_77, %c1_78, %c10_79, %c0_80] : memref<1x4x176x8xbf16, #tpu.memory_space<vmem>>, vector<1x1x160x8xbf16>
    %68 = vector.shape_cast %67 : vector<1x1x160x8xbf16> to vector<160x8xbf16>
    %c11 = arith.constant 11 : index
    %c0_81 = arith.constant 0 : index
    %c0_82 = arith.constant 0 : index
    %69 = vector.load %arg2[%c11, %c0_81, %c0_82] : memref<16x8x8xbf16, #tpu.memory_space<vmem>>, vector<1x8x8xbf16>
    %70 = vector.shape_cast %69 : vector<1x8x8xbf16> to vector<8x8xbf16>
    %cst_83 = arith.constant dense<0.000000e+00> : vector<160x8xf32>
    %71 = tpu.matmul %68, %70, %cst_83 {dimension_numbers = #tpu.dot_dimension_numbers<[1], [0], [0], [1], [0, 0, 1, 1], [], []>} : vector<160x8xbf16>, vector<8x8xbf16>, vector<160x8xf32> -> vector<160x8xf32>
    %72 = arith.addf %66, %71 : vector<160x8xf32>
    %c0_84 = arith.constant 0 : index
    %c2_85 = arith.constant 2 : index
    %c9_86 = arith.constant 9 : index
    %c0_87 = arith.constant 0 : index
    %73 = vector.load %arg1[%c0_84, %c2_85, %c9_86, %c0_87] : memref<1x4x176x8xbf16, #tpu.memory_space<vmem>>, vector<1x1x160x8xbf16>
    %74 = vector.shape_cast %73 : vector<1x1x160x8xbf16> to vector<160x8xbf16>
    %c12 = arith.constant 12 : index
    %c0_88 = arith.constant 0 : index
    %c0_89 = arith.constant 0 : index
    %75 = vector.load %arg2[%c12, %c0_88, %c0_89] : memref<16x8x8xbf16, #tpu.memory_space<vmem>>, vector<1x8x8xbf16>
    %76 = vector.shape_cast %75 : vector<1x8x8xbf16> to vector<8x8xbf16>
    %cst_90 = arith.constant dense<0.000000e+00> : vector<160x8xf32>
    %77 = tpu.matmul %74, %76, %cst_90 {dimension_numbers = #tpu.dot_dimension_numbers<[1], [0], [0], [1], [0, 0, 1, 1], [], []>} : vector<160x8xbf16>, vector<8x8xbf16>, vector<160x8xf32> -> vector<160x8xf32>
    %78 = arith.addf %72, %77 : vector<160x8xf32>
    %c0_91 = arith.constant 0 : index
    %c3_92 = arith.constant 3 : index
    %c9_93 = arith.constant 9 : index
    %c0_94 = arith.constant 0 : index
    %79 = vector.load %arg1[%c0_91, %c3_92, %c9_93, %c0_94] : memref<1x4x176x8xbf16, #tpu.memory_space<vmem>>, vector<1x1x160x8xbf16>
    %80 = vector.shape_cast %79 : vector<1x1x160x8xbf16> to vector<160x8xbf16>
    %c13 = arith.constant 13 : index
    %c0_95 = arith.constant 0 : index
    %c0_96 = arith.constant 0 : index
    %81 = vector.load %arg2[%c13, %c0_95, %c0_96] : memref<16x8x8xbf16, #tpu.memory_space<vmem>>, vector<1x8x8xbf16>
    %82 = vector.shape_cast %81 : vector<1x8x8xbf16> to vector<8x8xbf16>
    %cst_97 = arith.constant dense<0.000000e+00> : vector<160x8xf32>
    %83 = tpu.matmul %80, %82, %cst_97 {dimension_numbers = #tpu.dot_dimension_numbers<[1], [0], [0], [1], [0, 0, 1, 1], [], []>} : vector<160x8xbf16>, vector<8x8xbf16>, vector<160x8xf32> -> vector<160x8xf32>
    %84 = arith.addf %78, %83 : vector<160x8xf32>
    %c0_98 = arith.constant 0 : index
    %c2_99 = arith.constant 2 : index
    %c10_100 = arith.constant 10 : index
    %c0_101 = arith.constant 0 : index
    %85 = vector.load %arg1[%c0_98, %c2_99, %c10_100, %c0_101] : memref<1x4x176x8xbf16, #tpu.memory_space<vmem>>, vector<1x1x160x8xbf16>
    %86 = vector.shape_cast %85 : vector<1x1x160x8xbf16> to vector<160x8xbf16>
    %c14 = arith.constant 14 : index
    %c0_102 = arith.constant 0 : index
    %c0_103 = arith.constant 0 : index
    %87 = vector.load %arg2[%c14, %c0_102, %c0_103] : memref<16x8x8xbf16, #tpu.memory_space<vmem>>, vector<1x8x8xbf16>
    %88 = vector.shape_cast %87 : vector<1x8x8xbf16> to vector<8x8xbf16>
    %cst_104 = arith.constant dense<0.000000e+00> : vector<160x8xf32>
    %89 = tpu.matmul %86, %88, %cst_104 {dimension_numbers = #tpu.dot_dimension_numbers<[1], [0], [0], [1], [0, 0, 1, 1], [], []>} : vector<160x8xbf16>, vector<8x8xbf16>, vector<160x8xf32> -> vector<160x8xf32>
    %90 = arith.addf %84, %89 : vector<160x8xf32>
    %c0_105 = arith.constant 0 : index
    %c3_106 = arith.constant 3 : index
    %c10_107 = arith.constant 10 : index
    %c0_108 = arith.constant 0 : index
    %91 = vector.load %arg1[%c0_105, %c3_106, %c10_107, %c0_108] : memref<1x4x176x8xbf16, #tpu.memory_space<vmem>>, vector<1x1x160x8xbf16>
    %92 = vector.shape_cast %91 : vector<1x1x160x8xbf16> to vector<160x8xbf16>
    %c15 = arith.constant 15 : index
    %c0_109 = arith.constant 0 : index
    %c0_110 = arith.constant 0 : index
    %93 = vector.load %arg2[%c15, %c0_109, %c0_110] : memref<16x8x8xbf16, #tpu.memory_space<vmem>>, vector<1x8x8xbf16>
    %94 = vector.shape_cast %93 : vector<1x8x8xbf16> to vector<8x8xbf16>
    %cst_111 = arith.constant dense<0.000000e+00> : vector<160x8xf32>
    %95 = tpu.matmul %92, %94, %cst_111 {dimension_numbers = #tpu.dot_dimension_numbers<[1], [0], [0], [1], [0, 0, 1, 1], [], []>} : vector<160x8xbf16>, vector<8x8xbf16>, vector<160x8xf32> -> vector<160x8xf32>
    %96 = arith.addf %90, %95 : vector<160x8xf32>
    %c0_112 = arith.constant 0 : index
    %c0_113 = arith.constant 0 : index
    %97 = vector.load %arg3[%c0_112, %c0_113] : memref<1x8xf32, #tpu.memory_space<vmem>>, vector<1x8xf32>
    %98 = vector.broadcast %97 : vector<1x8xf32> to vector<160x8xf32>
    %99 = arith.addf %96, %98 : vector<160x8xf32>
    %cst_114 = arith.constant 0.000000e+00 : f32
    %100 = vector.broadcast %cst_114 : f32 to vector<160x8xf32>
    %101 = arith.cmpf ogt, %99, %100 : vector<160x8xf32>
    %cst_115 = arith.constant 2.000000e-01 : f32
    %102 = vector.broadcast %cst_115 : f32 to vector<160x8xf32>
    %103 = arith.mulf %102, %99 : vector<160x8xf32>
    %104 = arith.select %101, %99, %103 : vector<160x8xi1>, vector<160x8xf32>
    %105 = arith.truncf %104 : vector<160x8xf32> to vector<160x8xbf16>
    %c0_116 = arith.constant 0 : index
    %c0_117 = arith.constant 0 : index
    %c0_118 = arith.constant 0 : index
    %106 = vector.load %arg4[%c0_116, %c0_117, %c0_118] : memref<1x160x8xbf16, #tpu.memory_space<vmem>>, vector<1x160x8xbf16>
    %107 = vector.shape_cast %106 : vector<1x160x8xbf16> to vector<160x8xbf16>
    %108 = vector.shape_cast %105 : vector<160x8xbf16> to vector<1x160x8xbf16>
    tpu.vector_store %arg4[%c0_116, %c0_117, %c0_118], %108 {strides = array<i32>} : memref<1x160x8xbf16, #tpu.memory_space<vmem>>, vector<1x160x8xbf16>,
    return
  }
  func.func @transform_0(%arg0: i32) -> (i32, i32, i32, i32) {
    %c0_i32 = arith.constant 0 : i32
    %c0_i32_0 = arith.constant 0 : i32
    %c0_i32_1 = arith.constant 0 : i32
    %c0_i32_2 = arith.constant 0 : i32
    return %arg0, %c0_i32, %c0_i32_0, %c0_i32_1 : i32, i32, i32, i32
  }
  func.func @transform_1(%arg0: i32) -> (i32, i32, i32) {
    %c0_i32 = arith.constant 0 : i32
    %c0_i32_0 = arith.constant 0 : i32
    %c0_i32_1 = arith.constant 0 : i32
    %c0_i32_2 = arith.constant 0 : i32
    return %c0_i32, %c0_i32_0, %c0_i32_1 : i32, i32, i32
  }
  func.func @transform_2(%arg0: i32) -> (i32, i32) {
    %c0_i32 = arith.constant 0 : i32
    %c0_i32_0 = arith.constant 0 : i32
    %c0_i32_1 = arith.constant 0 : i32
    return %c0_i32, %c0_i32_0 : i32, i32
  }
  func.func @transform_3(%arg0: i32) -> (i32, i32, i32) {
    %c0_i32 = arith.constant 0 : i32
    %c0_i32_0 = arith.constant 0 : i32
    %c0_i32_1 = arith.constant 0 : i32
    return %arg0, %c0_i32, %c0_i32_0 : i32, i32, i32
  }
}

module attributes {stable_mosaic.version = 11 : i64} {
  func.func @_conv_tap_kernel(%arg0: i32, %arg1: memref<1x4x56x8xbf16, #tpu.memory_space<vmem>>, %arg2: memref<16x8x16xbf16, #tpu.memory_space<vmem>>, %arg3: memref<1x16xf32, #tpu.memory_space<vmem>>, %arg4: memref<1x48x16xbf16, #tpu.memory_space<vmem>>) attributes {dimension_semantics = [#tpu.dimension_semantics<parallel>], iteration_bounds = array<i64: 2>, scalar_prefetch = 0 : i64, scratch_operands = 0 : i64, tpu.core_type = #tpu.core_type<tc>, window_params = [{transform_indices = @transform_0, window_bounds = array<i64: 1, 4, 56, 8>}, {pipeline_mode = #tpu.pipeline_mode<synchronous>, transform_indices = @transform_1, window_bounds = array<i64: 16, 8, 16>}, {pipeline_mode = #tpu.pipeline_mode<synchronous>, transform_indices = @transform_2, window_bounds = array<i64: 1, 16>}, {transform_indices = @transform_3, window_bounds = array<i64: 1, 48, 16>}]} {
    %cst = arith.constant 0.000000e+00 : f32
    %0 = vector.broadcast %cst : f32 to vector<48x16xf32>
    %c0 = arith.constant 0 : index
    %c0_0 = arith.constant 0 : index
    %c0_1 = arith.constant 0 : index
    %c0_2 = arith.constant 0 : index
    %1 = vector.load %arg1[%c0, %c0_0, %c0_1, %c0_2] : memref<1x4x56x8xbf16, #tpu.memory_space<vmem>>, vector<1x1x48x8xbf16>
    %2 = vector.shape_cast %1 : vector<1x1x48x8xbf16> to vector<48x8xbf16>
    %c0_3 = arith.constant 0 : index
    %c0_4 = arith.constant 0 : index
    %c0_5 = arith.constant 0 : index
    %3 = vector.load %arg2[%c0_3, %c0_4, %c0_5] : memref<16x8x16xbf16, #tpu.memory_space<vmem>>, vector<1x8x16xbf16>
    %4 = vector.shape_cast %3 : vector<1x8x16xbf16> to vector<8x16xbf16>
    %cst_6 = arith.constant dense<0.000000e+00> : vector<48x16xf32>
    %5 = tpu.matmul %2, %4, %cst_6 {dimension_numbers = #tpu.dot_dimension_numbers<[1], [0], [0], [1], [0, 0, 1, 1], [], []>} : vector<48x8xbf16>, vector<8x16xbf16>, vector<48x16xf32> -> vector<48x16xf32>
    %6 = arith.addf %0, %5 : vector<48x16xf32>
    %c0_7 = arith.constant 0 : index
    %c1 = arith.constant 1 : index
    %c0_8 = arith.constant 0 : index
    %c0_9 = arith.constant 0 : index
    %7 = vector.load %arg1[%c0_7, %c1, %c0_8, %c0_9] : memref<1x4x56x8xbf16, #tpu.memory_space<vmem>>, vector<1x1x48x8xbf16>
    %8 = vector.shape_cast %7 : vector<1x1x48x8xbf16> to vector<48x8xbf16>
    %c1_10 = arith.constant 1 : index
    %c0_11 = arith.constant 0 : index
    %c0_12 = arith.constant 0 : index
    %9 = vector.load %arg2[%c1_10, %c0_11, %c0_12] : memref<16x8x16xbf16, #tpu.memory_space<vmem>>, vector<1x8x16xbf16>
    %10 = vector.shape_cast %9 : vector<1x8x16xbf16> to vector<8x16xbf16>
    %cst_13 = arith.constant dense<0.000000e+00> : vector<48x16xf32>
    %11 = tpu.matmul %8, %10, %cst_13 {dimension_numbers = #tpu.dot_dimension_numbers<[1], [0], [0], [1], [0, 0, 1, 1], [], []>} : vector<48x8xbf16>, vector<8x16xbf16>, vector<48x16xf32> -> vector<48x16xf32>
    %12 = arith.addf %6, %11 : vector<48x16xf32>
    %c0_14 = arith.constant 0 : index
    %c0_15 = arith.constant 0 : index
    %c1_16 = arith.constant 1 : index
    %c0_17 = arith.constant 0 : index
    %13 = vector.load %arg1[%c0_14, %c0_15, %c1_16, %c0_17] : memref<1x4x56x8xbf16, #tpu.memory_space<vmem>>, vector<1x1x48x8xbf16>
    %14 = vector.shape_cast %13 : vector<1x1x48x8xbf16> to vector<48x8xbf16>
    %c2 = arith.constant 2 : index
    %c0_18 = arith.constant 0 : index
    %c0_19 = arith.constant 0 : index
    %15 = vector.load %arg2[%c2, %c0_18, %c0_19] : memref<16x8x16xbf16, #tpu.memory_space<vmem>>, vector<1x8x16xbf16>
    %16 = vector.shape_cast %15 : vector<1x8x16xbf16> to vector<8x16xbf16>
    %cst_20 = arith.constant dense<0.000000e+00> : vector<48x16xf32>
    %17 = tpu.matmul %14, %16, %cst_20 {dimension_numbers = #tpu.dot_dimension_numbers<[1], [0], [0], [1], [0, 0, 1, 1], [], []>} : vector<48x8xbf16>, vector<8x16xbf16>, vector<48x16xf32> -> vector<48x16xf32>
    %18 = arith.addf %12, %17 : vector<48x16xf32>
    %c0_21 = arith.constant 0 : index
    %c1_22 = arith.constant 1 : index
    %c1_23 = arith.constant 1 : index
    %c0_24 = arith.constant 0 : index
    %19 = vector.load %arg1[%c0_21, %c1_22, %c1_23, %c0_24] : memref<1x4x56x8xbf16, #tpu.memory_space<vmem>>, vector<1x1x48x8xbf16>
    %20 = vector.shape_cast %19 : vector<1x1x48x8xbf16> to vector<48x8xbf16>
    %c3 = arith.constant 3 : index
    %c0_25 = arith.constant 0 : index
    %c0_26 = arith.constant 0 : index
    %21 = vector.load %arg2[%c3, %c0_25, %c0_26] : memref<16x8x16xbf16, #tpu.memory_space<vmem>>, vector<1x8x16xbf16>
    %22 = vector.shape_cast %21 : vector<1x8x16xbf16> to vector<8x16xbf16>
    %cst_27 = arith.constant dense<0.000000e+00> : vector<48x16xf32>
    %23 = tpu.matmul %20, %22, %cst_27 {dimension_numbers = #tpu.dot_dimension_numbers<[1], [0], [0], [1], [0, 0, 1, 1], [], []>} : vector<48x8xbf16>, vector<8x16xbf16>, vector<48x16xf32> -> vector<48x16xf32>
    %24 = arith.addf %18, %23 : vector<48x16xf32>
    %c0_28 = arith.constant 0 : index
    %c2_29 = arith.constant 2 : index
    %c0_30 = arith.constant 0 : index
    %c0_31 = arith.constant 0 : index
    %25 = vector.load %arg1[%c0_28, %c2_29, %c0_30, %c0_31] : memref<1x4x56x8xbf16, #tpu.memory_space<vmem>>, vector<1x1x48x8xbf16>
    %26 = vector.shape_cast %25 : vector<1x1x48x8xbf16> to vector<48x8xbf16>
    %c4 = arith.constant 4 : index
    %c0_32 = arith.constant 0 : index
    %c0_33 = arith.constant 0 : index
    %27 = vector.load %arg2[%c4, %c0_32, %c0_33] : memref<16x8x16xbf16, #tpu.memory_space<vmem>>, vector<1x8x16xbf16>
    %28 = vector.shape_cast %27 : vector<1x8x16xbf16> to vector<8x16xbf16>
    %cst_34 = arith.constant dense<0.000000e+00> : vector<48x16xf32>
    %29 = tpu.matmul %26, %28, %cst_34 {dimension_numbers = #tpu.dot_dimension_numbers<[1], [0], [0], [1], [0, 0, 1, 1], [], []>} : vector<48x8xbf16>, vector<8x16xbf16>, vector<48x16xf32> -> vector<48x16xf32>
    %30 = arith.addf %24, %29 : vector<48x16xf32>
    %c0_35 = arith.constant 0 : index
    %c3_36 = arith.constant 3 : index
    %c0_37 = arith.constant 0 : index
    %c0_38 = arith.constant 0 : index
    %31 = vector.load %arg1[%c0_35, %c3_36, %c0_37, %c0_38] : memref<1x4x56x8xbf16, #tpu.memory_space<vmem>>, vector<1x1x48x8xbf16>
    %32 = vector.shape_cast %31 : vector<1x1x48x8xbf16> to vector<48x8xbf16>
    %c5 = arith.constant 5 : index
    %c0_39 = arith.constant 0 : index
    %c0_40 = arith.constant 0 : index
    %33 = vector.load %arg2[%c5, %c0_39, %c0_40] : memref<16x8x16xbf16, #tpu.memory_space<vmem>>, vector<1x8x16xbf16>
    %34 = vector.shape_cast %33 : vector<1x8x16xbf16> to vector<8x16xbf16>
    %cst_41 = arith.constant dense<0.000000e+00> : vector<48x16xf32>
    %35 = tpu.matmul %32, %34, %cst_41 {dimension_numbers = #tpu.dot_dimension_numbers<[1], [0], [0], [1], [0, 0, 1, 1], [], []>} : vector<48x8xbf16>, vector<8x16xbf16>, vector<48x16xf32> -> vector<48x16xf32>
    %36 = arith.addf %30, %35 : vector<48x16xf32>
    %c0_42 = arith.constant 0 : index
    %c2_43 = arith.constant 2 : index
    %c1_44 = arith.constant 1 : index
    %c0_45 = arith.constant 0 : index
    %37 = vector.load %arg1[%c0_42, %c2_43, %c1_44, %c0_45] : memref<1x4x56x8xbf16, #tpu.memory_space<vmem>>, vector<1x1x48x8xbf16>
    %38 = vector.shape_cast %37 : vector<1x1x48x8xbf16> to vector<48x8xbf16>
    %c6 = arith.constant 6 : index
    %c0_46 = arith.constant 0 : index
    %c0_47 = arith.constant 0 : index
    %39 = vector.load %arg2[%c6, %c0_46, %c0_47] : memref<16x8x16xbf16, #tpu.memory_space<vmem>>, vector<1x8x16xbf16>
    %40 = vector.shape_cast %39 : vector<1x8x16xbf16> to vector<8x16xbf16>
    %cst_48 = arith.constant dense<0.000000e+00> : vector<48x16xf32>
    %41 = tpu.matmul %38, %40, %cst_48 {dimension_numbers = #tpu.dot_dimension_numbers<[1], [0], [0], [1], [0, 0, 1, 1], [], []>} : vector<48x8xbf16>, vector<8x16xbf16>, vector<48x16xf32> -> vector<48x16xf32>
    %42 = arith.addf %36, %41 : vector<48x16xf32>
    %c0_49 = arith.constant 0 : index
    %c3_50 = arith.constant 3 : index
    %c1_51 = arith.constant 1 : index
    %c0_52 = arith.constant 0 : index
    %43 = vector.load %arg1[%c0_49, %c3_50, %c1_51, %c0_52] : memref<1x4x56x8xbf16, #tpu.memory_space<vmem>>, vector<1x1x48x8xbf16>
    %44 = vector.shape_cast %43 : vector<1x1x48x8xbf16> to vector<48x8xbf16>
    %c7 = arith.constant 7 : index
    %c0_53 = arith.constant 0 : index
    %c0_54 = arith.constant 0 : index
    %45 = vector.load %arg2[%c7, %c0_53, %c0_54] : memref<16x8x16xbf16, #tpu.memory_space<vmem>>, vector<1x8x16xbf16>
    %46 = vector.shape_cast %45 : vector<1x8x16xbf16> to vector<8x16xbf16>
    %cst_55 = arith.constant dense<0.000000e+00> : vector<48x16xf32>
    %47 = tpu.matmul %44, %46, %cst_55 {dimension_numbers = #tpu.dot_dimension_numbers<[1], [0], [0], [1], [0, 0, 1, 1], [], []>} : vector<48x8xbf16>, vector<8x16xbf16>, vector<48x16xf32> -> vector<48x16xf32>
    %48 = arith.addf %42, %47 : vector<48x16xf32>
    %c0_56 = arith.constant 0 : index
    %c0_57 = arith.constant 0 : index
    %c5_58 = arith.constant 5 : index
    %c0_59 = arith.constant 0 : index
    %49 = vector.load %arg1[%c0_56, %c0_57, %c5_58, %c0_59] : memref<1x4x56x8xbf16, #tpu.memory_space<vmem>>, vector<1x1x48x8xbf16>
    %50 = vector.shape_cast %49 : vector<1x1x48x8xbf16> to vector<48x8xbf16>
    %c8 = arith.constant 8 : index
    %c0_60 = arith.constant 0 : index
    %c0_61 = arith.constant 0 : index
    %51 = vector.load %arg2[%c8, %c0_60, %c0_61] : memref<16x8x16xbf16, #tpu.memory_space<vmem>>, vector<1x8x16xbf16>
    %52 = vector.shape_cast %51 : vector<1x8x16xbf16> to vector<8x16xbf16>
    %cst_62 = arith.constant dense<0.000000e+00> : vector<48x16xf32>
    %53 = tpu.matmul %50, %52, %cst_62 {dimension_numbers = #tpu.dot_dimension_numbers<[1], [0], [0], [1], [0, 0, 1, 1], [], []>} : vector<48x8xbf16>, vector<8x16xbf16>, vector<48x16xf32> -> vector<48x16xf32>
    %54 = arith.addf %48, %53 : vector<48x16xf32>
    %c0_63 = arith.constant 0 : index
    %c1_64 = arith.constant 1 : index
    %c5_65 = arith.constant 5 : index
    %c0_66 = arith.constant 0 : index
    %55 = vector.load %arg1[%c0_63, %c1_64, %c5_65, %c0_66] : memref<1x4x56x8xbf16, #tpu.memory_space<vmem>>, vector<1x1x48x8xbf16>
    %56 = vector.shape_cast %55 : vector<1x1x48x8xbf16> to vector<48x8xbf16>
    %c9 = arith.constant 9 : index
    %c0_67 = arith.constant 0 : index
    %c0_68 = arith.constant 0 : index
    %57 = vector.load %arg2[%c9, %c0_67, %c0_68] : memref<16x8x16xbf16, #tpu.memory_space<vmem>>, vector<1x8x16xbf16>
    %58 = vector.shape_cast %57 : vector<1x8x16xbf16> to vector<8x16xbf16>
    %cst_69 = arith.constant dense<0.000000e+00> : vector<48x16xf32>
    %59 = tpu.matmul %56, %58, %cst_69 {dimension_numbers = #tpu.dot_dimension_numbers<[1], [0], [0], [1], [0, 0, 1, 1], [], []>} : vector<48x8xbf16>, vector<8x16xbf16>, vector<48x16xf32> -> vector<48x16xf32>
    %60 = arith.addf %54, %59 : vector<48x16xf32>
    %c0_70 = arith.constant 0 : index
    %c0_71 = arith.constant 0 : index
    %c6_72 = arith.constant 6 : index
    %c0_73 = arith.constant 0 : index
    %61 = vector.load %arg1[%c0_70, %c0_71, %c6_72, %c0_73] : memref<1x4x56x8xbf16, #tpu.memory_space<vmem>>, vector<1x1x48x8xbf16>
    %62 = vector.shape_cast %61 : vector<1x1x48x8xbf16> to vector<48x8xbf16>
    %c10 = arith.constant 10 : index
    %c0_74 = arith.constant 0 : index
    %c0_75 = arith.constant 0 : index
    %63 = vector.load %arg2[%c10, %c0_74, %c0_75] : memref<16x8x16xbf16, #tpu.memory_space<vmem>>, vector<1x8x16xbf16>
    %64 = vector.shape_cast %63 : vector<1x8x16xbf16> to vector<8x16xbf16>
    %cst_76 = arith.constant dense<0.000000e+00> : vector<48x16xf32>
    %65 = tpu.matmul %62, %64, %cst_76 {dimension_numbers = #tpu.dot_dimension_numbers<[1], [0], [0], [1], [0, 0, 1, 1], [], []>} : vector<48x8xbf16>, vector<8x16xbf16>, vector<48x16xf32> -> vector<48x16xf32>
    %66 = arith.addf %60, %65 : vector<48x16xf32>
    %c0_77 = arith.constant 0 : index
    %c1_78 = arith.constant 1 : index
    %c6_79 = arith.constant 6 : index
    %c0_80 = arith.constant 0 : index
    %67 = vector.load %arg1[%c0_77, %c1_78, %c6_79, %c0_80] : memref<1x4x56x8xbf16, #tpu.memory_space<vmem>>, vector<1x1x48x8xbf16>
    %68 = vector.shape_cast %67 : vector<1x1x48x8xbf16> to vector<48x8xbf16>
    %c11 = arith.constant 11 : index
    %c0_81 = arith.constant 0 : index
    %c0_82 = arith.constant 0 : index
    %69 = vector.load %arg2[%c11, %c0_81, %c0_82] : memref<16x8x16xbf16, #tpu.memory_space<vmem>>, vector<1x8x16xbf16>
    %70 = vector.shape_cast %69 : vector<1x8x16xbf16> to vector<8x16xbf16>
    %cst_83 = arith.constant dense<0.000000e+00> : vector<48x16xf32>
    %71 = tpu.matmul %68, %70, %cst_83 {dimension_numbers = #tpu.dot_dimension_numbers<[1], [0], [0], [1], [0, 0, 1, 1], [], []>} : vector<48x8xbf16>, vector<8x16xbf16>, vector<48x16xf32> -> vector<48x16xf32>
    %72 = arith.addf %66, %71 : vector<48x16xf32>
    %c0_84 = arith.constant 0 : index
    %c2_85 = arith.constant 2 : index
    %c5_86 = arith.constant 5 : index
    %c0_87 = arith.constant 0 : index
    %73 = vector.load %arg1[%c0_84, %c2_85, %c5_86, %c0_87] : memref<1x4x56x8xbf16, #tpu.memory_space<vmem>>, vector<1x1x48x8xbf16>
    %74 = vector.shape_cast %73 : vector<1x1x48x8xbf16> to vector<48x8xbf16>
    %c12 = arith.constant 12 : index
    %c0_88 = arith.constant 0 : index
    %c0_89 = arith.constant 0 : index
    %75 = vector.load %arg2[%c12, %c0_88, %c0_89] : memref<16x8x16xbf16, #tpu.memory_space<vmem>>, vector<1x8x16xbf16>
    %76 = vector.shape_cast %75 : vector<1x8x16xbf16> to vector<8x16xbf16>
    %cst_90 = arith.constant dense<0.000000e+00> : vector<48x16xf32>
    %77 = tpu.matmul %74, %76, %cst_90 {dimension_numbers = #tpu.dot_dimension_numbers<[1], [0], [0], [1], [0, 0, 1, 1], [], []>} : vector<48x8xbf16>, vector<8x16xbf16>, vector<48x16xf32> -> vector<48x16xf32>
    %78 = arith.addf %72, %77 : vector<48x16xf32>
    %c0_91 = arith.constant 0 : index
    %c3_92 = arith.constant 3 : index
    %c5_93 = arith.constant 5 : index
    %c0_94 = arith.constant 0 : index
    %79 = vector.load %arg1[%c0_91, %c3_92, %c5_93, %c0_94] : memref<1x4x56x8xbf16, #tpu.memory_space<vmem>>, vector<1x1x48x8xbf16>
    %80 = vector.shape_cast %79 : vector<1x1x48x8xbf16> to vector<48x8xbf16>
    %c13 = arith.constant 13 : index
    %c0_95 = arith.constant 0 : index
    %c0_96 = arith.constant 0 : index
    %81 = vector.load %arg2[%c13, %c0_95, %c0_96] : memref<16x8x16xbf16, #tpu.memory_space<vmem>>, vector<1x8x16xbf16>
    %82 = vector.shape_cast %81 : vector<1x8x16xbf16> to vector<8x16xbf16>
    %cst_97 = arith.constant dense<0.000000e+00> : vector<48x16xf32>
    %83 = tpu.matmul %80, %82, %cst_97 {dimension_numbers = #tpu.dot_dimension_numbers<[1], [0], [0], [1], [0, 0, 1, 1], [], []>} : vector<48x8xbf16>, vector<8x16xbf16>, vector<48x16xf32> -> vector<48x16xf32>
    %84 = arith.addf %78, %83 : vector<48x16xf32>
    %c0_98 = arith.constant 0 : index
    %c2_99 = arith.constant 2 : index
    %c6_100 = arith.constant 6 : index
    %c0_101 = arith.constant 0 : index
    %85 = vector.load %arg1[%c0_98, %c2_99, %c6_100, %c0_101] : memref<1x4x56x8xbf16, #tpu.memory_space<vmem>>, vector<1x1x48x8xbf16>
    %86 = vector.shape_cast %85 : vector<1x1x48x8xbf16> to vector<48x8xbf16>
    %c14 = arith.constant 14 : index
    %c0_102 = arith.constant 0 : index
    %c0_103 = arith.constant 0 : index
    %87 = vector.load %arg2[%c14, %c0_102, %c0_103] : memref<16x8x16xbf16, #tpu.memory_space<vmem>>, vector<1x8x16xbf16>
    %88 = vector.shape_cast %87 : vector<1x8x16xbf16> to vector<8x16xbf16>
    %cst_104 = arith.constant dense<0.000000e+00> : vector<48x16xf32>
    %89 = tpu.matmul %86, %88, %cst_104 {dimension_numbers = #tpu.dot_dimension_numbers<[1], [0], [0], [1], [0, 0, 1, 1], [], []>} : vector<48x8xbf16>, vector<8x16xbf16>, vector<48x16xf32> -> vector<48x16xf32>
    %90 = arith.addf %84, %89 : vector<48x16xf32>
    %c0_105 = arith.constant 0 : index
    %c3_106 = arith.constant 3 : index
    %c6_107 = arith.constant 6 : index
    %c0_108 = arith.constant 0 : index
    %91 = vector.load %arg1[%c0_105, %c3_106, %c6_107, %c0_108] : memref<1x4x56x8xbf16, #tpu.memory_space<vmem>>, vector<1x1x48x8xbf16>
    %92 = vector.shape_cast %91 : vector<1x1x48x8xbf16> to vector<48x8xbf16>
    %c15 = arith.constant 15 : index
    %c0_109 = arith.constant 0 : index
    %c0_110 = arith.constant 0 : index
    %93 = vector.load %arg2[%c15, %c0_109, %c0_110] : memref<16x8x16xbf16, #tpu.memory_space<vmem>>, vector<1x8x16xbf16>
    %94 = vector.shape_cast %93 : vector<1x8x16xbf16> to vector<8x16xbf16>
    %cst_111 = arith.constant dense<0.000000e+00> : vector<48x16xf32>
    %95 = tpu.matmul %92, %94, %cst_111 {dimension_numbers = #tpu.dot_dimension_numbers<[1], [0], [0], [1], [0, 0, 1, 1], [], []>} : vector<48x8xbf16>, vector<8x16xbf16>, vector<48x16xf32> -> vector<48x16xf32>
    %96 = arith.addf %90, %95 : vector<48x16xf32>
    %c0_112 = arith.constant 0 : index
    %c0_113 = arith.constant 0 : index
    %97 = vector.load %arg3[%c0_112, %c0_113] : memref<1x16xf32, #tpu.memory_space<vmem>>, vector<1x16xf32>
    %98 = vector.broadcast %97 : vector<1x16xf32> to vector<48x16xf32>
    %99 = arith.addf %96, %98 : vector<48x16xf32>
    %cst_114 = arith.constant 0.000000e+00 : f32
    %100 = vector.broadcast %cst_114 : f32 to vector<48x16xf32>
    %101 = arith.cmpf ogt, %99, %100 : vector<48x16xf32>
    %cst_115 = arith.constant 2.000000e-01 : f32
    %102 = vector.broadcast %cst_115 : f32 to vector<48x16xf32>
    %103 = arith.mulf %102, %99 : vector<48x16xf32>
    %104 = arith.select %101, %99, %103 : vector<48x16xi1>, vector<48x16xf32>
    %105 = arith.truncf %104 : vector<48x16xf32> to vector<48x16xbf16>
    %c0_116 = arith.constant 0 : index
    %c0_117 = arith.constant 0 : index
    %c0_118 = arith.constant 0 : index
    %106 = vector.load %arg4[%c0_116, %c0_117, %c0_118] : memref<1x48x16xbf16, #tpu.memory_space<vmem>>, vector<1x48x16xbf16>
    %107 = vector.shape_cast %106 : vector<1x48x16xbf16> to vector<48x16xbf16>
    %108 = vector.shape_cast %105 : vector<48x16xbf16> to vector<1x48x16xbf16>
    tpu.vector_store %arg4[%c0_116, %c0_117, %c0_118], %108 {strides = array<i32>} : memref<1x48x16xbf16, #tpu.memory_space<vmem>>, vector<1x48x16xbf16>,
    return
  }
  func.func @transform_0(%arg0: i32) -> (i32, i32, i32, i32) {
    %c0_i32 = arith.constant 0 : i32
    %c0_i32_0 = arith.constant 0 : i32
    %c0_i32_1 = arith.constant 0 : i32
    %c0_i32_2 = arith.constant 0 : i32
    return %arg0, %c0_i32, %c0_i32_0, %c0_i32_1 : i32, i32, i32, i32
  }
  func.func @transform_1(%arg0: i32) -> (i32, i32, i32) {
    %c0_i32 = arith.constant 0 : i32
    %c0_i32_0 = arith.constant 0 : i32
    %c0_i32_1 = arith.constant 0 : i32
    %c0_i32_2 = arith.constant 0 : i32
    return %c0_i32, %c0_i32_0, %c0_i32_1 : i32, i32, i32
  }
  func.func @transform_2(%arg0: i32) -> (i32, i32) {
    %c0_i32 = arith.constant 0 : i32
    %c0_i32_0 = arith.constant 0 : i32
    %c0_i32_1 = arith.constant 0 : i32
    return %c0_i32, %c0_i32_0 : i32, i32
  }
  func.func @transform_3(%arg0: i32) -> (i32, i32, i32) {
    %c0_i32 = arith.constant 0 : i32
    %c0_i32_0 = arith.constant 0 : i32
    %c0_i32_1 = arith.constant 0 : i32
    return %arg0, %c0_i32, %c0_i32_0 : i32, i32, i32
  }
}

module attributes {stable_mosaic.version = 11 : i64} {
  func.func @_conv_tap_kernel(%arg0: i32, %arg1: memref<1x4x24x16xbf16, #tpu.memory_space<vmem>>, %arg2: memref<16x16x32xbf16, #tpu.memory_space<vmem>>, %arg3: memref<1x32xf32, #tpu.memory_space<vmem>>, %arg4: memref<1x8x32xbf16, #tpu.memory_space<vmem>>) attributes {dimension_semantics = [#tpu.dimension_semantics<parallel>], iteration_bounds = array<i64: 2>, scalar_prefetch = 0 : i64, scratch_operands = 0 : i64, tpu.core_type = #tpu.core_type<tc>, window_params = [{transform_indices = @transform_0, window_bounds = array<i64: 1, 4, 24, 16>}, {pipeline_mode = #tpu.pipeline_mode<synchronous>, transform_indices = @transform_1, window_bounds = array<i64: 16, 16, 32>}, {pipeline_mode = #tpu.pipeline_mode<synchronous>, transform_indices = @transform_2, window_bounds = array<i64: 1, 32>}, {transform_indices = @transform_3, window_bounds = array<i64: 1, 8, 32>}]} {
    %cst = arith.constant 0.000000e+00 : f32
    %0 = vector.broadcast %cst : f32 to vector<16x32xf32>
    %c0 = arith.constant 0 : index
    %c0_0 = arith.constant 0 : index
    %c0_1 = arith.constant 0 : index
    %c0_2 = arith.constant 0 : index
    %1 = vector.load %arg1[%c0, %c0_0, %c0_1, %c0_2] : memref<1x4x24x16xbf16, #tpu.memory_space<vmem>>, vector<1x1x16x16xbf16>
    %2 = vector.shape_cast %1 : vector<1x1x16x16xbf16> to vector<16x16xbf16>
    %c0_3 = arith.constant 0 : index
    %c0_4 = arith.constant 0 : index
    %c0_5 = arith.constant 0 : index
    %3 = vector.load %arg2[%c0_3, %c0_4, %c0_5] : memref<16x16x32xbf16, #tpu.memory_space<vmem>>, vector<1x16x32xbf16>
    %4 = vector.shape_cast %3 : vector<1x16x32xbf16> to vector<16x32xbf16>
    %cst_6 = arith.constant dense<0.000000e+00> : vector<16x32xf32>
    %5 = tpu.matmul %2, %4, %cst_6 {dimension_numbers = #tpu.dot_dimension_numbers<[1], [0], [0], [1], [0, 0, 1, 1], [], []>} : vector<16x16xbf16>, vector<16x32xbf16>, vector<16x32xf32> -> vector<16x32xf32>
    %6 = arith.addf %0, %5 : vector<16x32xf32>
    %c0_7 = arith.constant 0 : index
    %c1 = arith.constant 1 : index
    %c0_8 = arith.constant 0 : index
    %c0_9 = arith.constant 0 : index
    %7 = vector.load %arg1[%c0_7, %c1, %c0_8, %c0_9] : memref<1x4x24x16xbf16, #tpu.memory_space<vmem>>, vector<1x1x16x16xbf16>
    %8 = vector.shape_cast %7 : vector<1x1x16x16xbf16> to vector<16x16xbf16>
    %c1_10 = arith.constant 1 : index
    %c0_11 = arith.constant 0 : index
    %c0_12 = arith.constant 0 : index
    %9 = vector.load %arg2[%c1_10, %c0_11, %c0_12] : memref<16x16x32xbf16, #tpu.memory_space<vmem>>, vector<1x16x32xbf16>
    %10 = vector.shape_cast %9 : vector<1x16x32xbf16> to vector<16x32xbf16>
    %cst_13 = arith.constant dense<0.000000e+00> : vector<16x32xf32>
    %11 = tpu.matmul %8, %10, %cst_13 {dimension_numbers = #tpu.dot_dimension_numbers<[1], [0], [0], [1], [0, 0, 1, 1], [], []>} : vector<16x16xbf16>, vector<16x32xbf16>, vector<16x32xf32> -> vector<16x32xf32>
    %12 = arith.addf %6, %11 : vector<16x32xf32>
    %c0_14 = arith.constant 0 : index
    %c0_15 = arith.constant 0 : index
    %c1_16 = arith.constant 1 : index
    %c0_17 = arith.constant 0 : index
    %13 = vector.load %arg1[%c0_14, %c0_15, %c1_16, %c0_17] : memref<1x4x24x16xbf16, #tpu.memory_space<vmem>>, vector<1x1x16x16xbf16>
    %14 = vector.shape_cast %13 : vector<1x1x16x16xbf16> to vector<16x16xbf16>
    %c2 = arith.constant 2 : index
    %c0_18 = arith.constant 0 : index
    %c0_19 = arith.constant 0 : index
    %15 = vector.load %arg2[%c2, %c0_18, %c0_19] : memref<16x16x32xbf16, #tpu.memory_space<vmem>>, vector<1x16x32xbf16>
    %16 = vector.shape_cast %15 : vector<1x16x32xbf16> to vector<16x32xbf16>
    %cst_20 = arith.constant dense<0.000000e+00> : vector<16x32xf32>
    %17 = tpu.matmul %14, %16, %cst_20 {dimension_numbers = #tpu.dot_dimension_numbers<[1], [0], [0], [1], [0, 0, 1, 1], [], []>} : vector<16x16xbf16>, vector<16x32xbf16>, vector<16x32xf32> -> vector<16x32xf32>
    %18 = arith.addf %12, %17 : vector<16x32xf32>
    %c0_21 = arith.constant 0 : index
    %c1_22 = arith.constant 1 : index
    %c1_23 = arith.constant 1 : index
    %c0_24 = arith.constant 0 : index
    %19 = vector.load %arg1[%c0_21, %c1_22, %c1_23, %c0_24] : memref<1x4x24x16xbf16, #tpu.memory_space<vmem>>, vector<1x1x16x16xbf16>
    %20 = vector.shape_cast %19 : vector<1x1x16x16xbf16> to vector<16x16xbf16>
    %c3 = arith.constant 3 : index
    %c0_25 = arith.constant 0 : index
    %c0_26 = arith.constant 0 : index
    %21 = vector.load %arg2[%c3, %c0_25, %c0_26] : memref<16x16x32xbf16, #tpu.memory_space<vmem>>, vector<1x16x32xbf16>
    %22 = vector.shape_cast %21 : vector<1x16x32xbf16> to vector<16x32xbf16>
    %cst_27 = arith.constant dense<0.000000e+00> : vector<16x32xf32>
    %23 = tpu.matmul %20, %22, %cst_27 {dimension_numbers = #tpu.dot_dimension_numbers<[1], [0], [0], [1], [0, 0, 1, 1], [], []>} : vector<16x16xbf16>, vector<16x32xbf16>, vector<16x32xf32> -> vector<16x32xf32>
    %24 = arith.addf %18, %23 : vector<16x32xf32>
    %c0_28 = arith.constant 0 : index
    %c2_29 = arith.constant 2 : index
    %c0_30 = arith.constant 0 : index
    %c0_31 = arith.constant 0 : index
    %25 = vector.load %arg1[%c0_28, %c2_29, %c0_30, %c0_31] : memref<1x4x24x16xbf16, #tpu.memory_space<vmem>>, vector<1x1x16x16xbf16>
    %26 = vector.shape_cast %25 : vector<1x1x16x16xbf16> to vector<16x16xbf16>
    %c4 = arith.constant 4 : index
    %c0_32 = arith.constant 0 : index
    %c0_33 = arith.constant 0 : index
    %27 = vector.load %arg2[%c4, %c0_32, %c0_33] : memref<16x16x32xbf16, #tpu.memory_space<vmem>>, vector<1x16x32xbf16>
    %28 = vector.shape_cast %27 : vector<1x16x32xbf16> to vector<16x32xbf16>
    %cst_34 = arith.constant dense<0.000000e+00> : vector<16x32xf32>
    %29 = tpu.matmul %26, %28, %cst_34 {dimension_numbers = #tpu.dot_dimension_numbers<[1], [0], [0], [1], [0, 0, 1, 1], [], []>} : vector<16x16xbf16>, vector<16x32xbf16>, vector<16x32xf32> -> vector<16x32xf32>
    %30 = arith.addf %24, %29 : vector<16x32xf32>
    %c0_35 = arith.constant 0 : index
    %c3_36 = arith.constant 3 : index
    %c0_37 = arith.constant 0 : index
    %c0_38 = arith.constant 0 : index
    %31 = vector.load %arg1[%c0_35, %c3_36, %c0_37, %c0_38] : memref<1x4x24x16xbf16, #tpu.memory_space<vmem>>, vector<1x1x16x16xbf16>
    %32 = vector.shape_cast %31 : vector<1x1x16x16xbf16> to vector<16x16xbf16>
    %c5 = arith.constant 5 : index
    %c0_39 = arith.constant 0 : index
    %c0_40 = arith.constant 0 : index
    %33 = vector.load %arg2[%c5, %c0_39, %c0_40] : memref<16x16x32xbf16, #tpu.memory_space<vmem>>, vector<1x16x32xbf16>
    %34 = vector.shape_cast %33 : vector<1x16x32xbf16> to vector<16x32xbf16>
    %cst_41 = arith.constant dense<0.000000e+00> : vector<16x32xf32>
    %35 = tpu.matmul %32, %34, %cst_41 {dimension_numbers = #tpu.dot_dimension_numbers<[1], [0], [0], [1], [0, 0, 1, 1], [], []>} : vector<16x16xbf16>, vector<16x32xbf16>, vector<16x32xf32> -> vector<16x32xf32>
    %36 = arith.addf %30, %35 : vector<16x32xf32>
    %c0_42 = arith.constant 0 : index
    %c2_43 = arith.constant 2 : index
    %c1_44 = arith.constant 1 : index
    %c0_45 = arith.constant 0 : index
    %37 = vector.load %arg1[%c0_42, %c2_43, %c1_44, %c0_45] : memref<1x4x24x16xbf16, #tpu.memory_space<vmem>>, vector<1x1x16x16xbf16>
    %38 = vector.shape_cast %37 : vector<1x1x16x16xbf16> to vector<16x16xbf16>
    %c6 = arith.constant 6 : index
    %c0_46 = arith.constant 0 : index
    %c0_47 = arith.constant 0 : index
    %39 = vector.load %arg2[%c6, %c0_46, %c0_47] : memref<16x16x32xbf16, #tpu.memory_space<vmem>>, vector<1x16x32xbf16>
    %40 = vector.shape_cast %39 : vector<1x16x32xbf16> to vector<16x32xbf16>
    %cst_48 = arith.constant dense<0.000000e+00> : vector<16x32xf32>
    %41 = tpu.matmul %38, %40, %cst_48 {dimension_numbers = #tpu.dot_dimension_numbers<[1], [0], [0], [1], [0, 0, 1, 1], [], []>} : vector<16x16xbf16>, vector<16x32xbf16>, vector<16x32xf32> -> vector<16x32xf32>
    %42 = arith.addf %36, %41 : vector<16x32xf32>
    %c0_49 = arith.constant 0 : index
    %c3_50 = arith.constant 3 : index
    %c1_51 = arith.constant 1 : index
    %c0_52 = arith.constant 0 : index
    %43 = vector.load %arg1[%c0_49, %c3_50, %c1_51, %c0_52] : memref<1x4x24x16xbf16, #tpu.memory_space<vmem>>, vector<1x1x16x16xbf16>
    %44 = vector.shape_cast %43 : vector<1x1x16x16xbf16> to vector<16x16xbf16>
    %c7 = arith.constant 7 : index
    %c0_53 = arith.constant 0 : index
    %c0_54 = arith.constant 0 : index
    %45 = vector.load %arg2[%c7, %c0_53, %c0_54] : memref<16x16x32xbf16, #tpu.memory_space<vmem>>, vector<1x16x32xbf16>
    %46 = vector.shape_cast %45 : vector<1x16x32xbf16> to vector<16x32xbf16>
    %cst_55 = arith.constant dense<0.000000e+00> : vector<16x32xf32>
    %47 = tpu.matmul %44, %46, %cst_55 {dimension_numbers = #tpu.dot_dimension_numbers<[1], [0], [0], [1], [0, 0, 1, 1], [], []>} : vector<16x16xbf16>, vector<16x32xbf16>, vector<16x32xf32> -> vector<16x32xf32>
    %48 = arith.addf %42, %47 : vector<16x32xf32>
    %c0_56 = arith.constant 0 : index
    %c0_57 = arith.constant 0 : index
    %c3_58 = arith.constant 3 : index
    %c0_59 = arith.constant 0 : index
    %49 = vector.load %arg1[%c0_56, %c0_57, %c3_58, %c0_59] : memref<1x4x24x16xbf16, #tpu.memory_space<vmem>>, vector<1x1x16x16xbf16>
    %50 = vector.shape_cast %49 : vector<1x1x16x16xbf16> to vector<16x16xbf16>
    %c8 = arith.constant 8 : index
    %c0_60 = arith.constant 0 : index
    %c0_61 = arith.constant 0 : index
    %51 = vector.load %arg2[%c8, %c0_60, %c0_61] : memref<16x16x32xbf16, #tpu.memory_space<vmem>>, vector<1x16x32xbf16>
    %52 = vector.shape_cast %51 : vector<1x16x32xbf16> to vector<16x32xbf16>
    %cst_62 = arith.constant dense<0.000000e+00> : vector<16x32xf32>
    %53 = tpu.matmul %50, %52, %cst_62 {dimension_numbers = #tpu.dot_dimension_numbers<[1], [0], [0], [1], [0, 0, 1, 1], [], []>} : vector<16x16xbf16>, vector<16x32xbf16>, vector<16x32xf32> -> vector<16x32xf32>
    %54 = arith.addf %48, %53 : vector<16x32xf32>
    %c0_63 = arith.constant 0 : index
    %c1_64 = arith.constant 1 : index
    %c3_65 = arith.constant 3 : index
    %c0_66 = arith.constant 0 : index
    %55 = vector.load %arg1[%c0_63, %c1_64, %c3_65, %c0_66] : memref<1x4x24x16xbf16, #tpu.memory_space<vmem>>, vector<1x1x16x16xbf16>
    %56 = vector.shape_cast %55 : vector<1x1x16x16xbf16> to vector<16x16xbf16>
    %c9 = arith.constant 9 : index
    %c0_67 = arith.constant 0 : index
    %c0_68 = arith.constant 0 : index
    %57 = vector.load %arg2[%c9, %c0_67, %c0_68] : memref<16x16x32xbf16, #tpu.memory_space<vmem>>, vector<1x16x32xbf16>
    %58 = vector.shape_cast %57 : vector<1x16x32xbf16> to vector<16x32xbf16>
    %cst_69 = arith.constant dense<0.000000e+00> : vector<16x32xf32>
    %59 = tpu.matmul %56, %58, %cst_69 {dimension_numbers = #tpu.dot_dimension_numbers<[1], [0], [0], [1], [0, 0, 1, 1], [], []>} : vector<16x16xbf16>, vector<16x32xbf16>, vector<16x32xf32> -> vector<16x32xf32>
    %60 = arith.addf %54, %59 : vector<16x32xf32>
    %c0_70 = arith.constant 0 : index
    %c0_71 = arith.constant 0 : index
    %c4_72 = arith.constant 4 : index
    %c0_73 = arith.constant 0 : index
    %61 = vector.load %arg1[%c0_70, %c0_71, %c4_72, %c0_73] : memref<1x4x24x16xbf16, #tpu.memory_space<vmem>>, vector<1x1x16x16xbf16>
    %62 = vector.shape_cast %61 : vector<1x1x16x16xbf16> to vector<16x16xbf16>
    %c10 = arith.constant 10 : index
    %c0_74 = arith.constant 0 : index
    %c0_75 = arith.constant 0 : index
    %63 = vector.load %arg2[%c10, %c0_74, %c0_75] : memref<16x16x32xbf16, #tpu.memory_space<vmem>>, vector<1x16x32xbf16>
    %64 = vector.shape_cast %63 : vector<1x16x32xbf16> to vector<16x32xbf16>
    %cst_76 = arith.constant dense<0.000000e+00> : vector<16x32xf32>
    %65 = tpu.matmul %62, %64, %cst_76 {dimension_numbers = #tpu.dot_dimension_numbers<[1], [0], [0], [1], [0, 0, 1, 1], [], []>} : vector<16x16xbf16>, vector<16x32xbf16>, vector<16x32xf32> -> vector<16x32xf32>
    %66 = arith.addf %60, %65 : vector<16x32xf32>
    %c0_77 = arith.constant 0 : index
    %c1_78 = arith.constant 1 : index
    %c4_79 = arith.constant 4 : index
    %c0_80 = arith.constant 0 : index
    %67 = vector.load %arg1[%c0_77, %c1_78, %c4_79, %c0_80] : memref<1x4x24x16xbf16, #tpu.memory_space<vmem>>, vector<1x1x16x16xbf16>
    %68 = vector.shape_cast %67 : vector<1x1x16x16xbf16> to vector<16x16xbf16>
    %c11 = arith.constant 11 : index
    %c0_81 = arith.constant 0 : index
    %c0_82 = arith.constant 0 : index
    %69 = vector.load %arg2[%c11, %c0_81, %c0_82] : memref<16x16x32xbf16, #tpu.memory_space<vmem>>, vector<1x16x32xbf16>
    %70 = vector.shape_cast %69 : vector<1x16x32xbf16> to vector<16x32xbf16>
    %cst_83 = arith.constant dense<0.000000e+00> : vector<16x32xf32>
    %71 = tpu.matmul %68, %70, %cst_83 {dimension_numbers = #tpu.dot_dimension_numbers<[1], [0], [0], [1], [0, 0, 1, 1], [], []>} : vector<16x16xbf16>, vector<16x32xbf16>, vector<16x32xf32> -> vector<16x32xf32>
    %72 = arith.addf %66, %71 : vector<16x32xf32>
    %c0_84 = arith.constant 0 : index
    %c2_85 = arith.constant 2 : index
    %c3_86 = arith.constant 3 : index
    %c0_87 = arith.constant 0 : index
    %73 = vector.load %arg1[%c0_84, %c2_85, %c3_86, %c0_87] : memref<1x4x24x16xbf16, #tpu.memory_space<vmem>>, vector<1x1x16x16xbf16>
    %74 = vector.shape_cast %73 : vector<1x1x16x16xbf16> to vector<16x16xbf16>
    %c12 = arith.constant 12 : index
    %c0_88 = arith.constant 0 : index
    %c0_89 = arith.constant 0 : index
    %75 = vector.load %arg2[%c12, %c0_88, %c0_89] : memref<16x16x32xbf16, #tpu.memory_space<vmem>>, vector<1x16x32xbf16>
    %76 = vector.shape_cast %75 : vector<1x16x32xbf16> to vector<16x32xbf16>
    %cst_90 = arith.constant dense<0.000000e+00> : vector<16x32xf32>
    %77 = tpu.matmul %74, %76, %cst_90 {dimension_numbers = #tpu.dot_dimension_numbers<[1], [0], [0], [1], [0, 0, 1, 1], [], []>} : vector<16x16xbf16>, vector<16x32xbf16>, vector<16x32xf32> -> vector<16x32xf32>
    %78 = arith.addf %72, %77 : vector<16x32xf32>
    %c0_91 = arith.constant 0 : index
    %c3_92 = arith.constant 3 : index
    %c3_93 = arith.constant 3 : index
    %c0_94 = arith.constant 0 : index
    %79 = vector.load %arg1[%c0_91, %c3_92, %c3_93, %c0_94] : memref<1x4x24x16xbf16, #tpu.memory_space<vmem>>, vector<1x1x16x16xbf16>
    %80 = vector.shape_cast %79 : vector<1x1x16x16xbf16> to vector<16x16xbf16>
    %c13 = arith.constant 13 : index
    %c0_95 = arith.constant 0 : index
    %c0_96 = arith.constant 0 : index
    %81 = vector.load %arg2[%c13, %c0_95, %c0_96] : memref<16x16x32xbf16, #tpu.memory_space<vmem>>, vector<1x16x32xbf16>
    %82 = vector.shape_cast %81 : vector<1x16x32xbf16> to vector<16x32xbf16>
    %cst_97 = arith.constant dense<0.000000e+00> : vector<16x32xf32>
    %83 = tpu.matmul %80, %82, %cst_97 {dimension_numbers = #tpu.dot_dimension_numbers<[1], [0], [0], [1], [0, 0, 1, 1], [], []>} : vector<16x16xbf16>, vector<16x32xbf16>, vector<16x32xf32> -> vector<16x32xf32>
    %84 = arith.addf %78, %83 : vector<16x32xf32>
    %c0_98 = arith.constant 0 : index
    %c2_99 = arith.constant 2 : index
    %c4_100 = arith.constant 4 : index
    %c0_101 = arith.constant 0 : index
    %85 = vector.load %arg1[%c0_98, %c2_99, %c4_100, %c0_101] : memref<1x4x24x16xbf16, #tpu.memory_space<vmem>>, vector<1x1x16x16xbf16>
    %86 = vector.shape_cast %85 : vector<1x1x16x16xbf16> to vector<16x16xbf16>
    %c14 = arith.constant 14 : index
    %c0_102 = arith.constant 0 : index
    %c0_103 = arith.constant 0 : index
    %87 = vector.load %arg2[%c14, %c0_102, %c0_103] : memref<16x16x32xbf16, #tpu.memory_space<vmem>>, vector<1x16x32xbf16>
    %88 = vector.shape_cast %87 : vector<1x16x32xbf16> to vector<16x32xbf16>
    %cst_104 = arith.constant dense<0.000000e+00> : vector<16x32xf32>
    %89 = tpu.matmul %86, %88, %cst_104 {dimension_numbers = #tpu.dot_dimension_numbers<[1], [0], [0], [1], [0, 0, 1, 1], [], []>} : vector<16x16xbf16>, vector<16x32xbf16>, vector<16x32xf32> -> vector<16x32xf32>
    %90 = arith.addf %84, %89 : vector<16x32xf32>
    %c0_105 = arith.constant 0 : index
    %c3_106 = arith.constant 3 : index
    %c4_107 = arith.constant 4 : index
    %c0_108 = arith.constant 0 : index
    %91 = vector.load %arg1[%c0_105, %c3_106, %c4_107, %c0_108] : memref<1x4x24x16xbf16, #tpu.memory_space<vmem>>, vector<1x1x16x16xbf16>
    %92 = vector.shape_cast %91 : vector<1x1x16x16xbf16> to vector<16x16xbf16>
    %c15 = arith.constant 15 : index
    %c0_109 = arith.constant 0 : index
    %c0_110 = arith.constant 0 : index
    %93 = vector.load %arg2[%c15, %c0_109, %c0_110] : memref<16x16x32xbf16, #tpu.memory_space<vmem>>, vector<1x16x32xbf16>
    %94 = vector.shape_cast %93 : vector<1x16x32xbf16> to vector<16x32xbf16>
    %cst_111 = arith.constant dense<0.000000e+00> : vector<16x32xf32>
    %95 = tpu.matmul %92, %94, %cst_111 {dimension_numbers = #tpu.dot_dimension_numbers<[1], [0], [0], [1], [0, 0, 1, 1], [], []>} : vector<16x16xbf16>, vector<16x32xbf16>, vector<16x32xf32> -> vector<16x32xf32>
    %96 = arith.addf %90, %95 : vector<16x32xf32>
    %c0_112 = arith.constant 0 : index
    %c0_113 = arith.constant 0 : index
    %97 = vector.load %arg3[%c0_112, %c0_113] : memref<1x32xf32, #tpu.memory_space<vmem>>, vector<1x32xf32>
    %98 = vector.broadcast %97 : vector<1x32xf32> to vector<16x32xf32>
    %99 = arith.addf %96, %98 : vector<16x32xf32>
    %100 = vector.extract_strided_slice %99 {offsets = [0, 0], sizes = [2, 32], strides = [1, 1]} : vector<16x32xf32> to vector<2x32xf32>
    %101 = arith.truncf %100 : vector<2x32xf32> to vector<2x32xbf16>
    %c0_114 = arith.constant 0 : index
    %c0_115 = arith.constant 0 : index
    %c0_116 = arith.constant 0 : index
    %102 = vector.load %arg4[%c0_114, %c0_115, %c0_116] : memref<1x8x32xbf16, #tpu.memory_space<vmem>>, vector<1x2x32xbf16>
    %103 = vector.shape_cast %102 : vector<1x2x32xbf16> to vector<2x32xbf16>
    %104 = vector.shape_cast %101 : vector<2x32xbf16> to vector<1x2x32xbf16>
    tpu.vector_store %arg4[%c0_114, %c0_115, %c0_116], %104 {strides = array<i32>} : memref<1x8x32xbf16, #tpu.memory_space<vmem>>, vector<1x2x32xbf16>,
    %105 = vector.extract_strided_slice %99 {offsets = [3, 0], sizes = [2, 32], strides = [1, 1]} : vector<16x32xf32> to vector<2x32xf32>
    %106 = arith.truncf %105 : vector<2x32xf32> to vector<2x32xbf16>
    %c0_117 = arith.constant 0 : index
    %c2_118 = arith.constant 2 : index
    %c0_119 = arith.constant 0 : index
    %107 = vector.load %arg4[%c0_117, %c2_118, %c0_119] : memref<1x8x32xbf16, #tpu.memory_space<vmem>>, vector<1x2x32xbf16>
    %108 = vector.shape_cast %107 : vector<1x2x32xbf16> to vector<2x32xbf16>
    %109 = vector.shape_cast %106 : vector<2x32xbf16> to vector<1x2x32xbf16>
    tpu.vector_store %arg4[%c0_117, %c2_118, %c0_119], %109 {strides = array<i32>} : memref<1x8x32xbf16, #tpu.memory_space<vmem>>, vector<1x2x32xbf16>,
    %110 = vector.extract_strided_slice %99 {offsets = [6, 0], sizes = [2, 32], strides = [1, 1]} : vector<16x32xf32> to vector<2x32xf32>
    %111 = arith.truncf %110 : vector<2x32xf32> to vector<2x32xbf16>
    %c0_120 = arith.constant 0 : index
    %c4_121 = arith.constant 4 : index
    %c0_122 = arith.constant 0 : index
    %112 = vector.load %arg4[%c0_120, %c4_121, %c0_122] : memref<1x8x32xbf16, #tpu.memory_space<vmem>>, vector<1x2x32xbf16>
    %113 = vector.shape_cast %112 : vector<1x2x32xbf16> to vector<2x32xbf16>
    %114 = vector.shape_cast %111 : vector<2x32xbf16> to vector<1x2x32xbf16>
    tpu.vector_store %arg4[%c0_120, %c4_121, %c0_122], %114 {strides = array<i32>} : memref<1x8x32xbf16, #tpu.memory_space<vmem>>, vector<1x2x32xbf16>,
    %115 = vector.extract_strided_slice %99 {offsets = [9, 0], sizes = [2, 32], strides = [1, 1]} : vector<16x32xf32> to vector<2x32xf32>
    %116 = arith.truncf %115 : vector<2x32xf32> to vector<2x32xbf16>
    %c0_123 = arith.constant 0 : index
    %c6_124 = arith.constant 6 : index
    %c0_125 = arith.constant 0 : index
    %117 = vector.load %arg4[%c0_123, %c6_124, %c0_125] : memref<1x8x32xbf16, #tpu.memory_space<vmem>>, vector<1x2x32xbf16>
    %118 = vector.shape_cast %117 : vector<1x2x32xbf16> to vector<2x32xbf16>
    %119 = vector.shape_cast %116 : vector<2x32xbf16> to vector<1x2x32xbf16>
    tpu.vector_store %arg4[%c0_123, %c6_124, %c0_125], %119 {strides = array<i32>} : memref<1x8x32xbf16, #tpu.memory_space<vmem>>, vector<1x2x32xbf16>,
    return
  }
  func.func @transform_0(%arg0: i32) -> (i32, i32, i32, i32) {
    %c0_i32 = arith.constant 0 : i32
    %c0_i32_0 = arith.constant 0 : i32
    %c0_i32_1 = arith.constant 0 : i32
    %c0_i32_2 = arith.constant 0 : i32
    return %arg0, %c0_i32, %c0_i32_0, %c0_i32_1 : i32, i32, i32, i32
  }
  func.func @transform_1(%arg0: i32) -> (i32, i32, i32) {
    %c0_i32 = arith.constant 0 : i32
    %c0_i32_0 = arith.constant 0 : i32
    %c0_i32_1 = arith.constant 0 : i32
    %c0_i32_2 = arith.constant 0 : i32
    return %c0_i32, %c0_i32_0, %c0_i32_1 : i32, i32, i32
  }
  func.func @transform_2(%arg0: i32) -> (i32, i32) {
    %c0_i32 = arith.constant 0 : i32
    %c0_i32_0 = arith.constant 0 : i32
    %c0_i32_1 = arith.constant 0 : i32
    return %c0_i32, %c0_i32_0 : i32, i32
  }
  func.func @transform_3(%arg0: i32) -> (i32, i32, i32) {
    %c0_i32 = arith.constant 0 : i32
    %c0_i32_0 = arith.constant 0 : i32
    %c0_i32_1 = arith.constant 0 : i32
    return %arg0, %c0_i32, %c0_i32_0 : i32, i32, i32
  }
}

module attributes {stable_mosaic.version = 11 : i64} {
  func.func @_head_kernel(%arg0: i32, %arg1: memref<8x8xbf16, #tpu.memory_space<vmem>>, %arg2: memref<8x256xbf16, #tpu.memory_space<vmem>>, %arg3: memref<8x32xbf16, #tpu.memory_space<vmem>>, %arg4: memref<1x32xf32, #tpu.memory_space<vmem>>, %arg5: memref<32x32xbf16, #tpu.memory_space<vmem>>, %arg6: memref<1x32xf32, #tpu.memory_space<vmem>>, %arg7: memref<32x32xbf16, #tpu.memory_space<vmem>>, %arg8: memref<256x32xbf16, #tpu.memory_space<vmem>>, %arg9: memref<1x32xf32, #tpu.memory_space<vmem>>, %arg10: memref<32x32xbf16, #tpu.memory_space<vmem>>, %arg11: memref<1x32xf32, #tpu.memory_space<vmem>>, %arg12: memref<32x32xbf16, #tpu.memory_space<vmem>>, %arg13: memref<1x32xf32, #tpu.memory_space<vmem>>, %arg14: memref<32x32xbf16, #tpu.memory_space<vmem>>, %arg15: memref<1x32xf32, #tpu.memory_space<vmem>>, %arg16: memref<32x128xbf16, #tpu.memory_space<vmem>>, %arg17: memref<1x128xf32, #tpu.memory_space<vmem>>, %arg18: memref<8x128xf32, #tpu.memory_space<vmem>>) attributes {dimension_semantics = [#tpu.dimension_semantics<parallel>], iteration_bounds = array<i64: 1>, scalar_prefetch = 0 : i64, scratch_operands = 0 : i64, tpu.core_type = #tpu.core_type<tc>, window_params = [{transform_indices = @transform_0, window_bounds = array<i64: 8, 8>}, {transform_indices = @transform_1, window_bounds = array<i64: 8, 256>}, {pipeline_mode = #tpu.pipeline_mode<synchronous>, transform_indices = @transform_2, window_bounds = array<i64: 8, 32>}, {pipeline_mode = #tpu.pipeline_mode<synchronous>, transform_indices = @transform_3, window_bounds = array<i64: 1, 32>}, {pipeline_mode = #tpu.pipeline_mode<synchronous>, transform_indices = @transform_4, window_bounds = array<i64: 32, 32>}, {pipeline_mode = #tpu.pipeline_mode<synchronous>, transform_indices = @transform_5, window_bounds = array<i64: 1, 32>}, {pipeline_mode = #tpu.pipeline_mode<synchronous>, transform_indices = @transform_6, window_bounds = array<i64: 32, 32>}, {pipeline_mode = #tpu.pipeline_mode<synchronous>, transform_indices = @transform_7, window_bounds = array<i64: 256, 32>}, {pipeline_mode = #tpu.pipeline_mode<synchronous>, transform_indices = @transform_8, window_bounds = array<i64: 1, 32>}, {pipeline_mode = #tpu.pipeline_mode<synchronous>, transform_indices = @transform_9, window_bounds = array<i64: 32, 32>}, {pipeline_mode = #tpu.pipeline_mode<synchronous>, transform_indices = @transform_10, window_bounds = array<i64: 1, 32>}, {pipeline_mode = #tpu.pipeline_mode<synchronous>, transform_indices = @transform_11, window_bounds = array<i64: 32, 32>}, {pipeline_mode = #tpu.pipeline_mode<synchronous>, transform_indices = @transform_12, window_bounds = array<i64: 1, 32>}, {pipeline_mode = #tpu.pipeline_mode<synchronous>, transform_indices = @transform_13, window_bounds = array<i64: 32, 32>}, {pipeline_mode = #tpu.pipeline_mode<synchronous>, transform_indices = @transform_14, window_bounds = array<i64: 1, 32>}, {pipeline_mode = #tpu.pipeline_mode<synchronous>, transform_indices = @transform_15, window_bounds = array<i64: 32, 128>}, {pipeline_mode = #tpu.pipeline_mode<synchronous>, transform_indices = @transform_16, window_bounds = array<i64: 1, 128>}, {transform_indices = @transform_17, window_bounds = array<i64: 8, 128>}]} {
    %c0 = arith.constant 0 : index
    %c0_0 = arith.constant 0 : index
    %0 = vector.load %arg1[%c0, %c0_0] : memref<8x8xbf16, #tpu.memory_space<vmem>>, vector<8x8xbf16>
    %c0_1 = arith.constant 0 : index
    %c0_2 = arith.constant 0 : index
    %1 = vector.load %arg3[%c0_1, %c0_2] : memref<8x32xbf16, #tpu.memory_space<vmem>>, vector<8x32xbf16>
    %cst = arith.constant dense<0.000000e+00> : vector<8x32xf32>
    %2 = tpu.matmul %0, %1, %cst {dimension_numbers = #tpu.dot_dimension_numbers<[1], [0], [0], [1], [0, 0, 1, 1], [], []>} : vector<8x8xbf16>, vector<8x32xbf16>, vector<8x32xf32> -> vector<8x32xf32>
    %c0_3 = arith.constant 0 : index
    %c0_4 = arith.constant 0 : index
    %3 = vector.load %arg4[%c0_3, %c0_4] : memref<1x32xf32, #tpu.memory_space<vmem>>, vector<1x32xf32>
    %4 = vector.broadcast %3 : vector<1x32xf32> to vector<8x32xf32>
    %5 = arith.addf %2, %4 : vector<8x32xf32>
    %cst_5 = arith.constant 0.000000e+00 : f32
    %6 = vector.broadcast %cst_5 : f32 to vector<8x32xf32>
    %7 = arith.cmpf ogt, %5, %6 : vector<8x32xf32>
    %cst_6 = arith.constant 2.000000e-01 : f32
    %8 = vector.broadcast %cst_6 : f32 to vector<8x32xf32>
    %9 = arith.mulf %8, %5 : vector<8x32xf32>
    %10 = arith.select %7, %5, %9 : vector<8x32xi1>, vector<8x32xf32>
    %11 = arith.truncf %10 : vector<8x32xf32> to vector<8x32xbf16>
    %c0_7 = arith.constant 0 : index
    %c0_8 = arith.constant 0 : index
    %12 = vector.load %arg5[%c0_7, %c0_8] : memref<32x32xbf16, #tpu.memory_space<vmem>>, vector<32x32xbf16>
    %cst_9 = arith.constant dense<0.000000e+00> : vector<8x32xf32>
    %13 = tpu.matmul %11, %12, %cst_9 {dimension_numbers = #tpu.dot_dimension_numbers<[1], [0], [0], [1], [0, 0, 1, 1], [], []>} : vector<8x32xbf16>, vector<32x32xbf16>, vector<8x32xf32> -> vector<8x32xf32>
    %c0_10 = arith.constant 0 : index
    %c0_11 = arith.constant 0 : index
    %14 = vector.load %arg6[%c0_10, %c0_11] : memref<1x32xf32, #tpu.memory_space<vmem>>, vector<1x32xf32>
    %15 = vector.broadcast %14 : vector<1x32xf32> to vector<8x32xf32>
    %16 = arith.addf %13, %15 : vector<8x32xf32>
    %cst_12 = arith.constant 0.000000e+00 : f32
    %17 = vector.broadcast %cst_12 : f32 to vector<8x32xf32>
    %18 = arith.cmpf ogt, %16, %17 : vector<8x32xf32>
    %cst_13 = arith.constant 2.000000e-01 : f32
    %19 = vector.broadcast %cst_13 : f32 to vector<8x32xf32>
    %20 = arith.mulf %19, %16 : vector<8x32xf32>
    %21 = arith.select %18, %16, %20 : vector<8x32xi1>, vector<8x32xf32>
    %c0_14 = arith.constant 0 : index
    %c0_15 = arith.constant 0 : index
    %22 = vector.load %arg2[%c0_14, %c0_15] : memref<8x256xbf16, #tpu.memory_space<vmem>>, vector<8x256xbf16>
    %c0_16 = arith.constant 0 : index
    %c0_17 = arith.constant 0 : index
    %23 = vector.load %arg8[%c0_16, %c0_17] : memref<256x32xbf16, #tpu.memory_space<vmem>>, vector<256x32xbf16>
    %cst_18 = arith.constant dense<0.000000e+00> : vector<8x32xf32>
    %24 = tpu.matmul %22, %23, %cst_18 {dimension_numbers = #tpu.dot_dimension_numbers<[1], [0], [0], [1], [0, 0, 1, 1], [], []>} : vector<8x256xbf16>, vector<256x32xbf16>, vector<8x32xf32> -> vector<8x32xf32>
    %25 = arith.truncf %21 : vector<8x32xf32> to vector<8x32xbf16>
    %c0_19 = arith.constant 0 : index
    %c0_20 = arith.constant 0 : index
    %26 = vector.load %arg7[%c0_19, %c0_20] : memref<32x32xbf16, #tpu.memory_space<vmem>>, vector<32x32xbf16>
    %cst_21 = arith.constant dense<0.000000e+00> : vector<8x32xf32>
    %27 = tpu.matmul %25, %26, %cst_21 {dimension_numbers = #tpu.dot_dimension_numbers<[1], [0], [0], [1], [0, 0, 1, 1], [], []>} : vector<8x32xbf16>, vector<32x32xbf16>, vector<8x32xf32> -> vector<8x32xf32>
    %28 = arith.addf %24, %27 : vector<8x32xf32>
    %c0_22 = arith.constant 0 : index
    %c0_23 = arith.constant 0 : index
    %29 = vector.load %arg9[%c0_22, %c0_23] : memref<1x32xf32, #tpu.memory_space<vmem>>, vector<1x32xf32>
    %30 = vector.broadcast %29 : vector<1x32xf32> to vector<8x32xf32>
    %31 = arith.addf %28, %30 : vector<8x32xf32>
    %32 = arith.truncf %31 : vector<8x32xf32> to vector<8x32xbf16>
    %c0_24 = arith.constant 0 : index
    %c0_25 = arith.constant 0 : index
    %33 = vector.load %arg10[%c0_24, %c0_25] : memref<32x32xbf16, #tpu.memory_space<vmem>>, vector<32x32xbf16>
    %cst_26 = arith.constant dense<0.000000e+00> : vector<8x32xf32>
    %34 = tpu.matmul %32, %33, %cst_26 {dimension_numbers = #tpu.dot_dimension_numbers<[1], [0], [0], [1], [0, 0, 1, 1], [], []>} : vector<8x32xbf16>, vector<32x32xbf16>, vector<8x32xf32> -> vector<8x32xf32>
    %c0_27 = arith.constant 0 : index
    %c0_28 = arith.constant 0 : index
    %35 = vector.load %arg11[%c0_27, %c0_28] : memref<1x32xf32, #tpu.memory_space<vmem>>, vector<1x32xf32>
    %36 = vector.broadcast %35 : vector<1x32xf32> to vector<8x32xf32>
    %37 = arith.addf %34, %36 : vector<8x32xf32>
    %cst_29 = arith.constant 0.000000e+00 : f32
    %38 = vector.broadcast %cst_29 : f32 to vector<8x32xf32>
    %39 = arith.maximumf %37, %38 : vector<8x32xf32>
    %40 = arith.truncf %39 : vector<8x32xf32> to vector<8x32xbf16>
    %c0_30 = arith.constant 0 : index
    %c0_31 = arith.constant 0 : index
    %41 = vector.load %arg12[%c0_30, %c0_31] : memref<32x32xbf16, #tpu.memory_space<vmem>>, vector<32x32xbf16>
    %cst_32 = arith.constant dense<0.000000e+00> : vector<8x32xf32>
    %42 = tpu.matmul %40, %41, %cst_32 {dimension_numbers = #tpu.dot_dimension_numbers<[1], [0], [0], [1], [0, 0, 1, 1], [], []>} : vector<8x32xbf16>, vector<32x32xbf16>, vector<8x32xf32> -> vector<8x32xf32>
    %c0_33 = arith.constant 0 : index
    %c0_34 = arith.constant 0 : index
    %43 = vector.load %arg13[%c0_33, %c0_34] : memref<1x32xf32, #tpu.memory_space<vmem>>, vector<1x32xf32>
    %44 = vector.broadcast %43 : vector<1x32xf32> to vector<8x32xf32>
    %45 = arith.addf %42, %44 : vector<8x32xf32>
    %cst_35 = arith.constant 0.000000e+00 : f32
    %46 = vector.broadcast %cst_35 : f32 to vector<8x32xf32>
    %47 = arith.maximumf %45, %46 : vector<8x32xf32>
    %48 = arith.truncf %47 : vector<8x32xf32> to vector<8x32xbf16>
    %c0_36 = arith.constant 0 : index
    %c0_37 = arith.constant 0 : index
    %49 = vector.load %arg14[%c0_36, %c0_37] : memref<32x32xbf16, #tpu.memory_space<vmem>>, vector<32x32xbf16>
    %cst_38 = arith.constant dense<0.000000e+00> : vector<8x32xf32>
    %50 = tpu.matmul %48, %49, %cst_38 {dimension_numbers = #tpu.dot_dimension_numbers<[1], [0], [0], [1], [0, 0, 1, 1], [], []>} : vector<8x32xbf16>, vector<32x32xbf16>, vector<8x32xf32> -> vector<8x32xf32>
    %c0_39 = arith.constant 0 : index
    %c0_40 = arith.constant 0 : index
    %51 = vector.load %arg15[%c0_39, %c0_40] : memref<1x32xf32, #tpu.memory_space<vmem>>, vector<1x32xf32>
    %52 = vector.broadcast %51 : vector<1x32xf32> to vector<8x32xf32>
    %53 = arith.addf %50, %52 : vector<8x32xf32>
    %cst_41 = arith.constant 0.000000e+00 : f32
    %54 = vector.broadcast %cst_41 : f32 to vector<8x32xf32>
    %55 = arith.maximumf %53, %54 : vector<8x32xf32>
    %56 = arith.truncf %55 : vector<8x32xf32> to vector<8x32xbf16>
    %c0_42 = arith.constant 0 : index
    %c0_43 = arith.constant 0 : index
    %57 = vector.load %arg16[%c0_42, %c0_43] : memref<32x128xbf16, #tpu.memory_space<vmem>>, vector<32x128xbf16>
    %cst_44 = arith.constant dense<0.000000e+00> : vector<8x128xf32>
    %58 = tpu.matmul %56, %57, %cst_44 {dimension_numbers = #tpu.dot_dimension_numbers<[1], [0], [0], [1], [0, 0, 1, 1], [], []>} : vector<8x32xbf16>, vector<32x128xbf16>, vector<8x128xf32> -> vector<8x128xf32>
    %c0_45 = arith.constant 0 : index
    %c0_46 = arith.constant 0 : index
    %59 = vector.load %arg17[%c0_45, %c0_46] : memref<1x128xf32, #tpu.memory_space<vmem>>, vector<1x128xf32>
    %60 = vector.broadcast %59 : vector<1x128xf32> to vector<8x128xf32>
    %61 = arith.addf %58, %60 : vector<8x128xf32>
    %62 = arith.mulf %61, %61 : vector<8x128xf32>
    %63 = arith.mulf %62, %61 : vector<8x128xf32>
    %64 = tpu.iota {dimensions = array<i32: 1>} : vector<8x128xi32>
    %c1_i32 = arith.constant 1 : i32
    %65 = vector.broadcast %c1_i32 : i32 to vector<8x128xi32>
    %66 = arith.cmpi eq, %64, %65 : vector<8x128xi32>
    %67 = arith.select %66, %63, %61 : vector<8x128xi1>, vector<8x128xf32>
    %c0_47 = arith.constant 0 : index
    %c0_48 = arith.constant 0 : index
    %68 = vector.load %arg18[%c0_47, %c0_48] : memref<8x128xf32, #tpu.memory_space<vmem>>, vector<8x128xf32>
    tpu.vector_store %arg18[%c0_47, %c0_48], %67 {strides = array<i32>} : memref<8x128xf32, #tpu.memory_space<vmem>>, vector<8x128xf32>,
    return
  }
  func.func @transform_0(%arg0: i32) -> (i32, i32) {
    %c0_i32 = arith.constant 0 : i32
    %c0_i32_0 = arith.constant 0 : i32
    return %arg0, %c0_i32 : i32, i32
  }
  func.func @transform_1(%arg0: i32) -> (i32, i32) {
    %c0_i32 = arith.constant 0 : i32
    %c0_i32_0 = arith.constant 0 : i32
    return %arg0, %c0_i32 : i32, i32
  }
  func.func @transform_2(%arg0: i32) -> (i32, i32) {
    %c0_i32 = arith.constant 0 : i32
    %c0_i32_0 = arith.constant 0 : i32
    %c0_i32_1 = arith.constant 0 : i32
    return %c0_i32, %c0_i32_0 : i32, i32
  }
  func.func @transform_3(%arg0: i32) -> (i32, i32) {
    %c0_i32 = arith.constant 0 : i32
    %c0_i32_0 = arith.constant 0 : i32
    %c0_i32_1 = arith.constant 0 : i32
    return %c0_i32, %c0_i32_0 : i32, i32
  }
  func.func @transform_4(%arg0: i32) -> (i32, i32) {
    %c0_i32 = arith.constant 0 : i32
    %c0_i32_0 = arith.constant 0 : i32
    %c0_i32_1 = arith.constant 0 : i32
    return %c0_i32, %c0_i32_0 : i32, i32
  }
  func.func @transform_5(%arg0: i32) -> (i32, i32) {
    %c0_i32 = arith.constant 0 : i32
    %c0_i32_0 = arith.constant 0 : i32
    %c0_i32_1 = arith.constant 0 : i32
    return %c0_i32, %c0_i32_0 : i32, i32
  }
  func.func @transform_6(%arg0: i32) -> (i32, i32) {
    %c0_i32 = arith.constant 0 : i32
    %c0_i32_0 = arith.constant 0 : i32
    %c0_i32_1 = arith.constant 0 : i32
    return %c0_i32, %c0_i32_0 : i32, i32
  }
  func.func @transform_7(%arg0: i32) -> (i32, i32) {
    %c0_i32 = arith.constant 0 : i32
    %c0_i32_0 = arith.constant 0 : i32
    %c0_i32_1 = arith.constant 0 : i32
    return %c0_i32, %c0_i32_0 : i32, i32
  }
  func.func @transform_8(%arg0: i32) -> (i32, i32) {
    %c0_i32 = arith.constant 0 : i32
    %c0_i32_0 = arith.constant 0 : i32
    %c0_i32_1 = arith.constant 0 : i32
    return %c0_i32, %c0_i32_0 : i32, i32
  }
  func.func @transform_9(%arg0: i32) -> (i32, i32) {
    %c0_i32 = arith.constant 0 : i32
    %c0_i32_0 = arith.constant 0 : i32
    %c0_i32_1 = arith.constant 0 : i32
    return %c0_i32, %c0_i32_0 : i32, i32
  }
  func.func @transform_10(%arg0: i32) -> (i32, i32) {
    %c0_i32 = arith.constant 0 : i32
    %c0_i32_0 = arith.constant 0 : i32
    %c0_i32_1 = arith.constant 0 : i32
    return %c0_i32, %c0_i32_0 : i32, i32
  }
  func.func @transform_11(%arg0: i32) -> (i32, i32) {
    %c0_i32 = arith.constant 0 : i32
    %c0_i32_0 = arith.constant 0 : i32
    %c0_i32_1 = arith.constant 0 : i32
    return %c0_i32, %c0_i32_0 : i32, i32
  }
  func.func @transform_12(%arg0: i32) -> (i32, i32) {
    %c0_i32 = arith.constant 0 : i32
    %c0_i32_0 = arith.constant 0 : i32
    %c0_i32_1 = arith.constant 0 : i32
    return %c0_i32, %c0_i32_0 : i32, i32
  }
  func.func @transform_13(%arg0: i32) -> (i32, i32) {
    %c0_i32 = arith.constant 0 : i32
    %c0_i32_0 = arith.constant 0 : i32
    %c0_i32_1 = arith.constant 0 : i32
    return %c0_i32, %c0_i32_0 : i32, i32
  }
  func.func @transform_14(%arg0: i32) -> (i32, i32) {
    %c0_i32 = arith.constant 0 : i32
    %c0_i32_0 = arith.constant 0 : i32
    %c0_i32_1 = arith.constant 0 : i32
    return %c0_i32, %c0_i32_0 : i32, i32
  }
  func.func @transform_15(%arg0: i32) -> (i32, i32) {
    %c0_i32 = arith.constant 0 : i32
    %c0_i32_0 = arith.constant 0 : i32
    %c0_i32_1 = arith.constant 0 : i32
    return %c0_i32, %c0_i32_0 : i32, i32
  }
  func.func @transform_16(%arg0: i32) -> (i32, i32) {
    %c0_i32 = arith.constant 0 : i32
    %c0_i32_0 = arith.constant 0 : i32
    %c0_i32_1 = arith.constant 0 : i32
    return %c0_i32, %c0_i32_0 : i32, i32
  }
  func.func @transform_17(%arg0: i32) -> (i32, i32) {
    %c0_i32 = arith.constant 0 : i32
    %c0_i32_0 = arith.constant 0 : i32
    return %arg0, %c0_i32 : i32, i32
  }
}

</mosaic_0001>

<bundles_post_ra>
// kernel: deterministic_policy_forward.5
= control target key start
LH: loop header
LB: loop body
LE: loop exit
PB: predicated region body
PF: predicated region fallthrough
CT: control target
= control target key end

     0   :  { %s2531_s12 = smov 0   ;;  %s3176_s0 = inlined_call_operand.vmem [shape: bf16[2,4,56,8], index: 0, kind: input, shape index: {}]   ;;  %s3177_s1 = inlined_call_operand.vmem [shape: bf16[16,8,16], index: 1, kind: input, shape index: {}]   ;;  %s3178_s2 = inlined_call_operand.vmem [shape: f32[1,16], index: 2, kind: input, shape index: {}]   ;;  %s3179_s3 = inlined_call_operand.vmem [shape: bf16[2,48,16], index: 3, kind: output, shape index: {}]  }
   0x1 LB: > { %s1988_s13 = sadd.s32 4294967295, %s2507_s12   ;;  %p1992_p0 = scmp.ge.s32.totalorder %s2507_s12, 1  ;;  %s2507_s12 = sphi %s2531_s12, %s13_s12  }
   0x2   : > { %p137_p1 = scmp.lt.s32.totalorder %s2507_s12, 3 }
   0x4   : > { %p138_p2 = pnand %p1992_p0, %p137_p1 }
   0x5   : > { %p161_p3 = scmp.lt.s32.totalorder (!%p138_p2), %s1988_s13, 1 }
   0x6   : > { %141 = sbr.rel (%p138_p2) target bundleno = 410 (0x19a), region = 32 }
   0xb   : > { %v2001_v0 = vld [vmem:[%s3177_s1 + $0x4] sm:$0xf]  ;;  %vm213_vm0 = vcmask 1043456   ;;  %v178_v1 = vld [vmem:[%s3177_s1] sm:$0xf]  ;;  %v2509_v2 = vmov 0.0  }
   0xc   : > { %2225 = vmatprep.subr.bf16.mxu0 %v2509_v2  ;;  %v215_v3 = vsel %vm213_vm0, %v2001_v0, 0  ;;  %2239 = vmatprep.subr.bf16.mxu1 %v2509_v2  ;;  %v299_v4 = vsel %vm213_vm0, %v178_v1, 0  ;;  %vm2510_vm1 = vmmov 0   ;;  %s3181_s13 = smov (!%p161_p3, %s1988_s13), 1  ;;  %v2014_v5 = vld [vmem:[%s3177_s1 + $0x8] sm:$0xf] }
   0xd   : > { %2226 = vmatpush3.bf16.msra.mxu0 %v215_v3  ;;  %2240 = vmatpush3.bf16.msra.mxu1 %v299_v4  ;;  %s2449_s18 = smul.u32 112, %s3181_s13  ;;  %v2029_v6 = vld [vmem:[%s3177_s1 + $0xc] sm:$0xf]  ;;  %vm203_vm2 = vcmask 64512   ;;  %v424_v8 = vsel %vm213_vm0, %v2014_v5, 0  ;;  %vm1304_vm5 = vcmask 1044480  }
   0xe   : > { %2227 = vmatprep.mubr.msk.bf16.mxu0 %vm2510_vm1, %v2509_v2  ;;  %2241 = vmatprep.mubr.msk.bf16.mxu1 %vm2510_vm1, %v2509_v2  ;;  %v554_v10 = vsel %vm213_vm0, %v2029_v6, 0  ;;  %v2043_v20 = vld [vmem:[%s3177_s1 + $0x10] sm:$0xf]  ;;  %vm385_vm3 = vsmask.f32 7424  ;;  %s2450_s27 = smul.u32 24, %s3181_s13 }
   0xf   : > { %2253 = vmatprep.subr.bf16.mxu0 %v2509_v2  ;;  %2267 = vmatprep.subr.bf16.mxu1 %v2509_v2  ;;  %s2567_s25 = scalar_lea.vmem %s3176_s0, %s2449_s18  ;;  %v653_v24 = vsel %vm213_vm0, %v2043_v20, 0  ;;  %v2056_v27 = vld [vmem:[%s3177_s1 + $0x14] sm:$0xf]  ;;  %v2070_v46 = vld [vmem:[%s3177_s1 + $0x18] sm:$0xf]  ;;  %vm1926_vm7 = vcmask 125952  }
  0x10   : > { %v2461_v7 = vld [vmem:[%s2567_s25 + $0x1c] sm:$0xff]   ;;  %v2463_v11 = vld [vmem:[%s2567_s25 + $0x24] sm:$0xff]   ;;  %v2465_v25 = vld [vmem:[%s2567_s25 + $0x2c] sm:$0xff]   ;;  %v752_v40 = vsel %vm213_vm0, %v2056_v27, 0  ;;  %vm1087_vm4 = vsmask.f32 5376  ;;  %s3149_s29 = scalar_lea.vmem %s3179_s3, %s2450_s27 }
  0x11   : > { %v2462_v9 = vld [vmem:[%s2567_s25] sm:$0xff]   ;;  %2228 = vmatmul.mubr.msk.bf16.vlgmr.msra.gmra.mxu0 %vm203_vm2, %v2461_v7  ;;  %v2464_v14 = vld [vmem:[%s2567_s25 + $0x8] sm:$0xff]   ;;  %v2022_v16 = vld [vmem:[%s2567_s25 + $0x1c] sm:$0xf]  ;;  %v2647_v61 = vsel %vm213_vm0, %v2070_v46, 0 }
  0x12   : > { %2242 = vmatmul.mubr.msk.bf16.vlgmr.msra.gmra.mxu1 %vm203_vm2, %v2462_v9  ;;  %2254 = vmatpush3.bf16.msra.mxu0 %v424_v8  ;;  %v358_v12 = vld [vmem:[%s2567_s25] sm:$0xf]  ;;  %v2583_v13 = vld [vmem:[%s2567_s25 + $0x4] sm:$0xf]  ;;  %v2593_v18 = vld [vmem:[%s2567_s25 + $0x8] sm:$0xff]  }
  0x13   : > { %2268 = vmatpush3.bf16.msra.mxu1 %v554_v10  ;;  %2231 = vmatprep.mubr.msk.bf16.mxu0 %vm2510_vm1, %v2509_v2  ;;  %v2015_v15 = vcombine.low %v358_v12, %v2583_v13  ;;  %v2590_v17 = vld [vmem:[%s2567_s25 + $0x20] sm:$0xf]  ;;  %v2604_v22 = vld [vmem:[%s2567_s25 + $0x24] sm:$0xff]   ;;  %v394_v26 = vshll.u32 %v2593_v18, 16  ;;  %v2466_v28 = vld [vmem:[%s2567_s25 + $0x10] sm:$0xff]   ;;  %v398_v31 = vshrl.u32 %v2593_v18, 16 }
  0x14   : > { %2245 = vmatprep.mubr.msk.bf16.mxu1 %vm2510_vm1, %v2509_v2  ;;  %2281 = vmatprep.subr.bf16.mxu0 %v2509_v2  ;;  %v2030_v19 = vcombine.low %v2022_v16, %v2590_v17  ;;  %v2616_v30 = vld [vmem:[%s2567_s25 + $0x10] sm:$0xff]   ;;  %v524_v34 = vshll.u32 %v2604_v22, 16  ;;  %v2473_v35 = vld [vmem:[%s2567_s25 + $0x18] ss:$0 sps:$4 sm:$0x11]   ;;  %v528_v45 = vshrl.u32 %v2604_v22, 16 }
  0x15   : > { %2295 = vmatprep.subr.bf16.mxu1 %v2509_v2  ;;  %v389_v21 = vshll.u32 %v2015_v15, 16  ;;  %v387_v29 = vshrl.u32 %v2015_v15, 16  ;;  %v2622_v37 = vld [vmem:[%s2567_s25 + $0x2c] sm:$0xff]   ;;  %v2474_v38 = vld [vmem:[%s2567_s25 + $0x34] ss:$0 sps:$4 sm:$0x11]  }
  0x16   : > { %v519_v23 = vshll.u32 %v2030_v19, 16  ;;  %v517_v33 = vshrl.u32 %v2030_v19, 16  ;;  %v396_v39 = vrot.slane %v394_v26, 1  ;;  %v402_v41 = vshll.u32 %v2616_v30, 16  ;;  %v2063_v53 = vld [vmem:[%s2567_s25 + $0x38] sm:$0xf] }
  0x17   : > { %v391_v32 = vrot.slane %v389_v21, 1  ;;  %v1096_v42 = vrot.slane %v398_v31, 2  ;;  %v526_v44 = vrot.slane %v524_v34, 1  ;;  %v532_v48 = vshll.u32 %v2622_v37, 16  ;;  %v2643_v56 = vld [vmem:[%s2567_s25 + $0x3c] sm:$0xf] }
  0x18   : > { %v521_v36 = vrot.slane %v519_v23, 1  ;;  %v406_v49 = vshrl.u32 %v2616_v30, 16  ;;  %v410_v50 = vshll.u32 %v2473_v35, 16  ;;  %v536_v51 = vshrl.u32 %v2622_v37, 16  ;;  %v2085_v62 = vld [vmem:[%s3177_s1 + $0x1c] sm:$0xf] }
  0x19   : > { %2232 = vmatmul.mubr.msk.bf16.gmra.mxu0 %vm203_vm2, %v2463_v11  ;;  %v392_v43 = vor.u32 %v391_v32, %v387_v29  ;;  %v540_v52 = vshll.u32 %v2474_v38, 16  ;;  %v1097_v57 = vrot.slane %v394_v26, 3  ;;  %v1101_v58 = vrot.slane %v402_v41, 3  ;;  %v2655_v4 = vld [vmem:[%s2567_s25 + $0x40] sm:$0xff]   ;;  %v2662_v8 = vld [vmem:[%s2567_s25 + $0x48] sm:$0xff]  }
  0x1a   : > { %2246 = vmatmul.mubr.msk.bf16.gmra.mxu1 %vm203_vm2, %v2464_v14  ;;  %2235 = vmatprep.mubr.msk.bf16.mxu0 %vm2510_vm1, %v2509_v2  ;;  %v522_v47 = vor.u32 %v521_v36, %v517_v33  ;;  %v1100_v54 = vrot.slane %v406_v49, 2  ;;  %v404_v60 = vrot.slane %v402_v41, 1  ;;  %v400_v63 = vor.u32 %v398_v31, %v396_v39  ;;  %v2078_v15 = vld [vmem:[%s2567_s25 + $0x54] sm:$0xf]  ;;  %v2675_v16 = vld [vmem:[%s2567_s25 + $0x58] sm:$0xf] }
  0x1b   : > { %2249 = vmatprep.mubr.msk.bf16.mxu1 %vm2510_vm1, %v2509_v2  ;;  %v397_v55 = vsel %vm385_vm3, %v392_v43, %v396_v39  ;;  %v530_v0 = vor.u32 %v528_v45, %v526_v44  ;;  %v534_v1 = vrot.slane %v532_v48, 1  ;;  %v1206_v3 = vrot.slane %v528_v45, 2  ;;  %v2679_v20 = vld [vmem:[%s2567_s25 + $0x64] sm:$0xff]   ;;  %v2700_v31 = vld [vmem:[%s2567_s25 + $0x5c] sm:$0xff]  }
  0x1c   : > { %v527_v59 = vsel %vm385_vm3, %v522_v47, %v526_v44  ;;  %v408_v5 = vor.u32 %v406_v49, %v404_v60  ;;  %v412_v6 = vrot.slane %v410_v50, 1  ;;  %v2659_v7 = vcombine.low %v2063_v53, %v2643_v56  ;;  %v2488_v38 = vld [vmem:[%s2567_s25 + $0x6c] ss:$0 sps:$4 sm:$0x11]   ;;  %v2099_v43 = vld [vmem:[%s2567_s25 + $0x1c] sm:$0xc] }
  0x1d   : > { %v2664_v9 = vor.u32 %v1101_v58, %v1100_v54  ;;  %v538_v10 = vor.u32 %v536_v51, %v534_v1  ;;  %v542_v11 = vrot.slane %v540_v52, 1  ;;  %v2669_v12 = vor.u32 %v1097_v57, %v1096_v42  ;;  %v1077_v42 = vld [vmem:[%s2567_s25] sm:$0xc] }
  0x1e   : > { %v1207_v14 = vrot.slane %v524_v34, 3  ;;  %v860_v19 = vshll.u32 %v2662_v8, 16  ;;  %v405_v21 = vsel %vm385_vm3, %v400_v63, %v404_v60  ;;  %v535_v23 = vsel %vm385_vm3, %v530_v0, %v534_v1 }
  0x1f   : > { %v2693_v26 = vsel %vm1087_vm4, %v2669_v12, %v2664_v9  ;;  %v413_v27 = vsel %vm385_vm3, %v408_v5, %v412_v6  ;;  %v852_v29 = vshll.u32 %v2655_v4, 16  ;;  %v990_v32 = vshll.u32 %v2679_v20, 16 }
  0x20   : > { %v543_v33 = vsel %vm385_vm3, %v538_v10, %v542_v11  ;;  %v2706_v34 = vrot.slane %v860_v19, 1  ;;  %v864_v35 = vshrl.u32 %v2662_v8, 16  ;;  %v2711_v39 = vcombine.low %v2078_v15, %v2675_v16 }
  0x21   : > { %2236 = vmatmul.mubr.msk.bf16.gmra.mxu0 %vm203_vm2, %v2465_v25  ;;  %v2487_v25 = vld [vmem:[%s2567_s25 + $0x50] ss:$0 sps:$4 sm:$0x11]   ;;  %v994_v41 = vshrl.u32 %v2679_v20, 16  ;;  %v1208_v44 = vor.u32 %v1207_v14, %v1206_v3  ;;  %v856_v45 = vshrl.u32 %v2655_v4, 16  ;;  %v998_v49 = vshll.u32 %v2488_v38, 16 }
  0x22   : > { %2250 = vmatmul.mubr.msk.bf16.gmra.mxu1 %vm203_vm2, %v2466_v28  ;;  %2255 = vmatprep.mubr.msk.bf16.mxu0 %vm2510_vm1, %v2509_v2  ;;  %v847_v28 = vshll.u32 %v2659_v7, 16  ;;  %v868_v36 = vshll.u32 %v2487_v25, 16  ;;  %v866_v46 = vor.u32 %v864_v35, %v2706_v34  ;;  %v982_v50 = vshll.u32 %v2700_v31, 16 }
  0x23   : > { %2269 = vmatprep.mubr.msk.bf16.mxu1 %vm2510_vm1, %v2509_v2  ;;  %v2094_v53 = vcombine.low %v1077_v42, %v2583_v13  ;;  %v2102_v54 = vcombine.low %v2099_v43, %v2590_v17  ;;  %v986_v57 = vshrl.u32 %v2700_v31, 16  ;;  %v1210_v60 = vrot.slane %v536_v51, 2  ;;  %v1298_v51 = vld [vmem:[%s2567_s25] sm:$0x8] }
  0x24   : > { %v870_v47 = vrot.slane %v868_v36, 1  ;;  %v1211_v6 = vrot.slane %v532_v48, 3  ;;  %v2112_v48 = vld [vmem:[%s2567_s25 + $0x1c] sm:$0x8] }
  0x25   : > { %v1089_v63 = vshrl.u32 %v2094_v53, 16  ;;  %v1092_v0 = vshll.u32 %v2094_v53, 16  ;;  %v1199_v1 = vshrl.u32 %v2102_v54, 16  ;;  %v1202_v3 = vshll.u32 %v2102_v54, 16 }
  0x26   : > { %v2739_v58 = vsel %vm385_vm3, %v866_v46, %v870_v47  ;;  %v1212_v25 = vor.u32 %v1211_v6, %v1210_v60 }
  0x27   : > { %v1091_v14 = vrot.slane %v1089_v63, 2  ;;  %v1094_v15 = vrot.slane %v1092_v0, 3 }
  0x29   : > { %2256 = vmatmul.mubr.msk.bf16.vlgmr.msra.gmra.mxu0 %vm203_vm2, %v397_v55  ;;  %v2732_v55 = vld [vmem:[%s2567_s25 + $0x18] ss:$0 sps:$4 sm:$0x77]   ;;  %v1095_v43 = vor.u32 %v1094_v15, %v1091_v14 }
  0x2a   : > { %2270 = vmatmul.mubr.msk.bf16.vlgmr.msra.gmra.mxu1 %vm203_vm2, %v527_v59  ;;  %2282 = vmatpush3.bf16.msra.mxu0 %v653_v24  ;;  %v2687_v24 = vsel %vm213_vm0, %v2085_v62, 0  ;;  %v1000_v59 = vrot.slane %v998_v49, 1  ;;  %v2492_v62 = vld [vmem:[%s2567_s25 + $0x34] ss:$0 sps:$4 sm:$0x77]   ;;  %v1105_v10 = vshrl.u32 %v2732_v55, 16  ;;  %v2108_v49 = vcombine.low %v1298_v51, %v2583_v13 }
  0x2b   : > { %2296 = vmatpush3.bf16.msra.mxu1 %v752_v40  ;;  %2259 = vmatprep.mubr.msk.bf16.mxu0 %vm2510_vm1, %v2509_v2  ;;  %v2715_v40 = vrot.slane %v990_v32, 1  ;;  %v1108_v11 = vshll.u32 %v2732_v55, 16  ;;  %v1215_v42 = vshrl.u32 %v2492_v62, 16  ;;  %v1218_v47 = vshll.u32 %v2492_v62, 16  ;;  %v2126_v51 = vld [vmem:[%s2567_s25 + $0x54] sm:$0xc] }
  0x2c   : > { %2273 = vmatprep.mubr.msk.bf16.mxu1 %vm2510_vm1, %v2509_v2  ;;  %2309 = vmatprep.subr.bf16.mxu0 %v2509_v2  ;;  %v1107_v36 = vrot.slane %v1105_v10, 2  ;;  %v2763_v60 = vsel %vm1087_vm4, %v1095_v43, %v2669_v12  ;;  %v1305_v13 = vrot.slane %v2108_v49, 3  ;;  %v2114_v12 = vcombine.low %v2112_v48, %v2590_v17  ;;  %v2475_v14 = vld [vmem:[%s2567_s25 + $0x38] sm:$0xff]  }
  0x2d   : > { %2323 = vmatprep.subr.bf16.mxu1 %v2509_v2  ;;  %v996_v52 = vor.u32 %v994_v41, %v2715_v40  ;;  %v1110_v38 = vrot.slane %v1108_v11, 3  ;;  %v1217_v54 = vrot.slane %v1215_v42, 2  ;;  %v1220_v0 = vrot.slane %v1218_v47, 3  ;;  %v2816_v47 = vld [vmem:[%s2567_s25 + $0x50] ss:$0 sps:$4 sm:$0x77]  }
  0x2e   : > { %v1308_v10 = vrot.slane %v2616_v30, 3  ;;  %v1396_v11 = vrot.slane %v2622_v37, 3  ;;  %v1310_v17 = vrot.slane %v2732_v55, 3  ;;  %v1494_v30 = vrot.slane %v852_v29, 3 }
  0x2f   : > { %v2747_v5 = vsel %vm385_vm3, %v996_v52, %v1000_v59  ;;  %v2757_v52 = vsel %vm1087_vm4, %v1208_v44, %v1212_v25  ;;  %v1111_v53 = vor.u32 %v1110_v38, %v1107_v36  ;;  %v1306_v59 = vrot.slane %v2593_v18, 3  ;;  %v2476_v36 = vld [vmem:[%s2567_s25 + $0x54] sm:$0xff]  }
  0x30   : > { %v1493_v18 = vrot.slane %v856_v45, 2  ;;  %v977_v49 = vshll.u32 %v2711_v39, 16  ;;  %v1604_v48 = vrot.slane %v982_v50, 3 }
  0x31   : > { %2260 = vmatmul.mubr.msk.bf16.gmra.mxu0 %vm203_vm2, %v405_v21  ;;  %v1201_v21 = vrot.slane %v1199_v1, 2  ;;  %v2118_v1 = vld [vmem:[%s2567_s25 + $0x38] sm:$0xc]  ;;  %v2785_v6 = vsel %vm1304_vm5, %v1305_v13, %v1306_v59 }
  0x32   : > { %2274 = vmatmul.mubr.msk.bf16.gmra.mxu1 %vm203_vm2, %v535_v23  ;;  %2263 = vmatprep.mubr.msk.bf16.mxu0 %vm2510_vm1, %v2509_v2  ;;  %v1204_v23 = vrot.slane %v1202_v3, 3  ;;  %v1221_v3 = vor.u32 %v1220_v0, %v1217_v54  ;;  %v1495_v43 = vor.u32 %v1494_v30, %v1493_v18  ;;  %v2824_v54 = vld [vmem:[%s2567_s25 + $0x6c] ss:$0 sps:$4 sm:$0x77]   ;;  %v2478_v30 = vld [vmem:[%s2567_s25 + $0x5c] sm:$0xff]  }
  0x33   : > { %2277 = vmatprep.mubr.msk.bf16.mxu1 %vm2510_vm1, %v2509_v2 }
  0x34   : > { %v1205_v46 = vor.u32 %v1204_v23, %v1201_v21  ;;  %v2793_v15 = vsel %vm1087_vm4, %v1212_v25, %v1221_v3  ;;  %v2796_v21 = vsel %vm1304_vm5, %v1306_v59, %v1308_v10  ;;  %v2121_v23 = vcombine.low %v2118_v1, %v2643_v56 }
  0x35   : > { %v1608_v1 = vrot.slane %v990_v32, 3  ;;  %v1505_v32 = vshll.u32 %v2816_v47, 16 }
  0x36   : > { %v2766_v63 = vsel %vm1087_vm4, %v1205_v46, %v1208_v44  ;;  %v1394_v44 = vrot.slane %v2604_v22, 3  ;;  %v1398_v22 = vrot.slane %v2492_v62, 3  ;;  %v2809_v62 = vsel %vm1304_vm5, %v1308_v10, %v1310_v17 }
  0x37   : > { %v1486_v38 = vshrl.u32 %v2121_v23, 16  ;;  %v1489_v42 = vshll.u32 %v2121_v23, 16  ;;  %v2129_v46 = vcombine.low %v2126_v51, %v2675_v16  ;;  %v2140_v23 = vld [vmem:[%s2567_s25 + $0x54] sm:$0x8] }
  0x38   : > { %v2806_v55 = vsel %vm1304_vm5, %v1394_v44, %v1396_v11  ;;  %v2812_v25 = vsel %vm1304_vm5, %v1396_v11, %v1398_v22  ;;  %v2477_v11 = vld [vmem:[%s2567_s25 + $0x40] sm:$0xff]  }
  0x39   : > { %2264 = vmatmul.mubr.msk.bf16.gmra.mxu0 %vm203_vm2, %v413_v27  ;;  %v2775_v27 = vsel %vm1087_vm4, %v2664_v9, %v1111_v53  ;;  %v1393_v9 = vrot.slane %v2114_v12, 3  ;;  %v1497_v53 = vrot.slane %v864_v35, 2  ;;  %v1488_v59 = vrot.slane %v1486_v38, 2 }
  0x3a   : > { %2278 = vmatmul.mubr.msk.bf16.gmra.mxu1 %vm203_vm2, %v543_v33  ;;  %2283 = vmatprep.mubr.msk.bf16.mxu0 %vm2510_vm1, %v2509_v2  ;;  %v1603_v33 = vrot.slane %v986_v57, 2  ;;  %v1491_v0 = vrot.slane %v1489_v42, 3  ;;  %v1596_v13 = vshrl.u32 %v2129_v46, 16  ;;  %v1599_v18 = vshll.u32 %v2129_v46, 16 }
  0x3b   : > { %2297 = vmatprep.mubr.msk.bf16.mxu1 %vm2510_vm1, %v2509_v2  ;;  %v2803_v37 = vsel %vm1304_vm5, %v1393_v9, %v1394_v44  ;;  %v1498_v44 = vrot.slane %v860_v19, 3  ;;  %v1607_v35 = vrot.slane %v994_v41, 2  ;;  %v2134_v9 = vld [vmem:[%s2567_s25 + $0x38] sm:$0x8]  ;;  %v1507_v42 = vrot.slane %v1505_v32, 3  ;;  %v2479_v32 = vld [vmem:[%s2567_s25 + $0x48] sm:$0xff]  }
  0x3c   : > { %v1605_v12 = vor.u32 %v1604_v48, %v1603_v33  ;;  %v1492_v3 = vor.u32 %v1491_v0, %v1488_v59  ;;  %v1598_v10 = vrot.slane %v1596_v13, 2  ;;  %v1502_v33 = vshrl.u32 %v2816_v47, 16 }
  0x3d   : > { %v1499_v19 = vor.u32 %v1498_v44, %v1497_v53  ;;  %v1609_v41 = vor.u32 %v1608_v1, %v1607_v35  ;;  %v2136_v59 = vcombine.low %v2134_v9, %v2643_v56  ;;  %v1702_v0 = vrot.slane %v2655_v4, 3 }
  0x3e   : > { %v2848_v17 = vsel %vm1087_vm4, %v1492_v3, %v1495_v43  ;;  %v1504_v51 = vrot.slane %v1502_v33, 2  ;;  %v1790_v44 = vrot.slane %v2700_v31, 3  ;;  %v1706_v3 = vrot.slane %v2816_v47, 3  ;;  %v2107_v31 = vld [vmem:[%s3177_s1 + $0x28] sm:$0xf] }
  0x3f   : > { %v2857_v38 = vsel %vm1087_vm4, %v1605_v12, %v1609_v41  ;;  %v1701_v1 = vrot.slane %v2136_v59, 3  ;;  %v849_v9 = vrot.slane %v847_v28, 1  ;;  %v984_v28 = vrot.slane %v982_v50, 1 }
  0x40   : > { %v1508_v13 = vor.u32 %v1507_v42, %v1504_v51 }
  0x41   : > { %2284 = vmatmul.mubr.msk.bf16.vlgmr.msra.gmra.mxu0 %vm203_vm2, %v2475_v14  ;;  %v1615_v14 = vshll.u32 %v2824_v54, 16  ;;  %v2886_v47 = vsel %vm1304_vm5, %v1701_v1, %v1702_v0 }
  0x42   : > { %2298 = vmatmul.mubr.msk.bf16.vlgmr.msra.gmra.mxu1 %vm203_vm2, %v2476_v36  ;;  %2310 = vmatpush3.bf16.msra.mxu0 %v2647_v61  ;;  %v1601_v61 = vrot.slane %v1599_v18, 3  ;;  %v2854_v36 = vsel %vm1087_vm4, %v1495_v43, %v1499_v19  ;;  %v2142_v18 = vcombine.low %v2140_v23, %v2675_v16  ;;  %v1704_v43 = vrot.slane %v2662_v8, 3 }
  0x43   : > { %2324 = vmatpush3.bf16.msra.mxu1 %v2687_v24  ;;  %2287 = vmatprep.mubr.msk.bf16.mxu0 %vm2510_vm1, %v2509_v2  ;;  %v1612_v24 = vshrl.u32 %v2824_v54, 16  ;;  %v1617_v53 = vrot.slane %v1615_v14, 3  ;;  %v2874_v56 = vsel %vm1087_vm4, %v1499_v19, %v1508_v13  ;;  %v854_v14 = vrot.slane %v852_v29, 1 }
  0x44   : > { %2301 = vmatprep.mubr.msk.bf16.mxu1 %vm2510_vm1, %v2509_v2  ;;  %2337 = vmatprep.subr.bf16.mxu0 %v2509_v2  ;;  %v1602_v22 = vor.u32 %v1601_v61, %v1598_v10  ;;  %v1789_v16 = vrot.slane %v2142_v18, 3  ;;  %v2877_v8 = vsel %vm1304_vm5, %v1702_v0, %v1704_v43  ;;  %v1794_v10 = vrot.slane %v2824_v54, 3 }
  0x45   : > { %2351 = vmatprep.subr.bf16.mxu1 %v2509_v2  ;;  %v1614_v46 = vrot.slane %v1612_v24, 2  ;;  %v2892_v33 = vsel %vm1304_vm5, %v1704_v43, %v1706_v3  ;;  %v2480_v24 = vld [vmem:[%s2567_s25 + $0x64] sm:$0xff]   ;;  %v858_v50 = vor.u32 %v856_v45, %v854_v14 }
  0x46   : > { %v2860_v48 = vsel %vm1087_vm4, %v1602_v22, %v1605_v12  ;;  %v1792_v12 = vrot.slane %v2679_v20, 3  ;;  %v2895_v19 = vsel %vm1304_vm5, %v1789_v16, %v1790_v44  ;;  %v979_v22 = vrot.slane %v977_v49, 1  ;;  %v2101_v49 = vld [vmem:[%s3177_s1 + $0x24] sm:$0xf] }
  0x47   : > { %v1618_v35 = vor.u32 %v1617_v53, %v1614_v46  ;;  %v1233_v42 = vsel %vm213_vm0, %v2101_v49, 0  ;;  %v988_v46 = vor.u32 %v986_v57, %v984_v28  ;;  %v863_v53 = vsel %vm385_vm3, %v858_v50, %v2706_v34  ;;  %v2113_v34 = vld [vmem:[%s3177_s1 + $0x2c] sm:$0xf]  ;;  %v2128_v57 = vld [vmem:[%s3177_s1 + $0x34] sm:$0xf] }
  0x48   : > { %v2889_v61 = vsel %vm1304_vm5, %v1790_v44, %v1792_v12  ;;  %v2898_v54 = vsel %vm1304_vm5, %v1792_v12, %v1794_v10  ;;  %v1410_v45 = vsel %vm213_vm0, %v2113_v34, 0 }
  0x49   : > { %2288 = vmatmul.mubr.msk.bf16.gmra.mxu0 %vm203_vm2, %v2477_v11  ;;  %v2883_v20 = vsel %vm1087_vm4, %v1609_v41, %v1618_v35  ;;  %v845_v41 = vshrl.u32 %v2659_v7, 16  ;;  %v975_v11 = vshrl.u32 %v2711_v39, 16  ;;  %v2093_v39 = vld [vmem:[%s3177_s1 + $0x20] sm:$0xf]  ;;  %v993_v4 = vsel %vm385_vm3, %v988_v46, %v2715_v40 }
  0x4a   : > { %2302 = vmatmul.mubr.msk.bf16.gmra.mxu1 %vm203_vm2, %v2478_v30  ;;  %2291 = vmatprep.mubr.msk.bf16.mxu0 %vm2510_vm1, %v2509_v2  ;;  %v1123_v29 = vsel %vm213_vm0, %v2093_v39, 0  ;;  %v1322_v40 = vsel %vm213_vm0, %v2107_v31, 0 }
  0x4b   : > { %2305 = vmatprep.mubr.msk.bf16.mxu1 %vm2510_vm1, %v2509_v2  ;;  %v850_v51 = vor.u32 %v849_v9, %v845_v41  ;;  %v980_v7 = vor.u32 %v979_v22, %v975_v11 }
  0x4d   : > { %v855_v23 = vsel %vm385_vm3, %v850_v51, %v854_v14  ;;  %v985_v30 = vsel %vm385_vm3, %v980_v7, %v984_v28 }
  0x51   : > { %2292 = vmatmul.mubr.msk.bf16.gmra.mxu0 %vm203_vm2, %v2479_v32 }
  0x52   : > { %2306 = vmatmul.mubr.msk.bf16.gmra.mxu1 %vm203_vm2, %v2480_v24  ;;  %2311 = vmatprep.mubr.msk.bf16.mxu0 %vm2510_vm1, %v2509_v2 }
  0x53   : > { %2325 = vmatprep.mubr.msk.bf16.mxu1 %vm2510_vm1, %v2509_v2 }
  0x59   : > { %2312 = vmatmul.mubr.msk.bf16.vlgmr.msra.gmra.mxu0 %vm203_vm2, %v855_v23 }
  0x5a   : > { %2326 = vmatmul.mubr.msk.bf16.vlgmr.msra.gmra.mxu1 %vm203_vm2, %v985_v30  ;;  %2338 = vmatpush3.bf16.msra.mxu0 %v1123_v29 }
  0x5b   : > { %2352 = vmatpush3.bf16.msra.mxu1 %v1233_v42  ;;  %2315 = vmatprep.mubr.msk.bf16.mxu0 %vm2510_vm1, %v2509_v2 }
  0x5c   : > { %2329 = vmatprep.mubr.msk.bf16.mxu1 %vm2510_vm1, %v2509_v2  ;;  %2365 = vmatprep.subr.bf16.mxu0 %v2509_v2 }
  0x5d   : > { %2379 = vmatprep.subr.bf16.mxu1 %v2509_v2 }
  0x61   : > { %2316 = vmatmul.mubr.msk.bf16.gmra.mxu0 %vm203_vm2, %v863_v53 }
  0x62   : > { %2330 = vmatmul.mubr.msk.bf16.gmra.mxu1 %vm203_vm2, %v993_v4  ;;  %2319 = vmatprep.mubr.msk.bf16.mxu0 %vm2510_vm1, %v2509_v2 }
  0x63   : > { %2333 = vmatprep.mubr.msk.bf16.mxu1 %vm2510_vm1, %v2509_v2 }
  0x69   : > { %2320 = vmatmul.mubr.msk.bf16.gmra.mxu0 %vm203_vm2, %v2739_v58 }
  0x6a   : > { %2334 = vmatmul.mubr.msk.bf16.gmra.mxu1 %vm203_vm2, %v2747_v5  ;;  %2339 = vmatprep.mubr.msk.bf16.mxu0 %vm2510_vm1, %v2509_v2  ;;  %v1630_v5 = vsel %vm213_vm0, %v2128_v57, 0 }
  0x6b   : > { %2353 = vmatprep.mubr.msk.bf16.mxu1 %vm2510_vm1, %v2509_v2 }
  0x71   : > { %2340 = vmatmul.mubr.msk.bf16.vlgmr.msra.gmra.mxu0 %vm203_vm2, %v2763_v60  ;;  %v2141_v60 = vld [vmem:[%s3177_s1 + $0x3c] sm:$0xf] }
  0x72   : > { %2354 = vmatmul.mubr.msk.bf16.vlgmr.msra.gmra.mxu1 %vm203_vm2, %v2766_v63  ;;  %2366 = vmatpush3.bf16.msra.mxu0 %v1322_v40 }
  0x73   : > { %2380 = vmatpush3.bf16.msra.mxu1 %v1410_v45  ;;  %2343 = vmatprep.mubr.msk.bf16.mxu0 %vm2510_vm1, %v2509_v2 }
  0x74   : > { %2357 = vmatprep.mubr.msk.bf16.mxu1 %vm2510_vm1, %v2509_v2  ;;  %2393 = vmatprep.subr.bf16.mxu0 %v2509_v2 }
  0x75   : > { %2407 = vmatprep.subr.bf16.mxu1 %v2509_v2 }
  0x79   : > { %2344 = vmatmul.mubr.msk.bf16.gmra.mxu0 %vm203_vm2, %v2693_v26  ;;  %v2120_v26 = vld [vmem:[%s3177_s1 + $0x30] sm:$0xf] }
  0x7a   : > { %2358 = vmatmul.mubr.msk.bf16.gmra.mxu1 %vm203_vm2, %v2757_v52  ;;  %2347 = vmatprep.mubr.msk.bf16.mxu0 %vm2510_vm1, %v2509_v2  ;;  %v1520_v58 = vsel %vm213_vm0, %v2120_v26, 0  ;;  %v2135_v52 = vld [vmem:[%s3177_s1 + $0x38] sm:$0xf] }
  0x7b   : > { %2361 = vmatprep.mubr.msk.bf16.mxu1 %vm2510_vm1, %v2509_v2  ;;  %v1718_v63 = vsel %vm213_vm0, %v2135_v52, 0 }
  0x81   : > { %2348 = vmatmul.mubr.msk.bf16.gmra.mxu0 %vm203_vm2, %v2775_v27  ;;  %v1806_v27 = vsel %vm213_vm0, %v2141_v60, 0 }
  0x82   : > { %2362 = vmatmul.mubr.msk.bf16.gmra.mxu1 %vm203_vm2, %v2793_v15  ;;  %2367 = vmatprep.mubr.msk.bf16.mxu0 %vm2510_vm1, %v2509_v2 }
  0x83   : > { %2381 = vmatprep.mubr.msk.bf16.mxu1 %vm2510_vm1, %v2509_v2 }
  0x89   : > { %2368 = vmatmul.mubr.msk.bf16.vlgmr.msra.gmra.mxu0 %vm203_vm2, %v2785_v6 }
  0x8a   : > { %2382 = vmatmul.mubr.msk.bf16.vlgmr.msra.gmra.mxu1 %vm203_vm2, %v2803_v37  ;;  %2394 = vmatpush3.bf16.msra.mxu0 %v1520_v58 }
  0x8b   : > { %2408 = vmatpush3.bf16.msra.mxu1 %v1630_v5  ;;  %2371 = vmatprep.mubr.msk.bf16.mxu0 %vm2510_vm1, %v2509_v2 }
  0x8c   : > { %2385 = vmatprep.mubr.msk.bf16.mxu1 %vm2510_vm1, %v2509_v2  ;;  %2421 = vmatprep.subr.bf16.mxu0 %v2509_v2 }
  0x8d   : > { %2435 = vmatprep.subr.bf16.mxu1 %v2509_v2 }
  0x91   : > { %2372 = vmatmul.mubr.msk.bf16.gmra.mxu0 %vm203_vm2, %v2796_v21 }
  0x92   : > { %2386 = vmatmul.mubr.msk.bf16.gmra.mxu1 %vm203_vm2, %v2806_v55  ;;  %2375 = vmatprep.mubr.msk.bf16.mxu0 %vm2510_vm1, %v2509_v2 }
  0x93   : > { %2389 = vmatprep.mubr.msk.bf16.mxu1 %vm2510_vm1, %v2509_v2 }
  0x99   : > { %2376 = vmatmul.mubr.msk.bf16.gmra.mxu0 %vm203_vm2, %v2809_v62 }
  0x9a   : > { %2390 = vmatmul.mubr.msk.bf16.gmra.mxu1 %vm203_vm2, %v2812_v25  ;;  %2395 = vmatprep.mubr.msk.bf16.mxu0 %vm2510_vm1, %v2509_v2 }
  0x9b   : > { %2409 = vmatprep.mubr.msk.bf16.mxu1 %vm2510_vm1, %v2509_v2 }
  0xa1   : > { %2396 = vmatmul.mubr.msk.bf16.vlgmr.msra.gmra.mxu0 %vm203_vm2, %v2848_v17 }
  0xa2   : > { %2410 = vmatmul.mubr.msk.bf16.vlgmr.msra.gmra.mxu1 %vm203_vm2, %v2860_v48  ;;  %2422 = vmatpush3.bf16.msra.mxu0 %v1718_v63 }
  0xa3   : > { %2436 = vmatpush3.bf16.msra.mxu1 %v1806_v27  ;;  %2399 = vmatprep.mubr.msk.bf16.mxu0 %vm2510_vm1, %v2509_v2 }
  0xa4   : > { %2413 = vmatprep.mubr.msk.bf16.mxu1 %vm2510_vm1, %v2509_v2 }
  0xa9   : > { %2400 = vmatmul.mubr.msk.bf16.gmra.mxu0 %vm203_vm2, %v2854_v36 }
  0xaa   : > { %2414 = vmatmul.mubr.msk.bf16.gmra.mxu1 %vm203_vm2, %v2857_v38  ;;  %2403 = vmatprep.mubr.msk.bf16.mxu0 %vm2510_vm1, %v2509_v2 }
  0xab   : > { %2417 = vmatprep.mubr.msk.bf16.mxu1 %vm2510_vm1, %v2509_v2 }
  0xb1   : > { %2404 = vmatmul.mubr.msk.bf16.gmra.mxu0 %vm203_vm2, %v2874_v56 }
  0xb2   : > { %2418 = vmatmul.mubr.msk.bf16.gmra.mxu1 %vm203_vm2, %v2883_v20  ;;  %2423 = vmatprep.mubr.msk.bf16.mxu0 %vm2510_vm1, %v2509_v2 }
  0xb3   : > { %2437 = vmatprep.mubr.msk.bf16.mxu1 %vm2510_vm1, %v2509_v2 }
  0xb9   : > { %2424 = vmatmul.mubr.msk.bf16.vlgmr.msra.gmra.mxu0 %vm203_vm2, %v2886_v47 }
  0xba   : > { %2438 = vmatmul.mubr.msk.bf16.vlgmr.msra.gmra.mxu1 %vm203_vm2, %v2895_v19  ;;  %2427 = vmatprep.mubr.msk.bf16.mxu0 %vm2510_vm1, %v2509_v2 }
  0xbb   : > { %2441 = vmatprep.mubr.msk.bf16.mxu1 %vm2510_vm1, %v2509_v2 }
  0xc1   : > { %2428 = vmatmul.mubr.msk.bf16.gmra.mxu0 %vm203_vm2, %v2877_v8 }
  0xc2   : > { %2442 = vmatmul.mubr.msk.bf16.gmra.mxu1 %vm203_vm2, %v2889_v61  ;;  %2431 = vmatprep.mubr.msk.bf16.mxu0 %vm2510_vm1, %v2509_v2 }
  0xc3   : > { %2445 = vmatprep.mubr.msk.bf16.mxu1 %vm2510_vm1, %v2509_v2 }
  0xc9   : > { %2432 = vmatmul.mubr.msk.bf16.gmra.mxu0 %vm203_vm2, %v2892_v33 }
  0xca   : > { %2446 = vmatmul.mubr.msk.bf16.gmra.mxu1 %vm203_vm2, %v2898_v54 }
  0xd1   : > { %v251_v6 = vpop.f32.mrf.mxu0 }
  0xd2   : > { %v335_v15 = vpop.f32.mrf.mxu1 }
  0xd3   : > { %v336_v21 = vadd.f32 %v335_v15, %v251_v6  ;;  %v2229_v37 = vpop.f32.mrf.mxu0 }
  0xd4   : > { %v2243_v55 = vpop.f32.mrf.mxu1 }
  0xd5   : > { %v254_v62 = vpop.f32.mrf.mxu0 }
  0xd6   : > { %v338_v25 = vpop.f32.mrf.mxu1 }
  0xd7   : > { %v339_v17 = vadd.f32 %v338_v25, %v254_v62  ;;  %v2230_v36 = vpop.f32.mrf.mxu0 }
  0xd8   : > { %v2244_v38 = vpop.f32.mrf.mxu1 }
  0xd9   : > { %v259_v48 = vpop.f32.mrf.mxu0 }
  0xda   : > { %v343_v59 = vpop.f32.mrf.mxu1 }
  0xdb   : > { %v344_v0 = vadd.f32 %v343_v59, %v259_v48  ;;  %v2233_v2 = vpop.f32.mrf.mxu0 }
  0xdc   : > { %v2247_v13 = vpop.f32.mrf.mxu1 }
  0xdd   : > { %v262_v18 = vpop.f32.mrf.mxu0 }
  0xde   : > { %v346_v44 = vpop.f32.mrf.mxu1 }
  0xdf   : > { %v347_v43 = vadd.f32 %v346_v44, %v262_v18  ;;  %v2234_v35 = vpop.f32.mrf.mxu0 }
  0xe0   : > { %v2248_v1 = vpop.f32.mrf.mxu1 }
  0xe1   : > { %v267_v12 = vpop.f32.mrf.mxu0 }
  0xe2   : > { %v351_v3 = vpop.f32.mrf.mxu1 }
  0xe3   : > { %v352_v56 = vadd.f32 %v351_v3, %v267_v12  ;;  %v2237_v16 = vpop.f32.mrf.mxu0 }
  0xe4   : > { %v2251_v8 = vpop.f32.mrf.mxu1 }
  0xe5   : > { %v270_v10 = vpop.f32.mrf.mxu0 }
  0xe6   : > { %v354_v20 = vpop.f32.mrf.mxu1 }
  0xe7   : > { %v355_v47 = vadd.f32 %v354_v20, %v270_v10  ;;  %v2238_v61 = vpop.f32.mrf.mxu0 }
  0xe8   : > { %v2252_v33 = vpop.f32.mrf.mxu1 }
  0xe9   : > { %v460_v19 = vpop.f32.mrf.mxu0 }
  0xea   : > { %v483_v54 = vadd.f32 %v460_v19, %v336_v21  ;;  %v590_v32 = vpop.f32.mrf.mxu1 }
  0xeb   : > { %v2257_v24 = vpop.f32.mrf.mxu0 }
  0xec   : > { %v613_v41 = vadd.f32 %v590_v32, %v483_v54  ;;  %v2271_v9 = vpop.f32.mrf.mxu1 }
  0xed   : > { %v463_v11 = vpop.f32.mrf.mxu0 }
  0xee   : > { %v484_v22 = vadd.f32 %v463_v11, %v339_v17  ;;  %v593_v51 = vpop.f32.mrf.mxu1 }
  0xef   : > { %v2258_v14 = vpop.f32.mrf.mxu0 }
  0xf0   : > { %v614_v7 = vadd.f32 %v593_v51, %v484_v22  ;;  %v2272_v28 = vpop.f32.mrf.mxu1 }
  0xf1   : > { %v468_v39 = vpop.f32.mrf.mxu0 }
  0xf2   : > { %v485_v49 = vadd.f32 %v468_v39, %v344_v0  ;;  %v598_v23 = vpop.f32.mrf.mxu1 }
  0xf3   : > { %v2261_v30 = vpop.f32.mrf.mxu0 }
  0xf4   : > { %v615_v29 = vadd.f32 %v598_v23, %v485_v49  ;;  %v2275_v42 = vpop.f32.mrf.mxu1 }
  0xf5   : > { %v471_v50 = vpop.f32.mrf.mxu0 }
  0xf6   : > { %v486_v46 = vadd.f32 %v471_v50, %v347_v43  ;;  %v601_v53 = vpop.f32.mrf.mxu1 }
  0xf7   : > { %v2262_v4 = vpop.f32.mrf.mxu0 }
  0xf8   : > { %v616_v31 = vadd.f32 %v601_v53, %v486_v46  ;;  %v2276_v34 = vpop.f32.mrf.mxu1 }
  0xf9   : > { %v476_v40 = vpop.f32.mrf.mxu0 }
  0xfa   : > { %v487_v45 = vadd.f32 %v476_v40, %v352_v56  ;;  %v606_v26 = vpop.f32.mrf.mxu1 }
  0xfb   : > { %v2265_v57 = vpop.f32.mrf.mxu0 }
  0xfc   : > { %v617_v58 = vadd.f32 %v606_v26, %v487_v45  ;;  %v2279_v5 = vpop.f32.mrf.mxu1 }
  0xfd   : > { %v479_v52 = vpop.f32.mrf.mxu0 }
  0xfe   : > { %v488_v60 = vadd.f32 %v479_v52, %v355_v47  ;;  %v609_v63 = vpop.f32.mrf.mxu1 }
  0xff   : > { %v2266_v27 = vpop.f32.mrf.mxu0 }
 0x100   : > { %v618_v6 = vadd.f32 %v609_v63, %v488_v60  ;;  %v2280_v15 = vpop.f32.mrf.mxu1 }
 0x101   : > { %v689_v21 = vpop.f32.mrf.mxu0 }
 0x102   : > { %v712_v37 = vadd.f32 %v689_v21, %v613_v41  ;;  %v788_v55 = vpop.f32.mrf.mxu1 }
 0x103   : > { %v2285_v62 = vpop.f32.mrf.mxu0 }
 0x104   : > { %v811_v25 = vadd.f32 %v788_v55, %v712_v37  ;;  %v2299_v17 = vpop.f32.mrf.mxu1 }
 0x105   : > { %v692_v36 = vpop.f32.mrf.mxu0 }
 0x106   : > { %v713_v38 = vadd.f32 %v692_v36, %v614_v7  ;;  %v791_v48 = vpop.f32.mrf.mxu1 }
 0x107   : > { %v2286_v59 = vpop.f32.mrf.mxu0 }
 0x108   : > { %v812_v0 = vadd.f32 %v791_v48, %v713_v38  ;;  %v2300_v2 = vpop.f32.mrf.mxu1 }
 0x109   : > { %v697_v13 = vpop.f32.mrf.mxu0 }
 0x10a   : > { %v714_v18 = vadd.f32 %v697_v13, %v615_v29  ;;  %v796_v44 = vpop.f32.mrf.mxu1 }
 0x10b   : > { %v2289_v43 = vpop.f32.mrf.mxu0 }
 0x10c   : > { %v813_v35 = vadd.f32 %v796_v44, %v714_v18  ;;  %v2303_v1 = vpop.f32.mrf.mxu1 }
 0x10d   : > { %v700_v12 = vpop.f32.mrf.mxu0 }
 0x10e   : > { %v715_v3 = vadd.f32 %v700_v12, %v616_v31  ;;  %v799_v56 = vpop.f32.mrf.mxu1 }
 0x10f   : > { %v2290_v16 = vpop.f32.mrf.mxu0 }
 0x110   : > { %v814_v8 = vadd.f32 %v799_v56, %v715_v3  ;;  %v2304_v10 = vpop.f32.mrf.mxu1 }
 0x111   : > { %v705_v20 = vpop.f32.mrf.mxu0 }
 0x112   : > { %v716_v47 = vadd.f32 %v705_v20, %v617_v58  ;;  %v804_v61 = vpop.f32.mrf.mxu1 }
 0x113   : > { %v2293_v33 = vpop.f32.mrf.mxu0 }
 0x114   : > { %v815_v19 = vadd.f32 %v804_v61, %v716_v47  ;;  %v2307_v54 = vpop.f32.mrf.mxu1 }
 0x115   : > { %v708_v32 = vpop.f32.mrf.mxu0 }
 0x116   : > { %v717_v24 = vadd.f32 %v708_v32, %v618_v6  ;;  %v807_v41 = vpop.f32.mrf.mxu1 }
 0x117   : > { %v2294_v9 = vpop.f32.mrf.mxu0 }
 0x118   : > { %v816_v11 = vadd.f32 %v807_v41, %v717_v24  ;;  %v2308_v22 = vpop.f32.mrf.mxu1 }
 0x119   : > { %v918_v51 = vpop.f32.mrf.mxu0 }
 0x11a   : > { %v941_v14 = vadd.f32 %v918_v51, %v811_v25  ;;  %v1048_v7 = vpop.f32.mrf.mxu1 }
 0x11b   : > { %v2313_v28 = vpop.f32.mrf.mxu0 }
 0x11c   : > { %v3078_v39 = vadd.f32 %v1048_v7, %v941_v14  ;;  %v2327_v49 = vpop.f32.mrf.mxu1 }
 0x11d   : > { %v921_v23 = vpop.f32.mrf.mxu0 }
 0x11e   : > { %v942_v30 = vadd.f32 %v921_v23, %v812_v0  ;;  %v1051_v29 = vpop.f32.mrf.mxu1 }
 0x11f   : > { %v2314_v42 = vpop.f32.mrf.mxu0 }
 0x120   : > { %v3080_v50 = vadd.f32 %v1051_v29, %v942_v30  ;;  %v2328_v46 = vpop.f32.mrf.mxu1 }
 0x121   : > { %v926_v53 = vpop.f32.mrf.mxu0 }
 0x122   : > { %v943_v4 = vadd.f32 %v926_v53, %v813_v35  ;;  %v1056_v31 = vpop.f32.mrf.mxu1 }
 0x123   : > { %v2317_v34 = vpop.f32.mrf.mxu0 }
 0x124   : > { %v3082_v40 = vadd.f32 %v1056_v31, %v943_v4  ;;  %v2331_v45 = vpop.f32.mrf.mxu1 }
 0x125   : > { %v929_v26 = vpop.f32.mrf.mxu0 }
 0x126   : > { %v944_v57 = vadd.f32 %v929_v26, %v814_v8  ;;  %v1059_v58 = vpop.f32.mrf.mxu1 }
 0x127   : > { %v2318_v5 = vpop.f32.mrf.mxu0 }
 0x128   : > { %v3084_v52 = vadd.f32 %v1059_v58, %v944_v57  ;;  %v2332_v60 = vpop.f32.mrf.mxu1 }
 0x129   : > { %v934_v63 = vpop.f32.mrf.mxu0 }
 0x12a   : > { %v945_v27 = vadd.f32 %v934_v63, %v815_v19  ;;  %v1064_v6 = vpop.f32.mrf.mxu1 }
 0x12b   : > { %v2321_v15 = vpop.f32.mrf.mxu0 }
 0x12c   : > { %v3086_v21 = vadd.f32 %v1064_v6, %v945_v27  ;;  %v2335_v37 = vpop.f32.mrf.mxu1 }
 0x12d   : > { %v937_v55 = vpop.f32.mrf.mxu0 }
 0x12e   : > { %v946_v62 = vadd.f32 %v937_v55, %v816_v11  ;;  %v1067_v25 = vpop.f32.mrf.mxu1 }
 0x12f   : > { %v2322_v17 = vpop.f32.mrf.mxu0 }
 0x130   : > { %v3088_v36 = vadd.f32 %v1067_v25, %v946_v62  ;;  %v2336_v38 = vpop.f32.mrf.mxu1 }
 0x131   : > { %v1159_v48 = vpop.f32.mrf.mxu0 }
 0x132   : > { %v1269_v59 = vpop.f32.mrf.mxu1  ;;  %v1182_v25 = vadd.f32 %v1159_v48, %v3078_v39 }
 0x133   : > { %v2341_v0 = vpop.f32.mrf.mxu0 }
 0x134   : > { %v2355_v2 = vpop.f32.mrf.mxu1 }
 0x135   : > { %v1162_v13 = vpop.f32.mrf.mxu0 }
 0x136   : > { %v3090_v18 = vpop.f32.mrf.mxu1 }
 0x137   : > { %v2342_v44 = vpop.f32.mrf.mxu0 }
 0x138   : > { %v2356_v43 = vpop.f32.mrf.mxu1  ;;  %v1292_v44 = vadd.f32 %v1269_v59, %v1182_v25 }
 0x139   : > { %v1167_v35 = vpop.f32.mrf.mxu0  ;;  %v1183_v43 = vadd.f32 %v1162_v13, %v3080_v50 }
 0x13a   : > { %v3092_v1 = vpop.f32.mrf.mxu1 }
 0x13b   : > { %v2345_v12 = vpop.f32.mrf.mxu0 }
 0x13c   : > { %v2359_v3 = vpop.f32.mrf.mxu1 }
 0x13d   : > { %v3094_v56 = vpop.f32.mrf.mxu0 }
 0x13e   : > { %v3096_v16 = vpop.f32.mrf.mxu1  ;;  %v1185_v50 = vadd.f32 %v3094_v56, %v3084_v52 }
 0x13f   : > { %v2346_v8 = vpop.f32.mrf.mxu0 }
 0x140   : > { %v2360_v10 = vpop.f32.mrf.mxu1 }
 0x141   : > { %v3098_v20 = vpop.f32.mrf.mxu0 }
 0x142   : > { %v3100_v47 = vpop.f32.mrf.mxu1 }
 0x143   : > { %v2349_v61 = vpop.f32.mrf.mxu0 }
 0x144   : > { %v2363_v33 = vpop.f32.mrf.mxu1  ;;  %v1184_v61 = vadd.f32 %v1167_v35, %v3082_v40 }
 0x145   : > { %v3102_v19 = vpop.f32.mrf.mxu0 }
 0x146   : > { %v3104_v54 = vpop.f32.mrf.mxu1  ;;  %v1294_v59 = vadd.f32 %v3092_v1, %v1184_v61 }
 0x147   : > { %v2350_v32 = vpop.f32.mrf.mxu0 }
 0x148   : > { %v2364_v24 = vpop.f32.mrf.mxu1  ;;  %v1293_v32 = vadd.f32 %v3090_v18, %v1183_v43  ;;  %v1186_v18 = vadd.f32 %v3098_v20, %v3086_v21  ;;  %v3138_v21 = vld [vmem:[%s3178_s2] ss:$0 sm:$0xff] }
 0x149   : > { %v1358_v41 = vpop.f32.mrf.mxu0 }
 0x14a   : > { %v1446_v9 = vpop.f32.mrf.mxu1  ;;  %v1381_v8 = vadd.f32 %v1358_v41, %v1292_v44 }
 0x14b   : > { %v2369_v11 = vpop.f32.mrf.mxu0 }
 0x14c   : > { %v2383_v22 = vpop.f32.mrf.mxu1  ;;  %v1469_v39 = vadd.f32 %v1446_v9, %v1381_v8 }
 0x14d   : > { %v1361_v51 = vpop.f32.mrf.mxu0 }
 0x14e   : > { %v1449_v14 = vpop.f32.mrf.mxu1  ;;  %v1382_v48 = vadd.f32 %v1361_v51, %v1293_v32  ;;  %v1295_v51 = vadd.f32 %v3096_v16, %v1185_v50 }
 0x14f   : > { %v2370_v7 = vpop.f32.mrf.mxu0 }
 0x150   : > { %v2384_v28 = vpop.f32.mrf.mxu1  ;;  %v1470_v40 = vadd.f32 %v1449_v14, %v1382_v48  ;;  %v1187_v14 = vadd.f32 %v3102_v19, %v3088_v36 }
 0x151   : > { %v1366_v49 = vpop.f32.mrf.mxu0 }
 0x152   : > { %v1454_v23 = vpop.f32.mrf.mxu1  ;;  %v1383_v28 = vadd.f32 %v1366_v49, %v1294_v59  ;;  %v1297_v36 = vadd.f32 %v3104_v54, %v1187_v14 }
 0x153   : > { %v2373_v30 = vpop.f32.mrf.mxu0 }
 0x154   : > { %v2387_v29 = vpop.f32.mrf.mxu1 }
 0x155   : > { %v1369_v42 = vpop.f32.mrf.mxu0 }
 0x156   : > { %v3106_v46 = vpop.f32.mrf.mxu1  ;;  %v1384_v56 = vadd.f32 %v1369_v42, %v1295_v51 }
 0x157   : > { %v2374_v53 = vpop.f32.mrf.mxu0 }
 0x158   : > { %v2388_v4 = vpop.f32.mrf.mxu1  ;;  %v1472_v42 = vadd.f32 %v3106_v46, %v1384_v56 }
 0x159   : > { %v1374_v31 = vpop.f32.mrf.mxu0  ;;  %v1471_v4 = vadd.f32 %v1454_v23, %v1383_v28 }
 0x15a   : > { %v3108_v34 = vpop.f32.mrf.mxu1 }
 0x15b   : > { %v2377_v45 = vpop.f32.mrf.mxu0 }
 0x15c   : > { %v2391_v26 = vpop.f32.mrf.mxu1 }
 0x15d   : > { %v3110_v57 = vpop.f32.mrf.mxu0  ;;  %v1296_v26 = vadd.f32 %v3100_v47, %v1186_v18 }
 0x15e   : > { %v3112_v58 = vpop.f32.mrf.mxu1  ;;  %v1386_v46 = vadd.f32 %v3110_v57, %v1297_v36 }
 0x15f   : > { %v2378_v5 = vpop.f32.mrf.mxu0 }
 0x160   : > { %v2392_v60 = vpop.f32.mrf.mxu1  ;;  %v1474_v32 = vadd.f32 %v3112_v58, %v1386_v46 }
 0x161   : > { %v1556_v63 = vpop.f32.mrf.mxu0 }
 0x162   : > { %v1666_v27 = vpop.f32.mrf.mxu1  ;;  %v1579_v13 = vadd.f32 %v1556_v63, %v1469_v39  ;;  %v1385_v63 = vadd.f32 %v1374_v31, %v1296_v26 }
 0x163   : > { %v2397_v6 = vpop.f32.mrf.mxu0 }
 0x164   : > { %v2411_v15 = vpop.f32.mrf.mxu1  ;;  %v1689_v29 = vadd.f32 %v1666_v27, %v1579_v13 }
 0x165   : > { %v1559_v37 = vpop.f32.mrf.mxu0 }
 0x166   : > { %v1669_v55 = vpop.f32.mrf.mxu1  ;;  %v1580_v1 = vadd.f32 %v1559_v37, %v1470_v40 }
 0x167   : > { %v2398_v62 = vpop.f32.mrf.mxu0 }
 0x168   : > { %v2412_v17 = vpop.f32.mrf.mxu1  ;;  %v1690_v20 = vadd.f32 %v1669_v55, %v1580_v1 }
 0x169   : > { %v1564_v38 = vpop.f32.mrf.mxu0 }
 0x16a   : > { %v1674_v0 = vpop.f32.mrf.mxu1  ;;  %v1581_v5 = vadd.f32 %v1564_v38, %v1471_v4  ;;  %v1473_v38 = vadd.f32 %v3108_v34, %v1385_v63 }
 0x16b   : > { %v2401_v2 = vpop.f32.mrf.mxu0 }
 0x16c   : > { %v2415_v12 = vpop.f32.mrf.mxu1  ;;  %v1691_v19 = vadd.f32 %v1674_v0, %v1581_v5 }
 0x16d   : > { %v1567_v3 = vpop.f32.mrf.mxu0 }
 0x16e   : > { %v3116_v10 = vpop.f32.mrf.mxu1  ;;  %v1582_v62 = vadd.f32 %v1567_v3, %v1472_v42 }
 0x16f   : > { %v2402_v33 = vpop.f32.mrf.mxu0 }
 0x170   : > { %v2416_v24 = vpop.f32.mrf.mxu1  ;;  %v1692_v34 = vadd.f32 %v3116_v10, %v1582_v62 }
 0x171   : > { %v1572_v11 = vpop.f32.mrf.mxu0 }
 0x172   : > { %v3120_v22 = vpop.f32.mrf.mxu1  ;;  %v1583_v43 = vadd.f32 %v1572_v11, %v1473_v38 }
 0x173   : > { %v2405_v7 = vpop.f32.mrf.mxu0 }
 0x174   : > { %v2419_v41 = vpop.f32.mrf.mxu1  ;;  %v1693_v11 = vadd.f32 %v3120_v22, %v1583_v43 }
 0x175   : > { %v3125_v30 = vpop.f32.mrf.mxu0 }
 0x176   : > { %v3127_v35 = vpop.f32.mrf.mxu1  ;;  %v1584_v10 = vadd.f32 %v3125_v30, %v1474_v32 }
 0x177   : > { %v2406_v9 = vpop.f32.mrf.mxu0 }
 0x178   : > { %v2420_v53 = vpop.f32.mrf.mxu1  ;;  %v1694_v22 = vadd.f32 %v3127_v35, %v1584_v10 }
 0x179   : > { %v1754_v52 = vpop.f32.mrf.mxu0 }
 0x17a   : > { %v1777_v45 = vadd.f32 %v1754_v52, %v1689_v29  ;;  %v1842_v49 = vpop.f32.mrf.mxu1 }
 0x17b   : > { %v2425_v16 = vpop.f32.mrf.mxu0 }
 0x17c   : > { %v1865_v60 = vadd.f32 %v1842_v49, %v1777_v45  ;;  %v2439_v23 = vpop.f32.mrf.mxu1 }
 0x17d   : > { %v1757_v27 = vpop.f32.mrf.mxu0 }
 0x17e   : > { %v1878_v47 = vadd.f32 %v3138_v21, %v1865_v60  ;;  %v1778_v6 = vadd.f32 %v1757_v27, %v1690_v20  ;;  %v1845_v15 = vpop.f32.mrf.mxu1 }
 0x17f   : > { %v2426_v37 = vpop.f32.mrf.mxu0 }
 0x180   : > { %vm1884_vm6 = vcmp.gt.f32.partialorder %v1878_v47, 0.0  ;;  %v1890_v25 = vmul.f32 0.2, %v1878_v47  ;;  %v1866_v17 = vadd.f32 %v1845_v15, %v1778_v6  ;;  %v2440_v55 = vpop.f32.mrf.mxu1 }
 0x181   : > { %v1762_v31 = vpop.f32.mrf.mxu0 }
 0x182   : > { %v1896_v54 = vsel %vm1884_vm6, %v1878_v47, %v1890_v25  ;;  %v1879_v0 = vadd.f32 %v3138_v21, %v1866_v17  ;;  %v1779_v2 = vadd.f32 %v1762_v31, %v1691_v19  ;;  %v1850_v44 = vpop.f32.mrf.mxu1 }
 0x183   : > { %v2155_v12 = vpack.c.bf16 %v1896_v54, %v1896_v54  ;;  %v2429_v3 = vpop.f32.mrf.mxu0 }
 0x184   : > { %vm1885_vm8 = vcmp.gt.f32.partialorder %v1879_v0, 0.0  ;;  %v1891_v8 = vmul.f32 0.2, %v1879_v0  ;;  %v1867_v61 = vadd.f32 %v1850_v44, %v1779_v2  ;;  %v2443_v57 = vpop.f32.mrf.mxu1 }
 0x185   : > { %1927 = vst.msk [vmem:[%s3149_s29] sm:$0xf] %vm1926_vm7, %v2155_v12  ;;  %v1765_v33 = vpop.f32.mrf.mxu0 }
 0x186   : > { %v1897_v24 = vsel %vm1885_vm8, %v1879_v0, %v1891_v8  ;;  %v1880_v39 = vadd.f32 %v3138_v21, %v1867_v61  ;;  %v1780_v48 = vadd.f32 %v1765_v33, %v1692_v34  ;;  %v1853_v59 = vpop.f32.mrf.mxu1 }
 0x187   : > { %v2156_v7 = vpack.c.bf16 %v1897_v24, %v1897_v24  ;;  %v2430_v50 = vpop.f32.mrf.mxu0 }
 0x188   : > { %vm1886_vm9 = vcmp.gt.f32.partialorder %v1880_v39, 0.0  ;;  %v1892_v13 = vmul.f32 0.2, %v1880_v39  ;;  %v1868_v41 = vadd.f32 %v1853_v59, %v1780_v48  ;;  %v2444_v28 = vpop.f32.mrf.mxu1 }
 0x189   : > { %1928 = vst.msk [vmem:[%s3149_s29 + $0x4] sm:$0xf] %vm1926_vm7, %v2156_v7  ;;  %v1770_v40 = vpop.f32.mrf.mxu0 }
 0x18a   : > { %v1898_v58 = vsel %vm1886_vm9, %v1880_v39, %v1892_v13  ;;  %v1881_v18 = vadd.f32 %v3138_v21, %v1868_v41  ;;  %v1781_v9 = vadd.f32 %v1770_v40, %v1693_v11  ;;  %v1858_v51 = vpop.f32.mrf.mxu1 }
 0x18b   : > { %v2157_v29 = vpack.c.bf16 %v1898_v58, %v1898_v58  ;;  %v2433_v1 = vpop.f32.mrf.mxu0 }
 0x18c   : > { %vm1887_vm10 = vcmp.gt.f32.partialorder %v1881_v18, 0.0  ;;  %v1893_v30 = vmul.f32 0.2, %v1881_v18  ;;  %v1869_v53 = vadd.f32 %v1858_v51, %v1781_v9  ;;  %v2447_v4 = vpop.f32.mrf.mxu1 }
 0x18d   : > { %1929 = vst.msk [vmem:[%s3149_s29 + $0x8] sm:$0xf] %vm1926_vm7, %v2157_v29  ;;  %v1773_v52 = vpop.f32.mrf.mxu0 }
 0x18e   : > { %v1899_v56 = vsel %vm1887_vm10, %v1881_v18, %v1893_v30  ;;  %v1882_v45 = vadd.f32 %v3138_v21, %v1869_v53  ;;  %v1782_v49 = vadd.f32 %v1773_v52, %v1694_v22  ;;  %v1861_v26 = vpop.f32.mrf.mxu1 }
 0x18f   : > { %v2158_v14 = vpack.c.bf16 %v1899_v56, %v1899_v56  ;;  %v2434_v5 = vpop.f32.mrf.mxu0 }
 0x190   : > { %vm1888_vm11 = vcmp.gt.f32.partialorder %v1882_v45, 0.0  ;;  %v1894_v16 = vmul.f32 0.2, %v1882_v45  ;;  %v1870_v35 = vadd.f32 %v1861_v26, %v1782_v49  ;;  %v2448_v20 = vpop.f32.mrf.mxu1 }
 0x191   : > { %1930 = vst.msk [vmem:[%s3149_s29 + $0xc] sm:$0xf] %vm1926_vm7, %v2158_v14 }
 0x192   : > { %v1900_v60 = vsel %vm1888_vm11, %v1882_v45, %v1894_v16  ;;  %v1883_v23 = vadd.f32 %v3138_v21, %v1870_v35 }
 0x193   : > { %v2159_v63 = vpack.c.bf16 %v1900_v60, %v1900_v60 }
 0x194   : > { %vm1889_vm12 = vcmp.gt.f32.partialorder %v1883_v23, 0.0  ;;  %v1895_v27 = vmul.f32 0.2, %v1883_v23 }
 0x195   : > { %1931 = vst.msk [vmem:[%s3149_s29 + $0x10] sm:$0xf] %vm1926_vm7, %v2159_v63 }
 0x196   : > { %v1901_v42 = vsel %vm1889_vm12, %v1883_v23, %v1895_v27 }
 0x197   : > { %v2160_v47 = vpack.c.bf16 %v1901_v42, %v1901_v42 }
 0x199   : > { %1932 = vst.msk [vmem:[%s3149_s29 + $0x14] sm:$0xf] %vm1926_vm7, %v2160_v47 }
 0x19a PF: > { %s13_s12 = sadd.s32 1, %s2507_s12  }
 0x19b   : > { %p10_p4 = scmp.ge.s32.totalorder %s13_s12, 4  }
 0x19d   :  { %12 = sbr.rel (!%p10_p4) target bundleno = 1 (0x1), region = 80 }

// kernel: deterministic_policy_forward.4
= control target key start
LH: loop header
LB: loop body
LE: loop exit
PB: predicated region body
PF: predicated region fallthrough
CT: control target
= control target key end

     0   :  { %s5973_s12 = smov 0   ;;  %s7249_s0 = inlined_call_operand.vmem [shape: bf16[2,4,176,8], index: 0, kind: input, shape index: {}]   ;;  %s7250_s1 = inlined_call_operand.vmem [shape: bf16[16,8,8], index: 1, kind: input, shape index: {}]   ;;  %s7251_s2 = inlined_call_operand.vmem [shape: f32[1,8], index: 2, kind: input, shape index: {}]   ;;  %s7252_s3 = inlined_call_operand.vmem [shape: bf16[2,160,8], index: 3, kind: output, shape index: {}]  }
   0x1 LB: > { %s4713_s13 = sadd.s32 4294967295, %s5951_s12   ;;  %p4717_p0 = scmp.ge.s32.totalorder %s5951_s12, 1  ;;  %s5951_s12 = sphi %s5973_s12, %s13_s12  }
   0x2   : > { %p137_p1 = scmp.lt.s32.totalorder %s5951_s12, 3 }
   0x4   : > { %p138_p2 = pnand %p4717_p0, %p137_p1 }
   0x6   : > { %141 = sbr.rel (%p138_p2) target bundleno = 544 (0x220), region = 32 }
   0xb   : > { %v4740_v0 = vld [vmem:[%s7250_s1 + $0x4] sm:$0xf]  ;;  %vm297_vm0 = vcmask 1043456   ;;  %v192_v1 = vld [vmem:[%s7250_s1] sm:$0xf]  ;;  %p161_p3 = scmp.lt.s32.totalorder %s4713_s13, 1 }
   0xc   : > { %5787 = vmatprep.subr.msk.bf16.mxu0 %vm297_vm0, %v4740_v0  ;;  %v299_v2 = vsel %vm297_vm0, %v4740_v0, 0  ;;  %5788 = vmatprep.subr.msk.bf16.mxu1 %vm297_vm0, %v192_v1  ;;  %v495_v3 = vsel %vm297_vm0, %v192_v1, 0  ;;  %v4781_v4 = vld [vmem:[%s7250_s1 + $0x8] sm:$0xf]  ;;  %v4824_v5 = vld [vmem:[%s7250_s1 + $0xc] sm:$0xf] }
   0xd   : > { %5436 = vmatpush3.bf16.msra.mxu0 %v299_v2  ;;  %5458 = vmatpush3.bf16.msra.mxu1 %v495_v3  ;;  %s7273_s13 = smov (!%p161_p3, %s4713_s13), 1  ;;  %vm266_vm1 = vcmask 64512   ;;  %v802_v9 = vsel %vm297_vm0, %v4781_v4, 0  ;;  %v6015_v10 = vld [vmem:[%s7250_s1 + $0x10] sm:$0xf]  ;;  %v1128_v12 = vsel %vm297_vm0, %v4824_v5, 0 }
   0xe   : > { %5789 = vmatprep.subr.msk.bf16.mxu0 %vm297_vm0, %v4781_v4  ;;  %5790 = vmatprep.subr.msk.bf16.mxu1 %vm297_vm0, %v4824_v5  ;;  %s5803_s22 = smul.u32 352, %s7273_s13  ;;  %v6023_v13 = vld [vmem:[%s7250_s1 + $0x14] sm:$0xf]  ;;  %vm686_vm2 = vsmask.f32 7424  ;;  %v1367_v3 = vsel %vm297_vm0, %v6015_v10, 0 }
   0xf   : > { %v1606_v4 = vsel %vm297_vm0, %v6023_v13, 0  ;;  %vm3051_vm3 = vcmask 1046528   ;;  %vm4637_vm4 = vcmask 60416   ;;  %s5804_s27 = smul.u32 80, %s7273_s13 }
  0x10   : > { %s6005_s25 = scalar_lea.vmem %s7249_s0, %s5803_s22 }
  0x11   : > { %v5813_v6 = vld [vmem:[%s6005_s25 + $0x58] sm:$0xff]   ;;  %v5814_v7 = vld [vmem:[%s6005_s25] sm:$0xff]   ;;  %v5816_v11 = vld [vmem:[%s6005_s25 + $0x8] sm:$0xff]   ;;  %s7151_s29 = scalar_lea.vmem %s7252_s3, %s5804_s27 }
  0x12   : > { %5437 = vmatprep.mubr.msk.bf16.mxu0 %vm266_vm1, %v5813_v6  ;;  %v5815_v8 = vld [vmem:[%s6005_s25 + $0x60] sm:$0xff]   ;;  %5459 = vmatprep.mubr.msk.bf16.mxu1 %vm266_vm1, %v5814_v7  ;;  %v5817_v14 = vld [vmem:[%s6005_s25 + $0x68] sm:$0xff]   ;;  %v5818_v15 = vld [vmem:[%s6005_s25 + $0x10] sm:$0xff]  }
  0x13   : > { %5438 = vmatmul.mubr.msk.bf16.vlgmr.msra.gmra.mxu0 %vm266_vm1, %v5815_v8  ;;  %5460 = vmatmul.mubr.msk.bf16.vlgmr.msra.gmra.mxu1 %vm266_vm1, %v5816_v11  ;;  %v5819_v16 = vld [vmem:[%s6005_s25 + $0x70] sm:$0xff]   ;;  %v5820_v17 = vld [vmem:[%s6005_s25 + $0x18] sm:$0xff]   ;;  %v5822_v19 = vld [vmem:[%s6005_s25 + $0x20] sm:$0xff]  }
  0x14   : > { %5480 = vmatpush3.bf16.msra.mxu0 %v802_v9  ;;  %5502 = vmatpush3.bf16.msra.mxu1 %v1128_v12  ;;  %v5821_v18 = vld [vmem:[%s6005_s25 + $0x78] sm:$0xff]   ;;  %v5823_v20 = vld [vmem:[%s6005_s25 + $0x80] sm:$0xff]   ;;  %v5824_v21 = vld [vmem:[%s6005_s25 + $0x28] sm:$0xff]  }
  0x15   : > { %5441 = vmatprep.mubr.msk.bf16.mxu0 %vm266_vm1, %v5817_v14  ;;  %5463 = vmatprep.mubr.msk.bf16.mxu1 %vm266_vm1, %v5818_v15  ;;  %v5825_v22 = vld [vmem:[%s6005_s25 + $0x88] sm:$0xff]   ;;  %v5826_v23 = vld [vmem:[%s6005_s25 + $0x30] sm:$0xff]   ;;  %v5833_v24 = vld [vmem:[%s6005_s25] sm:$0xff]  }
  0x16   : > { %5791 = vmatprep.subr.msk.bf16.mxu0 %vm297_vm0, %v6015_v10  ;;  %5792 = vmatprep.subr.msk.bf16.mxu1 %vm297_vm0, %v6023_v13  ;;  %v5834_v25 = vld [vmem:[%s6005_s25 + $0x8] sm:$0xff]   ;;  %v5827_v26 = vld [vmem:[%s6005_s25 + $0x90] sm:$0xff]   ;;  %v5828_v27 = vld [vmem:[%s6005_s25 + $0x38] sm:$0xff]   ;;  %v690_v28 = vshll.u32 %v5833_v24, 16  ;;  %v688_v33 = vshrl.u32 %v5833_v24, 16 }
  0x17   : > { %v5835_v29 = vld [vmem:[%s6005_s25 + $0x58] sm:$0xff]   ;;  %v5836_v30 = vld [vmem:[%s6005_s25 + $0x60] sm:$0xff]   ;;  %v695_v35 = vshll.u32 %v5834_v25, 16  ;;  %v5837_v40 = vld [vmem:[%s6005_s25 + $0x10] sm:$0xff]   ;;  %v699_v50 = vshrl.u32 %v5834_v25, 16 }
  0x18   : > { %v5829_v31 = vld [vmem:[%s6005_s25 + $0x98] sm:$0xff]   ;;  %v5830_v32 = vld [vmem:[%s6005_s25 + $0x40] sm:$0xff]   ;;  %v692_v34 = vrot.slane %v690_v28, 1  ;;  %v1016_v36 = vshll.u32 %v5835_v29, 16  ;;  %v1014_v37 = vshrl.u32 %v5835_v29, 16  ;;  %v1021_v38 = vshll.u32 %v5836_v30, 16 }
  0x19   : > { %v5831_v41 = vld [vmem:[%s6005_s25 + $0xa0] sm:$0xff]   ;;  %v697_v43 = vrot.slane %v695_v35, 1  ;;  %v5838_v44 = vld [vmem:[%s6005_s25 + $0x68] sm:$0xff]   ;;  %v5839_v47 = vld [vmem:[%s6005_s25 + $0x18] sm:$0xff]   ;;  %v703_v51 = vshll.u32 %v5837_v40, 16  ;;  %v1025_v53 = vshrl.u32 %v5836_v30, 16 }
  0x1a   : > { %v1018_v39 = vrot.slane %v1016_v36, 1  ;;  %v693_v42 = vor.u32 %v692_v34, %v688_v33  ;;  %v1023_v46 = vrot.slane %v1021_v38, 1  ;;  %v5840_v48 = vld [vmem:[%s6005_s25 + $0x70] sm:$0xff]   ;;  %v5832_v49 = vld [vmem:[%s6005_s25 + $0x48] sm:$0xff]   ;;  %v1029_v54 = vshll.u32 %v5838_v44, 16  ;;  %v5841_v60 = vld [vmem:[%s6005_s25 + $0x20] sm:$0xff]  }
  0x1b   : > { %5442 = vmatmul.mubr.msk.bf16.gmra.mxu0 %vm266_vm1, %v5819_v16  ;;  %5464 = vmatmul.mubr.msk.bf16.gmra.mxu1 %vm266_vm1, %v5820_v17  ;;  %v707_v56 = vshrl.u32 %v5837_v40, 16  ;;  %v711_v57 = vshll.u32 %v5839_v47, 16  ;;  %v1033_v58 = vshrl.u32 %v5838_v44, 16  ;;  %v1037_v59 = vshll.u32 %v5840_v48, 16  ;;  %v5842_v63 = vld [vmem:[%s6005_s25 + $0x78] sm:$0xff]   ;;  %v5843_v2 = vld [vmem:[%s6005_s25 + $0x28] sm:$0xff]  }
  0x1c   : > { %5445 = vmatprep.mubr.msk.bf16.mxu0 %vm266_vm1, %v5821_v18  ;;  %5467 = vmatprep.mubr.msk.bf16.mxu1 %vm266_vm1, %v5822_v19  ;;  %v1019_v45 = vor.u32 %v1018_v39, %v1014_v37  ;;  %v698_v52 = vsel %vm686_vm2, %v693_v42, %v697_v43  ;;  %v701_v61 = vor.u32 %v699_v50, %v697_v43  ;;  %v705_v62 = vrot.slane %v703_v51, 1  ;;  %v5844_v7 = vld [vmem:[%s6005_s25 + $0x80] sm:$0xff]   ;;  %v5845_v25 = vld [vmem:[%s6005_s25 + $0x30] sm:$0xff]   ;;  %v5846_v28 = vld [vmem:[%s6005_s25 + $0x88] sm:$0xff]  }
  0x1d   : > { %v1027_v0 = vor.u32 %v1025_v53, %v1023_v46  ;;  %v1031_v1 = vrot.slane %v1029_v54, 1  ;;  %v713_v6 = vrot.slane %v711_v57, 1  ;;  %v1039_v9 = vrot.slane %v1037_v59, 1  ;;  %v5847_v29 = vld [vmem:[%s6005_s25 + $0x38] sm:$0xff]   ;;  %v5848_v35 = vld [vmem:[%s6005_s25 + $0x90] sm:$0xff]   ;;  %v5852_v59 = vld [vmem:[%s6005_s25 + $0xa0] sm:$0xff]  }
  0x1e   : > { %v1024_v55 = vsel %vm686_vm2, %v1019_v45, %v1023_v46  ;;  %v709_v5 = vor.u32 %v707_v56, %v705_v62  ;;  %v715_v11 = vshrl.u32 %v5839_v47, 16  ;;  %v719_v12 = vshll.u32 %v5841_v60, 16  ;;  %v5851_v56 = vld [vmem:[%s6005_s25 + $0x48] sm:$0xff]  }
  0x1f   : > { %v1035_v8 = vor.u32 %v1033_v58, %v1031_v1  ;;  %v706_v14 = vsel %vm686_vm2, %v701_v61, %v705_v62  ;;  %v1041_v15 = vshrl.u32 %v5840_v48, 16  ;;  %v1045_v16 = vshll.u32 %v5842_v63, 16 }
  0x20   : > { %v1032_v17 = vsel %vm686_vm2, %v1027_v0, %v1031_v1  ;;  %v723_v18 = vshrl.u32 %v5841_v60, 16  ;;  %v727_v10 = vshll.u32 %v5843_v2, 16  ;;  %v714_v13 = vsel %vm686_vm2, %v709_v5, %v713_v6  ;;  %v5853_v5 = vld [vmem:[%s6005_s25 + $0x50] ss:$0 sps:$4 sm:$0x11]  }
  0x21   : > { %v1049_v19 = vshrl.u32 %v5842_v63, 16  ;;  %v721_v24 = vrot.slane %v719_v12, 1  ;;  %v1043_v30 = vor.u32 %v1041_v15, %v1039_v9  ;;  %v731_v37 = vshrl.u32 %v5843_v2, 16 }
  0x22   : > { %v735_v38 = vshll.u32 %v5845_v25, 16  ;;  %v1057_v39 = vshrl.u32 %v5844_v7, 16  ;;  %v1061_v40 = vshll.u32 %v5846_v28, 16  ;;  %v743_v42 = vshll.u32 %v5847_v29, 16 }
  0x23   : > { %5446 = vmatmul.mubr.msk.bf16.gmra.mxu0 %vm266_vm1, %v5823_v20  ;;  %5468 = vmatmul.mubr.msk.bf16.gmra.mxu1 %vm266_vm1, %v5824_v21  ;;  %v1053_v20 = vshll.u32 %v5844_v7, 16  ;;  %v6089_v21 = vld [vmem:[%s7250_s1 + $0x18] sm:$0xf]  ;;  %v1065_v46 = vshrl.u32 %v5846_v28, 16  ;;  %v1069_v47 = vshll.u32 %v5848_v35, 16  ;;  %v747_v60 = vshrl.u32 %v5847_v29, 16 }
  0x24   : > { %5449 = vmatprep.mubr.msk.bf16.mxu0 %vm266_vm1, %v5825_v22  ;;  %5471 = vmatprep.mubr.msk.bf16.mxu1 %vm266_vm1, %v5826_v23  ;;  %v1040_v22 = vsel %vm686_vm2, %v1035_v8, %v1039_v9  ;;  %v717_v23 = vor.u32 %v715_v11, %v713_v6  ;;  %v737_v48 = vrot.slane %v735_v38, 1  ;;  %v1063_v51 = vrot.slane %v1061_v40, 1  ;;  %v5854_v11 = vld [vmem:[%s6005_s25 + $0xa8] ss:$0 sps:$4 sm:$0x11]  }
  0x25   : > { %v1055_v34 = vrot.slane %v1053_v20, 1  ;;  %v1071_v58 = vrot.slane %v1069_v47, 1  ;;  %v1073_v63 = vshrl.u32 %v5848_v35, 16  ;;  %v1085_v8 = vshll.u32 %v5852_v59, 16  ;;  %v5856_v35 = vld [vmem:[%s6005_s25 + $0x108] sm:$0xff]   ;;  %v5866_v47 = vld [vmem:[%s6005_s25 + $0x130] sm:$0xff]  }
  0x26   : > { %v722_v36 = vsel %vm686_vm2, %v717_v23, %v721_v24  ;;  %v1067_v57 = vor.u32 %v1065_v46, %v1063_v51  ;;  %v763_v20 = vshrl.u32 %v5851_v56, 16  ;;  %v1932_v38 = vsel %vm297_vm0, %v6089_v21, 0  ;;  %v5865_v46 = vld [vmem:[%s6005_s25 + $0xd8] sm:$0xff]  }
  0x27   : > { %v1059_v53 = vor.u32 %v1057_v39, %v1055_v34  ;;  %v1075_v15 = vor.u32 %v1073_v63, %v1071_v58  ;;  %v5859_v39 = vld [vmem:[%s6005_s25 + $0xc0] sm:$0xff]  }
  0x28   : > { %v1072_v6 = vsel %vm686_vm2, %v1067_v57, %v1071_v58  ;;  %v5870_v57 = vld [vmem:[%s6005_s25 + $0x140] sm:$0xff]   ;;  %v5871_v58 = vld [vmem:[%s6005_s25 + $0xf0] sm:$0xff]  }
  0x29   : > { %v1064_v1 = vsel %vm686_vm2, %v1059_v53, %v1063_v51  ;;  %v5877_v51 = vld [vmem:[%s6005_s25 + $0x108] sm:$0xff]  }
  0x2a   : > { %v2144_v63 = vshrl.u32 %v5877_v51, 16 }
  0x2b   : > { %5450 = vmatmul.mubr.msk.bf16.gmra.mxu0 %vm266_vm1, %v5827_v26  ;;  %5472 = vmatmul.mubr.msk.bf16.gmra.mxu1 %vm266_vm1, %v5828_v27  ;;  %v6097_v26 = vld [vmem:[%s7250_s1 + $0x1c] sm:$0xf]  ;;  %v1047_v27 = vrot.slane %v1045_v16, 1 }
  0x2c   : > { %5453 = vmatprep.mubr.msk.bf16.mxu0 %vm266_vm1, %v5829_v31  ;;  %5475 = vmatprep.mubr.msk.bf16.mxu1 %vm266_vm1, %v5830_v32  ;;  %v725_v31 = vor.u32 %v723_v18, %v721_v24  ;;  %v729_v32 = vrot.slane %v727_v10, 1  ;;  %v1087_v10 = vrot.slane %v1085_v8, 1  ;;  %v1089_v24 = vshrl.u32 %v5852_v59, 16  ;;  %v5872_v59 = vld [vmem:[%s6005_s25 + $0x148] sm:$0xff]  }
  0x2d   : > { %v1051_v33 = vor.u32 %v1049_v19, %v1047_v27  ;;  %v1048_v43 = vsel %vm686_vm2, %v1043_v30, %v1047_v27  ;;  %v2258_v40 = vsel %vm297_vm0, %v6097_v26, 0 }
  0x2e   : > { %v730_v44 = vsel %vm686_vm2, %v725_v31, %v729_v32  ;;  %v733_v50 = vor.u32 %v731_v37, %v729_v32  ;;  %v1091_v30 = vor.u32 %v1089_v24, %v1087_v10  ;;  %v5858_v37 = vld [vmem:[%s6005_s25 + $0x110] sm:$0xff]   ;;  %v5884_v24 = vld [vmem:[%s6005_s25 + $0x128] sm:$0xff]  }
  0x2f   : > { %v1056_v45 = vsel %vm686_vm2, %v1051_v33, %v1055_v34  ;;  %v5855_v33 = vld [vmem:[%s6005_s25 + $0xb0] sm:$0xff]  }
  0x30   : > { %v738_v62 = vsel %vm686_vm2, %v733_v50, %v737_v48  ;;  %v5875_v50 = vld [vmem:[%s6005_s25 + $0xb0] sm:$0xff]  }
  0x31   : > { %v1820_v53 = vshll.u32 %v5875_v50, 16 }
  0x33   : > { %5454 = vmatmul.mubr.msk.bf16.gmra.mxu0 %vm266_vm1, %v5831_v41  ;;  %5476 = vmatmul.mubr.msk.bf16.gmra.mxu1 %vm266_vm1, %v5832_v49  ;;  %v739_v41 = vshrl.u32 %v5845_v25, 16  ;;  %v5849_v49 = vld [vmem:[%s6005_s25 + $0x40] sm:$0xff]   ;;  %v1093_v25 = vshll.u32 %v5854_v11, 16  ;;  %v5874_v11 = vld [vmem:[%s6005_s25 + $0x150] sm:$0xff]  }
  0x34   : > { %5481 = vmatprep.mubr.msk.bf16.mxu0 %vm266_vm1, %v698_v52  ;;  %5503 = vmatprep.mubr.msk.bf16.mxu1 %vm266_vm1, %v1024_v55  ;;  %v5850_v52 = vld [vmem:[%s6005_s25 + $0x98] sm:$0xff]   ;;  %v745_v55 = vrot.slane %v743_v42, 1  ;;  %v751_v61 = vshll.u32 %v5849_v49, 16  ;;  %v6159_v42 = vld [vmem:[%s7250_s1 + $0x20] sm:$0xf] }
  0x35   : > { %v741_v54 = vor.u32 %v739_v41, %v737_v48  ;;  %v1077_v0 = vshll.u32 %v5850_v52, 16  ;;  %v1081_v7 = vshrl.u32 %v5850_v52, 16  ;;  %v1095_v31 = vrot.slane %v1093_v25, 1  ;;  %v5860_v41 = vld [vmem:[%s6005_s25 + $0x118] sm:$0xff]   ;;  %v5867_v48 = vld [vmem:[%s6005_s25 + $0xe0] sm:$0xff]  }
  0x36   : > { %v753_v9 = vrot.slane %v751_v61, 1  ;;  %v749_v12 = vor.u32 %v747_v60, %v745_v55  ;;  %v5876_v52 = vld [vmem:[%s6005_s25 + $0xb8] sm:$0xff]   ;;  %v1818_v60 = vshrl.u32 %v5875_v50, 16  ;;  %v1822_v61 = vrot.slane %v1820_v53, 1  ;;  %v6234_v53 = vld [vmem:[%s7250_s1 + $0x28] sm:$0xf] }
  0x37   : > { %v746_v2 = vsel %vm686_vm2, %v741_v54, %v745_v55  ;;  %v1096_v34 = vsel %vm686_vm2, %v1091_v30, %v1095_v31  ;;  %v5878_v54 = vld [vmem:[%s6005_s25 + $0x110] sm:$0xff]   ;;  %v2146_v55 = vshll.u32 %v5877_v51, 16  ;;  %v5885_v31 = vld [vmem:[%s6005_s25 + $0xd8] sm:$0xff]  }
  0x38   : > { %v754_v19 = vsel %vm686_vm2, %v749_v12, %v753_v9  ;;  %v1829_v12 = vshrl.u32 %v5876_v52, 16 }
  0x3b   : > { %5482 = vmatmul.mubr.msk.bf16.vlgmr.msra.gmra.mxu0 %vm266_vm1, %v706_v14  ;;  %5504 = vmatmul.mubr.msk.bf16.vlgmr.msra.gmra.mxu1 %vm266_vm1, %v1032_v17  ;;  %v1079_v14 = vrot.slane %v1077_v0, 1  ;;  %v2148_v0 = vrot.slane %v2146_v55, 1  ;;  %v6240_v55 = vld [vmem:[%s7250_s1 + $0x2c] sm:$0xf] }
  0x3c   : > { %5524 = vmatpush3.bf16.msra.mxu0 %v1367_v3  ;;  %5546 = vmatpush3.bf16.msra.mxu1 %v1606_v4  ;;  %v755_v3 = vshrl.u32 %v5849_v49, 16  ;;  %v759_v4 = vshll.u32 %v5851_v56, 16  ;;  %v5868_v49 = vld [vmem:[%s6005_s25 + $0x138] sm:$0xff]   ;;  %v5869_v56 = vld [vmem:[%s6005_s25 + $0xe8] sm:$0xff]  }
  0x3d   : > { %5485 = vmatprep.mubr.msk.bf16.mxu0 %vm266_vm1, %v714_v13  ;;  %5507 = vmatprep.mubr.msk.bf16.mxu1 %vm266_vm1, %v1040_v22  ;;  %v1083_v18 = vor.u32 %v1081_v7, %v1079_v14  ;;  %v767_v13 = vshll.u32 %v5853_v5, 16  ;;  %v1080_v22 = vsel %vm686_vm2, %v1075_v15, %v1079_v14  ;;  %v1823_v5 = vor.u32 %v1822_v61, %v1818_v60  ;;  %v5882_v14 = vld [vmem:[%s6005_s25 + $0x120] sm:$0xff]  }
  0x3e   : > { %5793 = vmatprep.subr.msk.bf16.mxu0 %vm297_vm0, %v6089_v21  ;;  %5794 = vmatprep.subr.msk.bf16.mxu1 %vm297_vm0, %v6097_v26  ;;  %v757_v16 = vor.u32 %v755_v3, %v753_v9  ;;  %v761_v17 = vrot.slane %v759_v4, 1  ;;  %v6165_v21 = vld [vmem:[%s7250_s1 + $0x24] sm:$0xf]  ;;  %v5861_v26 = vld [vmem:[%s6005_s25 + $0xc8] sm:$0xff]   ;;  %v5880_v3 = vld [vmem:[%s6005_s25 + $0x118] sm:$0xff]   ;;  %v2149_v7 = vor.u32 %v2148_v0, %v2144_v63  ;;  %v1861_v63 = vshrl.u32 %v5885_v31, 16 }
  0x3f   : > { %v1088_v27 = vsel %vm686_vm2, %v1083_v18, %v1087_v10  ;;  %v769_v28 = vrot.slane %v767_v13, 1  ;;  %v5873_v4 = vld [vmem:[%s6005_s25 + $0xf8] sm:$0xff]   ;;  %v5881_v9 = vld [vmem:[%s6005_s25 + $0xc8] sm:$0xff]   ;;  %v2155_v18 = vshrl.u32 %v5878_v54, 16  ;;  %v5883_v13 = vld [vmem:[%s6005_s25 + $0xd0] sm:$0xff]  }
  0x40   : > { %v762_v23 = vsel %vm686_vm2, %v757_v16, %v761_v17  ;;  %v765_v29 = vor.u32 %v763_v20, %v761_v17  ;;  %v2159_v16 = vshll.u32 %v5880_v3, 16  ;;  %v1841_v20 = vshll.u32 %v5881_v9, 16 }
  0x41   : > { %v1849_v30 = vshll.u32 %v5883_v13, 16 }
  0x42   : > { %v770_v32 = vsel %vm686_vm2, %v765_v29, %v769_v28  ;;  %v2161_v28 = vrot.slane %v2159_v16, 1 }
  0x43   : > { %5486 = vmatmul.mubr.msk.bf16.gmra.mxu0 %vm266_vm1, %v722_v36  ;;  %5508 = vmatmul.mubr.msk.bf16.gmra.mxu1 %vm266_vm1, %v1048_v43  ;;  %v5857_v36 = vld [vmem:[%s6005_s25 + $0xb8] sm:$0xff]   ;;  %v5862_v43 = vld [vmem:[%s6005_s25 + $0x120] sm:$0xff]  }
  0x44   : > { %5489 = vmatprep.mubr.msk.bf16.mxu0 %vm266_vm1, %v730_v44  ;;  %5511 = vmatprep.mubr.msk.bf16.mxu1 %vm266_vm1, %v1056_v45  ;;  %v5863_v44 = vld [vmem:[%s6005_s25 + $0xd0] sm:$0xff]   ;;  %v5864_v45 = vld [vmem:[%s6005_s25 + $0x128] sm:$0xff]  }
  0x4b   : > { %5490 = vmatmul.mubr.msk.bf16.gmra.mxu0 %vm266_vm1, %v738_v62  ;;  %5512 = vmatmul.mubr.msk.bf16.gmra.mxu1 %vm266_vm1, %v1064_v1  ;;  %v1825_v62 = vshll.u32 %v5876_v52, 16  ;;  %v2151_v1 = vshll.u32 %v5878_v54, 16  ;;  %v6229_v52 = vld [vmem:[%s6005_s25 + $0xe8] sm:$0xff]  }
  0x4c   : > { %5493 = vmatprep.mubr.msk.bf16.mxu0 %vm266_vm1, %v746_v2  ;;  %5515 = vmatprep.mubr.msk.bf16.mxu1 %vm266_vm1, %v1072_v6  ;;  %v5879_v2 = vld [vmem:[%s6005_s25 + $0xc0] sm:$0xff]  }
  0x4d   : > { %v1827_v6 = vrot.slane %v1825_v62, 1  ;;  %v2153_v8 = vrot.slane %v2151_v1, 1  ;;  %v1833_v15 = vshll.u32 %v5879_v2, 16  ;;  %v1837_v10 = vshrl.u32 %v5879_v2, 16 }
  0x4f   : > { %v1828_v17 = vsel %vm686_vm2, %v1823_v5, %v1827_v6  ;;  %v1831_v25 = vor.u32 %v1829_v12, %v1827_v6  ;;  %v2157_v29 = vor.u32 %v2155_v18, %v2153_v8 }
  0x53   : > { %5494 = vmatmul.mubr.msk.bf16.gmra.mxu0 %vm266_vm1, %v754_v19  ;;  %5516 = vmatmul.mubr.msk.bf16.gmra.mxu1 %vm266_vm1, %v1080_v22  ;;  %v2154_v19 = vsel %vm686_vm2, %v2149_v7, %v2153_v8  ;;  %v2163_v22 = vshrl.u32 %v5880_v3, 16  ;;  %v5891_v8 = vld [vmem:[%s6005_s25 + $0xf0] sm:$0xff]  }
  0x54   : > { %5497 = vmatprep.mubr.msk.bf16.mxu0 %vm266_vm1, %v762_v23  ;;  %5519 = vmatprep.mubr.msk.bf16.mxu1 %vm266_vm1, %v1088_v27  ;;  %v2167_v23 = vshll.u32 %v5882_v14, 16  ;;  %v1835_v27 = vrot.slane %v1833_v15, 1 }
  0x5b   : > { %5498 = vmatmul.mubr.msk.bf16.gmra.mxu0 %vm266_vm1, %v770_v32  ;;  %5520 = vmatmul.mubr.msk.bf16.gmra.mxu1 %vm266_vm1, %v1096_v34  ;;  %v2584_v32 = vsel %vm297_vm0, %v6159_v42, 0  ;;  %v1839_v34 = vor.u32 %v1837_v10, %v1835_v27  ;;  %v1877_v10 = vshrl.u32 %v6229_v52, 16 }
  0x5c   : > { %5525 = vmatprep.mubr.msk.bf16.mxu0 %vm266_vm1, %v5855_v33  ;;  %5547 = vmatprep.mubr.msk.bf16.mxu1 %vm266_vm1, %v5856_v35  ;;  %v2910_v33 = vsel %vm297_vm0, %v6165_v21, 0  ;;  %v1843_v35 = vrot.slane %v1841_v20, 1  ;;  %v1881_v20 = vshll.u32 %v5891_v8, 16 }
  0x63   : > { %5526 = vmatmul.mubr.msk.bf16.vlgmr.msra.gmra.mxu0 %vm266_vm1, %v5857_v36  ;;  %5548 = vmatmul.mubr.msk.bf16.vlgmr.msra.gmra.mxu1 %vm266_vm1, %v5858_v37  ;;  %v5886_v36 = vld [vmem:[%s6005_s25 + $0x130] sm:$0xff]   ;;  %v2165_v37 = vor.u32 %v2163_v22, %v2161_v28  ;;  %v5893_v22 = vld [vmem:[%s6005_s25 + $0xf8] sm:$0xff]  }
  0x64   : > { %5568 = vmatpush3.bf16.msra.mxu0 %v1932_v38  ;;  %5590 = vmatpush3.bf16.msra.mxu1 %v2258_v40  ;;  %v2169_v38 = vrot.slane %v2167_v23, 1  ;;  %v2175_v40 = vshll.u32 %v5884_v24, 16  ;;  %v2187_v0 = vshrl.u32 %v5886_v36, 16  ;;  %v5894_v23 = vld [vmem:[%s6005_s25 + $0x150] sm:$0xff]  }
  0x65   : > { %5529 = vmatprep.mubr.msk.bf16.mxu0 %vm266_vm1, %v5859_v39  ;;  %5551 = vmatprep.mubr.msk.bf16.mxu1 %vm266_vm1, %v5860_v41  ;;  %v1845_v39 = vshrl.u32 %v5881_v9, 16  ;;  %v1836_v41 = vsel %vm686_vm2, %v1831_v25, %v1835_v27  ;;  %v2393_v25 = vld [vmem:[%s6005_s25 + $0x4] sm:$0xf]  ;;  %v6265_v27 = vld [vmem:[%s6005_s25 + $0x8] sm:$0xf] }
  0x66   : > { %5795 = vmatprep.subr.msk.bf16.mxu0 %vm297_vm0, %v6159_v42  ;;  %5796 = vmatprep.subr.msk.bf16.mxu1 %vm297_vm0, %v6165_v21  ;;  %v1851_v42 = vrot.slane %v1849_v30, 1  ;;  %v1844_v21 = vsel %vm686_vm2, %v1839_v34, %v1843_v35  ;;  %v2170_v50 = vsel %vm686_vm2, %v2165_v37, %v2169_v38  ;;  %v2177_v51 = vrot.slane %v2175_v40, 1  ;;  %v6270_v30 = vld [vmem:[%s6005_s25 + $0x60] sm:$0xf] }
  0x67   : > { %v1847_v54 = vor.u32 %v1845_v39, %v1843_v35  ;;  %v1885_v35 = vshrl.u32 %v5891_v8, 16  ;;  %v2215_v40 = vshll.u32 %v5894_v23, 16  ;;  %v6299_v8 = vld [vmem:[%s6005_s25 + $0x14] sm:$0xff]  }
  0x69   : > { %v1852_v1 = vsel %vm686_vm2, %v1847_v54, %v1851_v42 }
  0x6b   : > { %5530 = vmatmul.mubr.msk.bf16.gmra.mxu0 %vm266_vm1, %v5861_v26  ;;  %5552 = vmatmul.mubr.msk.bf16.gmra.mxu1 %vm266_vm1, %v5862_v43  ;;  %v2171_v26 = vshrl.u32 %v5882_v14, 16  ;;  %v1853_v43 = vshrl.u32 %v5883_v13, 16  ;;  %v5892_v13 = vld [vmem:[%s6005_s25 + $0x148] sm:$0xff]  }
  0x6c   : > { %5533 = vmatprep.mubr.msk.bf16.mxu0 %vm266_vm1, %v5863_v44  ;;  %5555 = vmatprep.mubr.msk.bf16.mxu1 %vm266_vm1, %v5864_v45  ;;  %v2162_v44 = vsel %vm686_vm2, %v2157_v29, %v2161_v28  ;;  %v1857_v45 = vshll.u32 %v5885_v31, 16  ;;  %v5036_v29 = vld [vmem:[%s6005_s25 + $0x5c] sm:$0xf]  ;;  %v2207_v34 = vshll.u32 %v5892_v13, 16  ;;  %v2211_v37 = vshrl.u32 %v5892_v13, 16 }
  0x73   : > { %5534 = vmatmul.mubr.msk.bf16.gmra.mxu0 %vm266_vm1, %v5865_v46  ;;  %5556 = vmatmul.mubr.msk.bf16.gmra.mxu1 %vm266_vm1, %v5866_v47  ;;  %v2179_v46 = vshrl.u32 %v5884_v24, 16  ;;  %v2183_v47 = vshll.u32 %v5886_v36, 16  ;;  %v1889_v36 = vshll.u32 %v5893_v22, 16 }
  0x74   : > { %5537 = vmatprep.mubr.msk.bf16.mxu0 %vm266_vm1, %v5867_v48  ;;  %5559 = vmatprep.mubr.msk.bf16.mxu1 %vm266_vm1, %v5868_v49  ;;  %v5887_v48 = vld [vmem:[%s6005_s25 + $0xe0] sm:$0xff]   ;;  %v5888_v49 = vld [vmem:[%s6005_s25 + $0x138] sm:$0xff]  }
  0x75   : > { %v2181_v60 = vor.u32 %v2179_v46, %v2177_v51  ;;  %v2185_v61 = vrot.slane %v2183_v47, 1  ;;  %v1865_v62 = vshll.u32 %v5887_v48, 16  ;;  %v2191_v2 = vshll.u32 %v5888_v49, 16  ;;  %v6283_v46 = vld [vmem:[%s6005_s25 + $0xc] sm:$0xff]  }
  0x76   : > { %v1869_v3 = vshrl.u32 %v5887_v48, 16  ;;  %v2195_v12 = vshrl.u32 %v5888_v49, 16  ;;  %v1891_v48 = vrot.slane %v1889_v36, 1 }
  0x77   : > { %v2186_v9 = vsel %vm686_vm2, %v2181_v60, %v2185_v61  ;;  %v2189_v15 = vor.u32 %v2187_v0, %v2185_v61  ;;  %v2193_v16 = vrot.slane %v2191_v2, 1  ;;  %v2219_v60 = vshrl.u32 %v5894_v23, 16 }
  0x78   : > { %v2477_v61 = vshll.u32 %v6283_v46, 16 }
  0x79   : > { %v2197_v24 = vor.u32 %v2195_v12, %v2193_v16  ;;  %v2194_v31 = vsel %vm686_vm2, %v2189_v15, %v2193_v16  ;;  %v6303_v15 = vld [vmem:[%s6005_s25 + $0x6c] sm:$0xff]  }
  0x7b   : > { %5538 = vmatmul.mubr.msk.bf16.gmra.mxu0 %vm266_vm1, %v5869_v56  ;;  %5560 = vmatmul.mubr.msk.bf16.gmra.mxu1 %vm266_vm1, %v5870_v57  ;;  %v2173_v56 = vor.u32 %v2171_v26, %v2169_v38  ;;  %v1855_v57 = vor.u32 %v1853_v43, %v1851_v42  ;;  %v5015_v38 = vcombine.low %v2393_v25, %v6265_v27  ;;  %v5896_v42 = vld [vmem:[%s6005_s25 + $0x158] ss:$0 sps:$4 sm:$0x11]   ;;  %v2811_v25 = vshll.u32 %v6303_v15, 16 }
  0x7c   : > { %5541 = vmatprep.mubr.msk.bf16.mxu0 %vm266_vm1, %v5871_v58  ;;  %5563 = vmatprep.mubr.msk.bf16.mxu1 %vm266_vm1, %v5872_v59  ;;  %v1859_v58 = vrot.slane %v1857_v45, 1  ;;  %v5890_v59 = vld [vmem:[%s6005_s25 + $0x140] sm:$0xff]   ;;  %v5058_v26 = vcombine.low %v5036_v29, %v6270_v30  ;;  %v2489_v29 = vshrl.u32 %v6299_v8, 16 }
  0x7d   : > { %v2178_v5 = vsel %vm686_vm2, %v2173_v56, %v2177_v51  ;;  %v2199_v7 = vshll.u32 %v5890_v59, 16  ;;  %v2472_v49 = vshll.u32 %v5015_v38, 16  ;;  %v2217_v51 = vrot.slane %v2215_v40, 1  ;;  %v6334_v40 = vld [vmem:[%s6005_s25 + $0x2c] sm:$0xff]  }
  0x7e   : > { %v1860_v6 = vsel %vm686_vm2, %v1855_v57, %v1859_v58  ;;  %v1863_v14 = vor.u32 %v1861_v63, %v1859_v58  ;;  %v2798_v54 = vshll.u32 %v5058_v26, 16  ;;  %v1893_v57 = vshrl.u32 %v5893_v22, 16 }
  0x7f   : > { %v2223_v63 = vshll.u32 %v5896_v42, 16  ;;  %v2470_v0 = vshrl.u32 %v5015_v38, 16 }
  0x83   : > { %5542 = vmatmul.mubr.msk.bf16.gmra.mxu0 %vm266_vm1, %v5873_v4  ;;  %5564 = vmatmul.mubr.msk.bf16.gmra.mxu1 %vm266_vm1, %v5874_v11  ;;  %v1873_v4 = vshll.u32 %v6229_v52, 16  ;;  %v1867_v11 = vrot.slane %v1865_v62, 1  ;;  %v6287_v52 = vld [vmem:[%s6005_s25 + $0x64] sm:$0xff]  }
  0x84   : > { %5569 = vmatprep.mubr.msk.bf16.mxu0 %vm266_vm1, %v1828_v17  ;;  %5591 = vmatprep.mubr.msk.bf16.mxu1 %vm266_vm1, %v2154_v19  ;;  %v2201_v19 = vrot.slane %v2199_v7, 1 }
  0x85   : > { %v1871_v17 = vor.u32 %v1869_v3, %v1867_v11  ;;  %v1875_v18 = vrot.slane %v1873_v4, 1  ;;  %v1868_v28 = vsel %vm686_vm2, %v1863_v14, %v1867_v11  ;;  %v2796_v3 = vshrl.u32 %v5058_v26, 16 }
  0x86   : > { %v2202_v39 = vsel %vm686_vm2, %v2197_v24, %v2201_v19  ;;  %v2800_v4 = vrot.slane %v2798_v54, 1  ;;  %v2225_v11 = vrot.slane %v2223_v63, 1  ;;  %v2479_v14 = vrot.slane %v2477_v61, 1  ;;  %v6362_v63 = vld [vmem:[%s7250_s1 + $0x30] sm:$0xf] }
  0x87   : > { %v1879_v43 = vor.u32 %v1877_v10, %v1875_v18  ;;  %v6309_v10 = vld [vmem:[%s6005_s25 + $0x74] sm:$0xff]   ;;  %v2807_v24 = vshrl.u32 %v6287_v52, 16 }
  0x88   : > { %v2801_v16 = vor.u32 %v2800_v4, %v2796_v3  ;;  %v6371_v3 = vld [vmem:[%s7250_s1 + $0x34] sm:$0xf] }
  0x8b   : > { %5570 = vmatmul.mubr.msk.bf16.vlgmr.msra.gmra.mxu0 %vm266_vm1, %v1836_v41  ;;  %5592 = vmatmul.mubr.msk.bf16.vlgmr.msra.gmra.mxu1 %vm266_vm1, %v2162_v44  ;;  %v5895_v41 = vld [vmem:[%s6005_s25 + $0x100] ss:$0 sps:$4 sm:$0x11]   ;;  %v1883_v44 = vrot.slane %v1881_v20, 1  ;;  %v2485_v20 = vshll.u32 %v6299_v8, 16 }
  0x8c   : > { %5612 = vmatpush3.bf16.msra.mxu0 %v2584_v32  ;;  %5634 = vmatpush3.bf16.msra.mxu1 %v2910_v33  ;;  %v1876_v32 = vsel %vm686_vm2, %v1871_v17, %v1875_v18  ;;  %v2203_v33 = vshrl.u32 %v5890_v59, 16  ;;  %v1897_v59 = vshll.u32 %v5895_v41, 16  ;;  %v6306_v18 = vld [vmem:[%s6005_s25 + $0x1c] sm:$0xff]  }
  0x8d   : > { %5573 = vmatprep.mubr.msk.bf16.mxu0 %vm266_vm1, %v1844_v21  ;;  %5595 = vmatprep.mubr.msk.bf16.mxu1 %vm266_vm1, %v2170_v50  ;;  %v2209_v21 = vrot.slane %v2207_v34, 1  ;;  %v1887_v47 = vor.u32 %v1885_v35, %v1883_v44  ;;  %v1884_v56 = vsel %vm686_vm2, %v1879_v43, %v1883_v44  ;;  %v6325_v34 = vld [vmem:[%s6005_s25 + $0x24] sm:$0xff]   ;;  %v2487_v36 = vrot.slane %v2485_v20, 1 }
  0x8e   : > { %5797 = vmatprep.subr.msk.bf16.mxu0 %vm297_vm0, %v6234_v53  ;;  %5798 = vmatprep.subr.msk.bf16.mxu1 %vm297_vm0, %v6240_v55  ;;  %v2205_v45 = vor.u32 %v2203_v33, %v2201_v19  ;;  %v1899_v7 = vrot.slane %v1897_v59, 1  ;;  %v2481_v19 = vshrl.u32 %v6283_v46, 16  ;;  %v2819_v33 = vshll.u32 %v6309_v10, 16  ;;  %v6337_v43 = vld [vmem:[%s6005_s25 + $0x84] sm:$0xff]  }
  0x8f   : > { %v2213_v50 = vor.u32 %v2211_v37, %v2209_v21  ;;  %v1892_v62 = vsel %vm686_vm2, %v1887_v47, %v1891_v48  ;;  %v6330_v37 = vld [vmem:[%s6005_s25 + $0x7c] sm:$0xff]   ;;  %v2491_v41 = vor.u32 %v2489_v29, %v2487_v36  ;;  %v2497_v47 = vshrl.u32 %v6306_v18, 16 }
  0x90   : > { %v2210_v58 = vsel %vm686_vm2, %v2205_v45, %v2209_v21  ;;  %v2483_v35 = vor.u32 %v2481_v19, %v2479_v14  ;;  %v2821_v42 = vrot.slane %v2819_v33, 1  ;;  %v2501_v45 = vshll.u32 %v6325_v34, 16 }
  0x91   : > { %v2218_v2 = vsel %vm686_vm2, %v2213_v50, %v2217_v51  ;;  %v2505_v54 = vshrl.u32 %v6325_v34, 16  ;;  %v2831_v59 = vshrl.u32 %v6330_v37, 16  ;;  %v2839_v20 = vshrl.u32 %v6337_v43, 16 }
  0x92   : > { %v2488_v21 = vsel %vm686_vm2, %v2483_v35, %v2487_v36  ;;  %v6404_v35 = vld [vmem:[%s6005_s25 + $0x9c] sm:$0xff]  }
  0x93   : > { %5574 = vmatmul.mubr.msk.bf16.gmra.mxu0 %vm266_vm1, %v1852_v1  ;;  %5596 = vmatmul.mubr.msk.bf16.gmra.mxu1 %vm266_vm1, %v2178_v5  ;;  %v2474_v1 = vrot.slane %v2472_v49, 1  ;;  %v2803_v5 = vshll.u32 %v6287_v52, 16  ;;  %v2827_v49 = vshll.u32 %v6330_v37, 16 }
  0x94   : > { %5577 = vmatprep.mubr.msk.bf16.mxu0 %vm266_vm1, %v1860_v6  ;;  %5599 = vmatprep.mubr.msk.bf16.mxu1 %vm266_vm1, %v2186_v9  ;;  %v1895_v6 = vor.u32 %v1893_v57, %v1891_v48  ;;  %v2221_v9 = vor.u32 %v2219_v60, %v2217_v51  ;;  %v2823_v48 = vshrl.u32 %v6309_v10, 16  ;;  %v3104_v51 = vsel %vm297_vm0, %v6234_v53, 0 }
  0x95   : > { %v2475_v12 = vor.u32 %v2474_v1, %v2470_v0  ;;  %v2805_v17 = vrot.slane %v2803_v5, 1  ;;  %v3297_v57 = vsel %vm297_vm0, %v6240_v55, 0  ;;  %v2835_v60 = vshll.u32 %v6337_v43, 16 }
  0x96   : > { %v1900_v13 = vsel %vm686_vm2, %v1895_v6, %v1899_v7  ;;  %v2226_v22 = vsel %vm686_vm2, %v2221_v9, %v2225_v11  ;;  %v2503_v53 = vrot.slane %v2501_v45, 1  ;;  %v2825_v0 = vor.u32 %v2823_v48, %v2821_v42  ;;  %v6375_v6 = vld [vmem:[%s6005_s25 + $0x3c] sm:$0xff]   ;;  %v6379_v11 = vld [vmem:[%s6005_s25 + $0x94] sm:$0xff]  }
  0x97   : > { %v2480_v23 = vsel %vm686_vm2, %v2475_v12, %v2479_v14  ;;  %v2809_v38 = vor.u32 %v2807_v24, %v2805_v17  ;;  %v2829_v1 = vrot.slane %v2827_v49, 1  ;;  %v2837_v9 = vrot.slane %v2835_v60, 1 }
  0x98   : > { %v2507_v4 = vor.u32 %v2505_v54, %v2503_v53  ;;  %v2855_v48 = vshrl.u32 %v6379_v11, 16  ;;  %v2859_v49 = vshll.u32 %v6404_v35, 16 }
  0x99   : > { %v2833_v7 = vor.u32 %v2831_v59, %v2829_v1  ;;  %v2841_v36 = vor.u32 %v2839_v20, %v2837_v9 }
  0x9b   : > { %5578 = vmatmul.mubr.msk.bf16.gmra.mxu0 %vm266_vm1, %v1868_v28  ;;  %5600 = vmatmul.mubr.msk.bf16.gmra.mxu1 %vm266_vm1, %v2194_v31  ;;  %v2806_v28 = vsel %vm686_vm2, %v2801_v16, %v2805_v17  ;;  %v2493_v31 = vshll.u32 %v6306_v18, 16  ;;  %v2830_v16 = vsel %vm686_vm2, %v2825_v0, %v2829_v1  ;;  %v2513_v17 = vshrl.u32 %v6334_v40, 16  ;;  %v6429_v0 = vld [vmem:[%s6005_s25 + $0x54] ss:$0 sps:$4 sm:$0x11]  }
  0x9c   : > { %5581 = vmatprep.mubr.msk.bf16.mxu0 %vm266_vm1, %v1876_v32  ;;  %5603 = vmatprep.mubr.msk.bf16.mxu1 %vm266_vm1, %v2202_v39  ;;  %v2815_v32 = vshrl.u32 %v6303_v15, 16  ;;  %v2813_v39 = vrot.slane %v2811_v25, 1  ;;  %v2838_v24 = vsel %vm686_vm2, %v2833_v7, %v2837_v9 }
  0x9d   : > { %v2495_v26 = vrot.slane %v2493_v31, 1  ;;  %v6399_v31 = vld [vmem:[%s6005_s25 + $0x44] sm:$0xff]  }
  0x9e   : > { %v2817_v44 = vor.u32 %v2815_v32, %v2813_v39  ;;  %v2814_v50 = vsel %vm686_vm2, %v2809_v38, %v2813_v39  ;;  %v2533_v45 = vshll.u32 %v6399_v31, 16  ;;  %v2537_v54 = vshrl.u32 %v6399_v31, 16 }
  0x9f   : > { %v2499_v55 = vor.u32 %v2497_v47, %v2495_v26  ;;  %v2529_v47 = vshrl.u32 %v6375_v6, 16 }
  0xa0   : > { %v2822_v61 = vsel %vm686_vm2, %v2817_v44, %v2821_v42  ;;  %v6411_v42 = vld [vmem:[%s6005_s25 + $0xa4] sm:$0xff]   ;;  %v2535_v60 = vrot.slane %v2533_v45, 1 }
  0xa1   : > { %v2504_v14 = vsel %vm686_vm2, %v2499_v55, %v2503_v53  ;;  %v2867_v59 = vshll.u32 %v6411_v42, 16  ;;  %v2861_v55 = vrot.slane %v2859_v49, 1 }
  0xa2   : > { %v2539_v1 = vor.u32 %v2537_v54, %v2535_v60  ;;  %v3057_v54 = vrot.slane %v6306_v18, 1  ;;  %v3949_v18 = vsel %vm297_vm0, %v6371_v3, 0 }
  0xa3   : > { %5582 = vmatmul.mubr.msk.bf16.gmra.mxu0 %vm266_vm1, %v1884_v56  ;;  %5604 = vmatmul.mubr.msk.bf16.gmra.mxu1 %vm266_vm1, %v2210_v58  ;;  %v2509_v56 = vshll.u32 %v6334_v40, 16  ;;  %v2496_v58 = vsel %vm686_vm2, %v2491_v41, %v2495_v26  ;;  %v6408_v41 = vld [vmem:[%s6005_s25 + $0x4c] sm:$0xff]   ;;  %v2869_v9 = vrot.slane %v2867_v59, 1 }
  0xa4   : > { %5585 = vmatprep.mubr.msk.bf16.mxu0 %vm266_vm1, %v1892_v62  ;;  %5607 = vmatprep.mubr.msk.bf16.mxu1 %vm266_vm1, %v2218_v2  ;;  %v6357_v62 = vld [vmem:[%s6005_s25 + $0x34] sm:$0xff]   ;;  %v6366_v2 = vld [vmem:[%s6005_s25 + $0x8c] sm:$0xff]  }
  0xa5   : > { %v2511_v5 = vrot.slane %v2509_v56, 1  ;;  %v2517_v12 = vshll.u32 %v6357_v62, 16  ;;  %v2847_v25 = vshrl.u32 %v6366_v2, 16  ;;  %v2541_v56 = vshll.u32 %v6408_v41, 16 }
  0xa7   : > { %v2512_v19 = vsel %vm686_vm2, %v2507_v4, %v2511_v5  ;;  %v2519_v29 = vrot.slane %v2517_v12, 1  ;;  %v2515_v32 = vor.u32 %v2513_v17, %v2511_v5  ;;  %v2543_v4 = vrot.slane %v2541_v56, 1  ;;  %v6433_v5 = vld [vmem:[%s6005_s25 + $0xac] ss:$0 sps:$4 sm:$0x11]  }
  0xa8   : > { %v3045_v12 = vld [vmem:[%s6005_s25 + $0x4] sm:$0xe] }
  0xa9   : > { %v2544_v20 = vsel %vm686_vm2, %v2539_v1, %v2543_v4 }
  0xab   : > { %5586 = vmatmul.mubr.msk.bf16.gmra.mxu0 %vm266_vm1, %v1900_v13  ;;  %5608 = vmatmul.mubr.msk.bf16.gmra.mxu1 %vm266_vm1, %v2226_v22  ;;  %v2843_v13 = vshll.u32 %v6366_v2, 16  ;;  %v2521_v22 = vshrl.u32 %v6357_v62, 16 }
  0xac   : > { %5613 = vmatprep.mubr.msk.bf16.mxu0 %vm266_vm1, %v2480_v23  ;;  %5635 = vmatprep.mubr.msk.bf16.mxu1 %vm266_vm1, %v2806_v28  ;;  %v2525_v23 = vshll.u32 %v6375_v6, 16  ;;  %v2851_v28 = vshll.u32 %v6379_v11, 16 }
  0xad   : > { %v2845_v33 = vrot.slane %v2843_v13, 1  ;;  %v2523_v38 = vor.u32 %v2521_v22, %v2519_v29  ;;  %v2545_v13 = vshrl.u32 %v6408_v41, 16  ;;  %v2871_v22 = vshrl.u32 %v6411_v42, 16 }
  0xae   : > { %v2527_v39 = vrot.slane %v2525_v23, 1  ;;  %v2853_v44 = vrot.slane %v2851_v28, 1  ;;  %v2875_v23 = vshll.u32 %v6433_v5, 16 }
  0xaf   : > { %v2849_v26 = vor.u32 %v2847_v25, %v2845_v33 }
  0xb0   : > { %v2857_v53 = vor.u32 %v2855_v48, %v2853_v44 }
  0xb2   : > { %v2862_v17 = vsel %vm686_vm2, %v2857_v53, %v2861_v55 }
  0xb3   : > { %5614 = vmatmul.mubr.msk.bf16.vlgmr.msra.gmra.mxu0 %vm266_vm1, %v2488_v21  ;;  %5636 = vmatmul.mubr.msk.bf16.vlgmr.msra.gmra.mxu1 %vm266_vm1, %v2814_v50  ;;  %v2520_v21 = vsel %vm686_vm2, %v2515_v32, %v2519_v29  ;;  %v2846_v50 = vsel %vm686_vm2, %v2841_v36, %v2845_v33  ;;  %v2547_v29 = vor.u32 %v2545_v13, %v2543_v4  ;;  %v2877_v36 = vrot.slane %v2875_v23, 1 }
  0xb4   : > { %5656 = vmatpush3.bf16.msra.mxu0 %v3104_v51  ;;  %5678 = vmatpush3.bf16.msra.mxu1 %v3297_v57  ;;  %v2528_v51 = vsel %vm686_vm2, %v2523_v38, %v2527_v39  ;;  %v2854_v57 = vsel %vm686_vm2, %v2849_v26, %v2853_v44  ;;  %v2873_v33 = vor.u32 %v2871_v22, %v2869_v9  ;;  %v3246_v26 = vrot.slane %v6287_v52, 1 }
  0xb5   : > { %5617 = vmatprep.mubr.msk.bf16.mxu0 %vm266_vm1, %v2496_v58  ;;  %5639 = vmatprep.mubr.msk.bf16.mxu1 %vm266_vm1, %v2822_v61  ;;  %v2863_v58 = vshrl.u32 %v6404_v35, 16  ;;  %v2531_v61 = vor.u32 %v2529_v47, %v2527_v39  ;;  %v3053_v39 = vrot.slane %v6283_v46, 1  ;;  %v3055_v46 = vrot.slane %v6299_v8, 1 }
  0xb6   : > { %5799 = vmatprep.subr.msk.bf16.mxu0 %vm297_vm0, %v6362_v63  ;;  %5800 = vmatprep.subr.msk.bf16.mxu1 %vm297_vm0, %v6371_v3  ;;  %v2878_v44 = vsel %vm686_vm2, %v2873_v33, %v2877_v36  ;;  %v6492_v3 = vld [vmem:[%s7250_s1 + $0x3c] sm:$0xf]  ;;  %v3061_v13 = vrot.slane %v6334_v40, 1 }
  0xb7   : > { %v2865_v7 = vor.u32 %v2863_v58, %v2861_v55  ;;  %v3250_v58 = vrot.slane %v6309_v10, 1  ;;  %v3623_v55 = vsel %vm297_vm0, %v6362_v63, 0  ;;  %v3058_v1 = vsel %vm3051_vm3, %v3055_v46, %v3057_v54 }
  0xb8   : > { %v3059_v63 = vrot.slane %v6325_v34, 1  ;;  %v3254_v34 = vrot.slane %v6337_v43, 1 }
  0xb9   : > { %v2870_v25 = vsel %vm686_vm2, %v2865_v7, %v2869_v9  ;;  %v6485_v9 = vld [vmem:[%s7250_s1 + $0x38] sm:$0xf] }
  0xbb   : > { %5618 = vmatmul.mubr.msk.bf16.gmra.mxu0 %vm266_vm1, %v2504_v14  ;;  %5640 = vmatmul.mubr.msk.bf16.gmra.mxu1 %vm266_vm1, %v2830_v16  ;;  %v5091_v14 = vld [vmem:[%s6005_s25 + $0x5c] sm:$0xe]  ;;  %v2536_v16 = vsel %vm686_vm2, %v2531_v61, %v2535_v60  ;;  %v3056_v60 = vsel %vm3051_vm3, %v3053_v39, %v3055_v46 }
  0xbc   : > { %5621 = vmatprep.mubr.msk.bf16.mxu0 %vm266_vm1, %v2512_v19  ;;  %5643 = vmatprep.mubr.msk.bf16.mxu1 %vm266_vm1, %v2838_v24  ;;  %v2549_v19 = vshll.u32 %v6429_v0, 16  ;;  %v5080_v24 = vcombine.low %v3045_v12, %v6265_v27  ;;  %v5093_v28 = vcombine.low %v5091_v14, %v6270_v30 }
  0xbe   : > { %v2551_v32 = vrot.slane %v2549_v19, 1  ;;  %v3052_v38 = vrot.slane %v5080_v24, 1  ;;  %v3245_v27 = vrot.slane %v5093_v28, 1  ;;  %v3060_v24 = vsel %vm3051_vm3, %v3057_v54, %v3059_v63 }
  0xbf   : > { %v3062_v28 = vsel %vm3051_vm3, %v3059_v63, %v3061_v13 }
  0xc0   : > { %v2552_v30 = vsel %vm686_vm2, %v2547_v29, %v2551_v32  ;;  %v3054_v45 = vsel %vm3051_vm3, %v3052_v38, %v3053_v39  ;;  %v3063_v38 = vrot.slane %v6357_v62, 1  ;;  %v6533_v62 = vld [vmem:[%s6005_s25 + $0x110] sm:$0xf] }
  0xc3   : > { %5622 = vmatmul.mubr.msk.bf16.gmra.mxu0 %vm266_vm1, %v2520_v21  ;;  %5644 = vmatmul.mubr.msk.bf16.gmra.mxu1 %vm266_vm1, %v2846_v50  ;;  %v3247_v21 = vsel %vm3051_vm3, %v3245_v27, %v3246_v26  ;;  %v3248_v50 = vrot.slane %v6303_v15, 1 }
  0xc4   : > { %5625 = vmatprep.mubr.msk.bf16.mxu0 %vm266_vm1, %v2528_v51  ;;  %5647 = vmatprep.mubr.msk.bf16.mxu1 %vm266_vm1, %v2854_v57 }
  0xc5   : > { %v3249_v53 = vsel %vm3051_vm3, %v3246_v26, %v3248_v50  ;;  %v3251_v7 = vsel %vm3051_vm3, %v3248_v50, %v3250_v58  ;;  %v3256_v26 = vrot.slane %v6366_v2, 1 }
  0xcb   : > { %5626 = vmatmul.mubr.msk.bf16.gmra.mxu0 %vm266_vm1, %v2536_v16  ;;  %5648 = vmatmul.mubr.msk.bf16.gmra.mxu1 %vm266_vm1, %v2862_v17  ;;  %v3252_v17 = vrot.slane %v6330_v37, 1 }
  0xcc   : > { %5629 = vmatprep.mubr.msk.bf16.mxu0 %vm266_vm1, %v2544_v20  ;;  %5651 = vmatprep.mubr.msk.bf16.mxu1 %vm266_vm1, %v2870_v25 }
  0xcd   : > { %v3253_v25 = vsel %vm3051_vm3, %v3250_v58, %v3252_v17  ;;  %v3255_v29 = vsel %vm3051_vm3, %v3252_v17, %v3254_v34  ;;  %v3262_v17 = vrot.slane %v6411_v42, 1 }
  0xd3   : > { %v5439_v47 = vpop.f32.mrf.mxu0  ;;  %5630 = vmatmul.mubr.msk.bf16.gmra.mxu0 %vm266_vm1, %v2552_v30  ;;  %v5461_v48 = vpop.f32.mrf.mxu1  ;;  %5652 = vmatmul.mubr.msk.bf16.gmra.mxu1 %vm266_vm1, %v2878_v44  ;;  %v3065_v30 = vrot.slane %v6375_v6, 1  ;;  %v3257_v6 = vsel %vm3051_vm3, %v3254_v34, %v3256_v26 }
  0xd4   : > { %5657 = vmatprep.mubr.msk.bf16.mxu0 %vm266_vm1, %v3054_v45  ;;  %v6461_v49 = vadd.f32 %v5461_v48, %v5439_v47  ;;  %5679 = vmatprep.mubr.msk.bf16.mxu1 %vm266_vm1, %v3247_v21  ;;  %v3258_v45 = vrot.slane %v6379_v11, 1  ;;  %v5104_v21 = vld [vmem:[%s6005_s25 + $0xb4] sm:$0xf]  ;;  %v6527_v47 = vld [vmem:[%s6005_s25 + $0xb8] sm:$0xf] }
  0xd5   : > { %v335_v52 = vpop.f32.mrf.mxu0  ;;  %v531_v51 = vpop.f32.mrf.mxu1  ;;  %v5126_v11 = vcombine.low %v5104_v21, %v6527_v47  ;;  %v3264_v21 = vrot.slane %v6433_v5, 1 }
  0xd6   : > { %v6466_v56 = vadd.f32 %v531_v51, %v335_v52  ;;  %v5147_v52 = vld [vmem:[%s6005_s25 + $0x10c] sm:$0xf]  ;;  %v3064_v51 = vsel %vm3051_vm3, %v3061_v13, %v3063_v38  ;;  %v6559_v13 = vld [vmem:[%s6005_s25 + $0x114] sm:$0xff]  }
  0xd7   : > { %v5440_v57 = vpop.f32.mrf.mxu0  ;;  %v5462_v59 = vpop.f32.mrf.mxu1  ;;  %v3511_v63 = vshll.u32 %v5126_v11, 16 }
  0xd8   : > { %v6470_v61 = vadd.f32 %v5462_v59, %v5440_v57  ;;  %v3066_v57 = vsel %vm3051_vm3, %v3063_v38, %v3065_v30  ;;  %v3259_v59 = vsel %vm3051_vm3, %v3256_v26, %v3258_v45  ;;  %v3842_v38 = vshll.u32 %v6559_v13, 16 }
  0xd9   : > { %v338_v8 = vpop.f32.mrf.mxu0  ;;  %v534_v15 = vpop.f32.mrf.mxu1 }
  0xda   : > { %v6478_v4 = vadd.f32 %v534_v15, %v338_v8  ;;  %v3067_v15 = vrot.slane %v6399_v31, 1 }
  0xdb   : > { %v5443_v10 = vpop.f32.mrf.mxu0  ;;  %5658 = vmatmul.mubr.msk.bf16.vlgmr.msra.gmra.mxu0 %vm266_vm1, %v3056_v60  ;;  %v5465_v12 = vpop.f32.mrf.mxu1  ;;  %5680 = vmatmul.mubr.msk.bf16.vlgmr.msra.gmra.mxu1 %vm266_vm1, %v3249_v53  ;;  %v5169_v60 = vcombine.low %v5147_v52, %v6533_v62 }
  0xdc   : > { %5700 = vmatpush3.bf16.msra.mxu0 %v3623_v55  ;;  %v6494_v14 = vadd.f32 %v5465_v12, %v5443_v10  ;;  %5722 = vmatpush3.bf16.msra.mxu1 %v3949_v18  ;;  %v3260_v18 = vrot.slane %v6404_v35, 1  ;;  %v6555_v12 = vld [vmem:[%s6005_s25 + $0xbc] sm:$0xff]  }
  0xdd   : > { %v351_v16 = vpop.f32.mrf.mxu0  ;;  %5661 = vmatprep.mubr.msk.bf16.mxu0 %vm266_vm1, %v3058_v1  ;;  %v547_v19 = vpop.f32.mrf.mxu1  ;;  %5683 = vmatprep.mubr.msk.bf16.mxu1 %vm266_vm1, %v3251_v7  ;;  %v3069_v1 = vrot.slane %v6408_v41, 1  ;;  %v3068_v41 = vsel %vm3051_vm3, %v3065_v30, %v3067_v15  ;;  %v3516_v42 = vshll.u32 %v6555_v12, 16 }
  0xde   : > { %5801 = vmatprep.subr.msk.bf16.mxu0 %vm297_vm0, %v6485_v9  ;;  %v6503_v20 = vadd.f32 %v547_v19, %v351_v16  ;;  %5802 = vmatprep.subr.msk.bf16.mxu1 %vm297_vm0, %v6492_v3  ;;  %v3837_v19 = vshll.u32 %v5169_v60, 16 }
  0xdf   : > { %v5444_v22 = vpop.f32.mrf.mxu0  ;;  %v5466_v23 = vpop.f32.mrf.mxu1 }
  0xe0   : > { %v6508_v37 = vadd.f32 %v5466_v23, %v5444_v22  ;;  %v3261_v22 = vsel %vm3051_vm3, %v3258_v45, %v3260_v18  ;;  %v3070_v23 = vsel %vm3051_vm3, %v3067_v15, %v3069_v1  ;;  %v3071_v45 = vrot.slane %v6429_v0, 1 }
  0xe1   : > { %v354_v40 = vpop.f32.mrf.mxu0  ;;  %v550_v43 = vpop.f32.mrf.mxu1  ;;  %v3844_v0 = vrot.slane %v3842_v38, 1 }
  0xe2   : > { %v6513_v32 = vadd.f32 %v550_v43, %v354_v40  ;;  %v3072_v15 = vsel %vm3051_vm3, %v3069_v1, %v3071_v45 }
  0xe3   : > { %v5447_v33 = vpop.f32.mrf.mxu0  ;;  %5662 = vmatmul.mubr.msk.bf16.gmra.mxu0 %vm266_vm1, %v3060_v24  ;;  %v5469_v36 = vpop.f32.mrf.mxu1  ;;  %5684 = vmatmul.mubr.msk.bf16.gmra.mxu1 %vm266_vm1, %v3253_v25  ;;  %v3509_v25 = vshrl.u32 %v5126_v11, 16  ;;  %v3520_v11 = vshrl.u32 %v6555_v12, 16 }
  0xe4   : > { %5665 = vmatprep.mubr.msk.bf16.mxu0 %vm266_vm1, %v3062_v28  ;;  %v6519_v39 = vadd.f32 %v5469_v36, %v5447_v33  ;;  %5687 = vmatprep.mubr.msk.bf16.mxu1 %vm266_vm1, %v3255_v29  ;;  %v3513_v28 = vrot.slane %v3511_v63, 1  ;;  %v3263_v29 = vsel %vm3051_vm3, %v3260_v18, %v3262_v17  ;;  %v3835_v33 = vshrl.u32 %v5169_v60, 16 }
  0xe5   : > { %v367_v27 = vpop.f32.mrf.mxu0  ;;  %v563_v44 = vpop.f32.mrf.mxu1  ;;  %v3839_v36 = vrot.slane %v3837_v19, 1  ;;  %v3265_v18 = vsel %vm3051_vm3, %v3262_v17, %v3264_v21 }
  0xe6   : > { %v6529_v48 = vadd.f32 %v563_v44, %v367_v27  ;;  %v6572_v27 = vld [vmem:[%s6005_s25 + $0xc4] sm:$0xff]  }
  0xe7   : > { %v5448_v46 = vpop.f32.mrf.mxu0  ;;  %v5470_v50 = vpop.f32.mrf.mxu1 }
  0xe8   : > { %v6536_v54 = vadd.f32 %v5470_v50, %v5448_v46  ;;  %v6582_v46 = vld [vmem:[%s6005_s25 + $0x11c] sm:$0xff]  }
  0xe9   : > { %v370_v2 = vpop.f32.mrf.mxu0  ;;  %v566_v58 = vpop.f32.mrf.mxu1  ;;  %v3850_v63 = vshll.u32 %v6582_v46, 16 }
  0xea   : > { %v6543_v8 = vadd.f32 %v566_v58, %v370_v2  ;;  %v3518_v2 = vrot.slane %v3516_v42, 1  ;;  %v3840_v58 = vor.u32 %v3839_v36, %v3835_v33  ;;  %v3854_v42 = vshrl.u32 %v6582_v46, 16 }
  0xeb   : > { %v5451_v53 = vpop.f32.mrf.mxu0  ;;  %5666 = vmatmul.mubr.msk.bf16.gmra.mxu0 %vm266_vm1, %v3064_v51  ;;  %v5473_v55 = vpop.f32.mrf.mxu1  ;;  %5688 = vmatmul.mubr.msk.bf16.gmra.mxu1 %vm266_vm1, %v3257_v6  ;;  %v3514_v51 = vor.u32 %v3513_v28, %v3509_v25  ;;  %v6588_v6 = vld [vmem:[%s6005_s25 + $0xcc] sm:$0xff]   ;;  %v3852_v38 = vrot.slane %v3850_v63, 1 }
  0xec   : > { %5669 = vmatprep.mubr.msk.bf16.mxu0 %vm266_vm1, %v3066_v57  ;;  %v6551_v10 = vadd.f32 %v5473_v55, %v5451_v53  ;;  %5691 = vmatprep.mubr.msk.bf16.mxu1 %vm266_vm1, %v3259_v59  ;;  %v3524_v59 = vshll.u32 %v6572_v27, 16  ;;  %v6595_v53 = vld [vmem:[%s6005_s25 + $0x124] sm:$0xff]   ;;  %v3522_v1 = vor.u32 %v3520_v11, %v3518_v2  ;;  %v3845_v17 = vsel %vm686_vm2, %v3840_v58, %v3844_v0 }
  0xed   : > { %v383_v7 = vpop.f32.mrf.mxu0  ;;  %v579_v16 = vpop.f32.mrf.mxu1 }
  0xee   : > { %v6561_v34 = vadd.f32 %v579_v16, %v383_v7  ;;  %v3846_v7 = vshrl.u32 %v6559_v13, 16 }
  0xef   : > { %v5452_v31 = vpop.f32.mrf.mxu0  ;;  %v5474_v35 = vpop.f32.mrf.mxu1 }
  0xf0   : > { %v6566_v24 = vadd.f32 %v5474_v35, %v5452_v31  ;;  %v3519_v31 = vsel %vm686_vm2, %v3514_v51, %v3518_v2  ;;  %v3528_v35 = vshrl.u32 %v6572_v27, 16  ;;  %v3848_v21 = vor.u32 %v3846_v7, %v3844_v0 }
  0xf1   : > { %v386_v40 = vpop.f32.mrf.mxu0  ;;  %v582_v43 = vpop.f32.mrf.mxu1 }
  0xf2   : > { %v6574_v26 = vadd.f32 %v582_v43, %v386_v40  ;;  %v3526_v40 = vrot.slane %v3524_v59, 1  ;;  %v3858_v43 = vshll.u32 %v6595_v53, 16  ;;  %v3536_v59 = vshrl.u32 %v6588_v6, 16 }
  0xf3   : > { %v5455_v30 = vpop.f32.mrf.mxu0  ;;  %5670 = vmatmul.mubr.msk.bf16.gmra.mxu0 %vm266_vm1, %v3068_v41  ;;  %v5477_v44 = vpop.f32.mrf.mxu1  ;;  %5692 = vmatmul.mubr.msk.bf16.gmra.mxu1 %vm266_vm1, %v3261_v22  ;;  %v3532_v41 = vshll.u32 %v6588_v6, 16  ;;  %v6607_v22 = vld [vmem:[%s6005_s25 + $0xd4] sm:$0xff]  }
  0xf4   : > { %5673 = vmatprep.mubr.msk.bf16.mxu0 %vm266_vm1, %v3070_v23  ;;  %v6584_v52 = vadd.f32 %v5477_v44, %v5455_v30  ;;  %5695 = vmatprep.mubr.msk.bf16.mxu1 %vm266_vm1, %v3263_v29  ;;  %v6616_v29 = vld [vmem:[%s6005_s25 + $0x12c] sm:$0xff]   ;;  %v4142_v30 = vsel %vm297_vm0, %v6485_v9, 0  ;;  %v6624_v44 = vld [vmem:[%s6005_s25 + $0xdc] sm:$0xff]   ;;  %v3527_v58 = vsel %vm686_vm2, %v3522_v1, %v3526_v40  ;;  %v6634_v9 = vld [vmem:[%s6005_s25 + $0x134] sm:$0xff]   ;;  %v3860_v0 = vrot.slane %v3858_v43, 1 }
  0xf5   : > { %v399_v50 = vpop.f32.mrf.mxu0  ;;  %v595_v57 = vpop.f32.mrf.mxu1  ;;  %v3534_v51 = vrot.slane %v3532_v41, 1  ;;  %v3853_v41 = vsel %vm686_vm2, %v3848_v21, %v3852_v38  ;;  %v3874_v43 = vshll.u32 %v6634_v9, 16  ;;  %v6655_v21 = vld [vmem:[%s6005_s25 + $0xe4] sm:$0xff]  }
  0xf6   : > { %v6592_v5 = vadd.f32 %v595_v57, %v399_v50  ;;  %v3530_v50 = vor.u32 %v3528_v35, %v3526_v40 }
  0xf7   : > { %v5456_v60 = vpop.f32.mrf.mxu0  ;;  %v5478_v55 = vpop.f32.mrf.mxu1 }
  0xf8   : > { %v6601_v16 = vadd.f32 %v5478_v55, %v5456_v60  ;;  %v3856_v55 = vor.u32 %v3854_v42, %v3852_v38  ;;  %v3535_v1 = vsel %vm686_vm2, %v3530_v50, %v3534_v51  ;;  %v3870_v42 = vshrl.u32 %v6616_v29, 16  ;;  %v6658_v50 = vld [vmem:[%s6005_s25 + $0x13c] sm:$0xff]  }
  0xf9   : > { %v402_v19 = vpop.f32.mrf.mxu0  ;;  %v598_v23 = vpop.f32.mrf.mxu1 }
  0xfa   : > { %v6610_v25 = vadd.f32 %v598_v23, %v402_v19  ;;  %v4335_v23 = vsel %vm297_vm0, %v6492_v3, 0  ;;  %v3861_v38 = vsel %vm686_vm2, %v3856_v55, %v3860_v0  ;;  %v6670_v55 = vld [vmem:[%s6005_s25 + $0x144] sm:$0xff]  }
  0xfb   : > { %v5483_v28 = vpop.f32.mrf.mxu0  ;;  %5674 = vmatmul.mubr.msk.bf16.gmra.mxu0 %vm266_vm1, %v3072_v15  ;;  %v5505_v36 = vpop.f32.mrf.mxu1  ;;  %5696 = vmatmul.mubr.msk.bf16.gmra.mxu1 %vm266_vm1, %v3265_v18  ;;  %v3862_v15 = vshrl.u32 %v6595_v53, 16  ;;  %v3866_v18 = vshll.u32 %v6616_v29, 16 }
  0xfc   : > { %v919_v33 = vadd.f32 %v5483_v28, %v6461_v49  ;;  %5701 = vmatprep.mubr.msk.bf16.mxu0 %vm266_vm1, %v3519_v31  ;;  %5723 = vmatprep.mubr.msk.bf16.mxu1 %vm266_vm1, %v3845_v17  ;;  %v3540_v49 = vshll.u32 %v6607_v22, 16  ;;  %v3548_v31 = vshll.u32 %v6624_v44, 16 }
  0xfd   : > { %v838_v45 = vpop.f32.mrf.mxu0  ;;  %v1164_v11 = vpop.f32.mrf.mxu1  ;;  %v3864_v3 = vor.u32 %v3862_v15, %v3860_v0 }
  0xfe   : > { %v6628_v2 = vadd.f32 %v5505_v36, %v919_v33  ;;  %v917_v57 = vadd.f32 %v838_v45, %v6466_v56  ;;  %v3544_v56 = vshrl.u32 %v6607_v22, 16  ;;  %v3542_v17 = vrot.slane %v3540_v49, 1 }
  0xff   : > { %v5484_v60 = vpop.f32.mrf.mxu0  ;;  %v5506_v19 = vpop.f32.mrf.mxu1  ;;  %v3538_v36 = vor.u32 %v3536_v59, %v3534_v51  ;;  %v3868_v45 = vrot.slane %v3866_v18, 1  ;;  %v3550_v51 = vrot.slane %v3548_v31, 1  ;;  %v3552_v59 = vshrl.u32 %v6624_v44, 16 }
 0x100   : > { %v6638_v7 = vadd.f32 %v1164_v11, %v917_v57  ;;  %v920_v63 = vadd.f32 %v5484_v60, %v6470_v61  ;;  %v3546_v11 = vor.u32 %v3544_v56, %v3542_v17  ;;  %v6667_v60 = vld [vmem:[%s6005_s25 + $0xec] sm:$0xff]   ;;  %v3876_v18 = vrot.slane %v3874_v43, 1 }
 0x101   : > { %v841_v35 = vpop.f32.mrf.mxu0  ;;  %v1167_v28 = vpop.f32.mrf.mxu1  ;;  %v3878_v56 = vshrl.u32 %v6634_v9, 16  ;;  %v3556_v31 = vshll.u32 %v6655_v21, 16  ;;  %v3886_v43 = vshrl.u32 %v6658_v50, 16 }
 0x102   : > { %v6647_v40 = vadd.f32 %v5506_v19, %v920_v63  ;;  %v918_v61 = vadd.f32 %v841_v35, %v6478_v4  ;;  %v3543_v19 = vsel %vm686_vm2, %v3538_v36, %v3542_v17  ;;  %v3882_v35 = vshll.u32 %v6658_v50, 16 }
 0x103   : > { %v5487_v33 = vpop.f32.mrf.mxu0  ;;  %5702 = vmatmul.mubr.msk.bf16.vlgmr.msra.gmra.mxu0 %vm266_vm1, %v3527_v58  ;;  %v5509_v57 = vpop.f32.mrf.mxu1  ;;  %5724 = vmatmul.mubr.msk.bf16.vlgmr.msra.gmra.mxu1 %vm266_vm1, %v3853_v41  ;;  %v3564_v17 = vshll.u32 %v6667_v60, 16 }
 0x104   : > { %v6660_v4 = vadd.f32 %v1167_v28, %v918_v61  ;;  %v923_v49 = vadd.f32 %v5487_v33, %v6494_v14  ;;  %5744 = vmatpush3.bf16.msra.mxu0 %v4142_v30  ;;  %5766 = vmatpush3.bf16.msra.mxu1 %v4335_v23  ;;  %v3872_v30 = vor.u32 %v3870_v42, %v3868_v45  ;;  %v3560_v42 = vshrl.u32 %v6655_v21, 16 }
 0x105   : > { %v854_v58 = vpop.f32.mrf.mxu0  ;;  %5705 = vmatprep.mubr.msk.bf16.mxu0 %vm266_vm1, %v3535_v1  ;;  %v1180_v15 = vpop.f32.mrf.mxu1  ;;  %5727 = vmatprep.mubr.msk.bf16.mxu1 %vm266_vm1, %v3861_v38  ;;  %v3551_v61 = vsel %vm686_vm2, %v3546_v11, %v3550_v51  ;;  %v3890_v33 = vshll.u32 %v6670_v55, 16  ;;  %v3884_v11 = vrot.slane %v3882_v35, 1 }
 0x106   : > { %v6672_v0 = vadd.f32 %v5509_v57, %v923_v49  ;;  %v921_v14 = vadd.f32 %v854_v58, %v6503_v20  ;;  %v3869_v20 = vsel %vm686_vm2, %v3864_v3, %v3868_v45  ;;  %v3877_v3 = vsel %vm686_vm2, %v3872_v30, %v3876_v18  ;;  %v6695_v58 = vld [vmem:[%s6005_s25 + $0xf4] sm:$0xff]   ;;  %v6703_v30 = vld [vmem:[%s6005_s25 + $0x14c] sm:$0xff]  }
 0x107   : > { %v5488_v63 = vpop.f32.mrf.mxu0  ;;  %v5510_v1 = vpop.f32.mrf.mxu1  ;;  %v3554_v49 = vor.u32 %v3552_v59, %v3550_v51  ;;  %v3558_v57 = vrot.slane %v3556_v31, 1  ;;  %7256 = vst [vmem:[#allocation2_spill] sm:$0xff] %v6695_v58  ;;  %7257 = vst [vmem:[#allocation3_spill] sm:$0xff] %v6703_v30  ;;  %v3566_v59 = vrot.slane %v3564_v17, 1  ;;  %v3888_v31 = vor.u32 %v3886_v43, %v3884_v11 }
 0x108   : > { %v6680_v41 = vadd.f32 %v1180_v15, %v921_v14  ;;  %v924_v23 = vadd.f32 %v5488_v63, %v6508_v37  ;;  %v3892_v35 = vrot.slane %v3890_v33, 1 }
 0x109   : > { %v857_v28 = vpop.f32.mrf.mxu0  ;;  %v1183_v38 = vpop.f32.mrf.mxu1  ;;  %v3562_v51 = vor.u32 %v3560_v42, %v3558_v57  ;;  %v3572_v42 = vshll.u32 %v6695_v58, 16 }
 0x10a   : > { %v6689_v36 = vadd.f32 %v5510_v1, %v924_v23  ;;  %v922_v37 = vadd.f32 %v857_v28, %v6513_v32  ;;  %v3880_v32 = vor.u32 %v3878_v56, %v3876_v18  ;;  %v6707_v23 = vld [vmem:[%s6005_s25 + $0xfc] sm:$0xff]   ;;  %v3559_v18 = vsel %vm686_vm2, %v3554_v49, %v3558_v57 }
 0x10b   : > { %v5491_v45 = vpop.f32.mrf.mxu0  ;;  %5706 = vmatmul.mubr.msk.bf16.gmra.mxu0 %vm266_vm1, %v3543_v19  ;;  %v5513_v63 = vpop.f32.mrf.mxu1  ;;  %5728 = vmatmul.mubr.msk.bf16.gmra.mxu1 %vm266_vm1, %v3869_v20  ;;  %v6713_v20 = vld [vmem:[%s6005_s25 + $0x154] sm:$0xff]   ;;  %v3568_v56 = vshrl.u32 %v6667_v60, 16  ;;  %v3893_v49 = vsel %vm686_vm2, %v3888_v31, %v3892_v35  ;;  %v3576_v57 = vshrl.u32 %v6695_v58, 16  ;;  %v3574_v31 = vrot.slane %v3572_v42, 1 }
 0x10c   : > { %v6697_v14 = vadd.f32 %v1183_v38, %v922_v37  ;;  %v927_v15 = vadd.f32 %v5491_v45, %v6519_v39  ;;  %5709 = vmatprep.mubr.msk.bf16.mxu0 %vm266_vm1, %v3551_v61  ;;  %5731 = vmatprep.mubr.msk.bf16.mxu1 %vm266_vm1, %v3877_v3  ;;  %v3894_v37 = vshrl.u32 %v6670_v55, 16  ;;  %v3885_v38 = vsel %vm686_vm2, %v3880_v32, %v3884_v11 }
 0x10d   : > { %v870_v19 = vpop.f32.mrf.mxu0  ;;  %v1196_v28 = vpop.f32.mrf.mxu1  ;;  %v3567_v45 = vsel %vm686_vm2, %v3562_v51, %v3566_v59  ;;  %v3906_v11 = vshll.u32 %v6713_v20, 16  ;;  %v3570_v51 = vor.u32 %v3568_v56, %v3566_v59  ;;  %v3578_v59 = vor.u32 %v3576_v57, %v3574_v31  ;;  %v6744_v56 = vld [vmem:[%s6005_s25 + $0x15c] ss:$0 sps:$4 sm:$0x11]  }
 0x10e   : > { %v6709_v1 = vadd.f32 %v5513_v63, %v927_v15  ;;  %v925_v39 = vadd.f32 %v870_v19, %v6529_v48  ;;  %v3898_v48 = vshll.u32 %v6703_v30, 16  ;;  %v3580_v15 = vshll.u32 %v6707_v23, 16 }
 0x10f   : > { %v5492_v61 = vpop.f32.mrf.mxu0  ;;  %v5514_v33 = vpop.f32.mrf.mxu1 }
 0x110   : > { %v6719_v17 = vadd.f32 %v1196_v28, %v925_v39  ;;  %v928_v43 = vadd.f32 %v5492_v61, %v6536_v54  ;;  %v3902_v39 = vshrl.u32 %v6703_v30, 16  ;;  %v3584_v30 = vshrl.u32 %v6707_v23, 16 }
 0x111   : > { %v873_v3 = vpop.f32.mrf.mxu0  ;;  %v1199_v54 = vpop.f32.mrf.mxu1 }
 0x112   : > { %v6728_v63 = vadd.f32 %v5514_v33, %v928_v43  ;;  %v926_v19 = vadd.f32 %v873_v3, %v6543_v8  ;;  %v3900_v8 = vrot.slane %v3898_v48, 1  ;;  %v6740_v43 = vld [vmem:[%s6005_s25 + $0x104] ss:$0 sps:$4 sm:$0x11]   ;;  %v3896_v3 = vor.u32 %v3894_v37, %v3892_v35  ;;  %v5203_v35 = vld [vmem:[%s6005_s25 + $0x10c] sm:$0xe] }
 0x113   : > { %v5495_v32 = vpop.f32.mrf.mxu0  ;;  %5710 = vmatmul.mubr.msk.bf16.gmra.mxu0 %vm266_vm1, %v3559_v18  ;;  %v5517_v58 = vpop.f32.mrf.mxu1  ;;  %5732 = vmatmul.mubr.msk.bf16.gmra.mxu1 %vm266_vm1, %v3885_v38  ;;  %7258 = vst [vmem:[#allocation4_spill] sm:$0xff] %v6740_v43  ;;  %v3582_v18 = vrot.slane %v3580_v15, 1  ;;  %v3588_v15 = vshll.u32 %v6740_v43, 16 }
 0x114   : > { %v6734_v28 = vadd.f32 %v1199_v54, %v926_v19  ;;  %v931_v61 = vadd.f32 %v5495_v32, %v6551_v10  ;;  %5713 = vmatprep.mubr.msk.bf16.mxu0 %vm266_vm1, %v3567_v45  ;;  %5735 = vmatprep.mubr.msk.bf16.mxu1 %vm266_vm1, %v3893_v49  ;;  %v3904_v38 = vor.u32 %v3902_v39, %v3900_v8  ;;  %v3908_v54 = vrot.slane %v3906_v11, 1  ;;  %v5190_v45 = vld [vmem:[%s6005_s25 + $0xb4] sm:$0xe] }
 0x115   : > { %v886_v33 = vpop.f32.mrf.mxu0  ;;  %v1212_v19 = vpop.f32.mrf.mxu1  ;;  %v3575_v32 = vsel %vm686_vm2, %v3570_v51, %v3574_v31  ;;  %v3901_v39 = vsel %vm686_vm2, %v3896_v3, %v3900_v8  ;;  %v3583_v11 = vsel %vm686_vm2, %v3578_v59, %v3582_v18  ;;  %v5192_v51 = vcombine.low %v5190_v45, %v6527_v47 }
 0x116   : > { %v6746_v42 = vadd.f32 %v5517_v58, %v931_v61  ;;  %v929_v10 = vadd.f32 %v886_v33, %v6561_v34  ;;  %v3910_v58 = vshrl.u32 %v6713_v20, 16  ;;  %v3914_v61 = vshll.u32 %v6744_v56, 16 }
 0x117   : > { %v5496_v48 = vpop.f32.mrf.mxu0  ;;  %v5518_v57 = vpop.f32.mrf.mxu1  ;;  %v3586_v47 = vor.u32 %v3584_v30, %v3582_v18  ;;  %v3590_v59 = vrot.slane %v3588_v15, 1 }
 0x118   : > { %v6753_v37 = vadd.f32 %v1212_v19, %v929_v10  ;;  %v932_v49 = vadd.f32 %v5496_v48, %v6566_v24  ;;  %v3909_v24 = vsel %vm686_vm2, %v3904_v38, %v3908_v54  ;;  %v5205_v19 = vcombine.low %v5203_v35, %v6533_v62 }
 0x119   : > { %v889_v34 = vpop.f32.mrf.mxu0  ;;  %v1215_v10 = vpop.f32.mrf.mxu1  ;;  %v3912_v45 = vor.u32 %v3910_v58, %v3908_v54  ;;  %v3916_v38 = vrot.slane %v3914_v61, 1  ;;  %v4090_v62 = vrot.slane %v5192_v51, 1  ;;  %v4091_v35 = vrot.slane %v6555_v12, 1 }
 0x11a   : > { %v6762_v31 = vadd.f32 %v5518_v57, %v932_v49  ;;  %v930_v33 = vadd.f32 %v889_v34, %v6574_v26  ;;  %v4283_v57 = vrot.slane %v5205_v19, 1  ;;  %v4284_v34 = vrot.slane %v6559_v13, 1 }
 0x11b   : > { %v5499_v48 = vpop.f32.mrf.mxu0  ;;  %5714 = vmatmul.mubr.msk.bf16.gmra.mxu0 %vm266_vm1, %v3575_v32  ;;  %v5521_v3 = vpop.f32.mrf.mxu1  ;;  %5736 = vmatmul.mubr.msk.bf16.gmra.mxu1 %vm266_vm1, %v3901_v39  ;;  %v3591_v58 = vsel %vm686_vm2, %v3586_v47, %v3590_v59  ;;  %v4092_v12 = vsel %vm3051_vm3, %v4090_v62, %v4091_v35  ;;  %v4093_v19 = vrot.slane %v6572_v27, 1 }
 0x11c   : > { %v6768_v43 = vadd.f32 %v1215_v10, %v930_v33  ;;  %v935_v8 = vadd.f32 %v5499_v48, %v6584_v52  ;;  %5717 = vmatprep.mubr.msk.bf16.mxu0 %vm266_vm1, %v3583_v11  ;;  %5739 = vmatprep.mubr.msk.bf16.mxu1 %vm266_vm1, %v3909_v24  ;;  %v3917_v11 = vsel %vm686_vm2, %v3912_v45, %v3916_v38 }
 0x11d   : > { %v902_v26 = vpop.f32.mrf.mxu0  ;;  %v1228_v52 = vpop.f32.mrf.mxu1  ;;  %v4285_v13 = vsel %vm3051_vm3, %v4283_v57, %v4284_v34  ;;  %v4094_v62 = vsel %vm3051_vm3, %v4091_v35, %v4093_v19 }
 0x11e   : > { %v6775_v32 = vadd.f32 %v5521_v3, %v935_v8  ;;  %v933_v49 = vadd.f32 %v902_v26, %v6592_v5  ;;  %v4095_v8 = vrot.slane %v6588_v6, 1 }
 0x11f   : > { %v5500_v30 = vpop.f32.mrf.mxu0  ;;  %v5522_v54 = vpop.f32.mrf.mxu1 }
 0x120   : > { %v6779_v18 = vadd.f32 %v1228_v52, %v933_v49  ;;  %v936_v15 = vadd.f32 %v5500_v30, %v6601_v16  ;;  %v4096_v6 = vsel %vm3051_vm3, %v4093_v19, %v4095_v8 }
 0x121   : > { %v905_v39 = vpop.f32.mrf.mxu0  ;;  %v1231_v51 = vpop.f32.mrf.mxu1 }
 0x122   : > { %v6785_v61 = vadd.f32 %v5522_v54, %v936_v15  ;;  %v934_v5 = vadd.f32 %v905_v39, %v6610_v25  ;;  %v4286_v25 = vrot.slane %v6582_v46, 1 }
 0x123   : > { %v5527_v33 = vpop.f32.mrf.mxu0  ;;  %5718 = vmatmul.mubr.msk.bf16.gmra.mxu0 %vm266_vm1, %v3591_v58  ;;  %v5549_v24 = vpop.f32.mrf.mxu1  ;;  %5740 = vmatmul.mubr.msk.bf16.gmra.mxu1 %vm266_vm1, %v3917_v11  ;;  %v4099_v58 = vrot.slane %v6624_v44, 1 }
 0x124   : > { %v6790_v10 = vadd.f32 %v1231_v51, %v934_v5  ;;  %v1484_v16 = vadd.f32 %v5527_v33, %v6628_v2  ;;  %5745 = vmatprep.mubr.msk.bf16.mxu0 %vm266_vm1, %v4092_v12  ;;  %5767 = vmatprep.mubr.msk.bf16.mxu1 %vm266_vm1, %v4285_v13  ;;  %v4288_v2 = vrot.slane %v6595_v53, 1  ;;  %v4287_v46 = vsel %vm3051_vm3, %v4284_v34, %v4286_v25 }
 0x125   : > { %v1403_v48 = vpop.f32.mrf.mxu0  ;;  %v1642_v59 = vpop.f32.mrf.mxu1  ;;  %v4097_v34 = vrot.slane %v6607_v22, 1 }
 0x126   : > { %v6799_v3 = vadd.f32 %v5549_v24, %v1484_v16  ;;  %v1482_v47 = vadd.f32 %v1403_v48, %v6638_v7  ;;  %v4289_v53 = vsel %vm3051_vm3, %v4286_v25, %v4288_v2 }
 0x127   : > { %v5528_v26 = vpop.f32.mrf.mxu0  ;;  %v5550_v27 = vpop.f32.mrf.mxu1  ;;  %v4098_v33 = vsel %vm3051_vm3, %v4095_v8, %v4097_v34  ;;  %v4100_v44 = vsel %vm3051_vm3, %v4097_v34, %v4099_v58  ;;  %v7259_v34 = vld [vmem:[#allocation2_spill] sm:$0xff] }
 0x128   : > { %v6803_v45 = vadd.f32 %v1642_v59, %v1482_v47  ;;  %v1485_v38 = vadd.f32 %v5528_v26, %v6647_v40  ;;  %v4101_v47 = vrot.slane %v6655_v21, 1 }
 0x129   : > { %v1406_v49 = vpop.f32.mrf.mxu0  ;;  %v1645_v57 = vpop.f32.mrf.mxu1 }
 0x12a   : > { %v6809_v52 = vadd.f32 %v5550_v27, %v1485_v38  ;;  %v1483_v7 = vadd.f32 %v1406_v49, %v6660_v4  ;;  %v4290_v4 = vrot.slane %v6616_v29, 1 }
 0x12b   : > { %v5531_v30 = vpop.f32.mrf.mxu0  ;;  %5746 = vmatmul.mubr.msk.bf16.vlgmr.msra.gmra.mxu0 %vm266_vm1, %v4094_v62  ;;  %v5553_v35 = vpop.f32.mrf.mxu1  ;;  %5768 = vmatmul.mubr.msk.bf16.vlgmr.msra.gmra.mxu1 %vm266_vm1, %v4287_v46 }
 0x12c   : > { %v6814_v15 = vadd.f32 %v1645_v57, %v1483_v7  ;;  %v1488_v40 = vadd.f32 %v5531_v30, %v6672_v0  ;;  %5749 = vmatprep.mubr.msk.bf16.mxu0 %vm266_vm1, %v4096_v6  ;;  %5771 = vmatprep.mubr.msk.bf16.mxu1 %vm266_vm1, %v4289_v53  ;;  %v4292_v0 = vrot.slane %v6634_v9, 1  ;;  %v4291_v29 = vsel %vm3051_vm3, %v4288_v2, %v4290_v4 }
 0x12d   : > { %v1419_v54 = vpop.f32.mrf.mxu0  ;;  %v1658_v12 = vpop.f32.mrf.mxu1  ;;  %v4103_v2 = vrot.slane %v6667_v60, 1  ;;  %v4102_v6 = vsel %vm3051_vm3, %v4099_v58, %v4101_v47 }
 0x12e   : > { %v6823_v39 = vadd.f32 %v5553_v35, %v1488_v40  ;;  %v1486_v11 = vadd.f32 %v1419_v54, %v6680_v41  ;;  %v4293_v9 = vsel %vm3051_vm3, %v4290_v4, %v4292_v0  ;;  %v4105_v54 = vrot.slane %v7259_v34, 1 }
 0x12f   : > { %v5532_v5 = vpop.f32.mrf.mxu0  ;;  %v5554_v22 = vpop.f32.mrf.mxu1  ;;  %v4104_v60 = vsel %vm3051_vm3, %v4101_v47, %v4103_v2  ;;  %v7261_v47 = vld [vmem:[#allocation4_spill] sm:$0xff] }
 0x130   : > { %v6827_v51 = vadd.f32 %v1658_v12, %v1486_v11  ;;  %v1489_v13 = vadd.f32 %v5532_v5, %v6689_v36  ;;  %v4107_v11 = vrot.slane %v6707_v23, 1 }
 0x131   : > { %v1422_v16 = vpop.f32.mrf.mxu0  ;;  %v1661_v19 = vpop.f32.mrf.mxu1 }
 0x132   : > { %v6833_v24 = vadd.f32 %v5554_v22, %v1489_v13  ;;  %v1487_v41 = vadd.f32 %v1422_v16, %v6697_v14  ;;  %v4294_v14 = vrot.slane %v6658_v50, 1  ;;  %v4108_v23 = vsel %vm3051_vm3, %v4105_v54, %v4107_v11 }
 0x133   : > { %v5535_v48 = vpop.f32.mrf.mxu0  ;;  %5750 = vmatmul.mubr.msk.bf16.gmra.mxu0 %vm266_vm1, %v4098_v33  ;;  %v5557_v8 = vpop.f32.mrf.mxu1  ;;  %5772 = vmatmul.mubr.msk.bf16.gmra.mxu1 %vm266_vm1, %v4291_v29  ;;  %v4106_v29 = vsel %vm3051_vm3, %v4103_v2, %v4105_v54 }
 0x134   : > { %v6838_v25 = vadd.f32 %v1661_v19, %v1487_v41  ;;  %v1492_v36 = vadd.f32 %v5535_v48, %v6709_v1  ;;  %5753 = vmatprep.mubr.msk.bf16.mxu0 %vm266_vm1, %v4100_v44  ;;  %5775 = vmatprep.mubr.msk.bf16.mxu1 %vm266_vm1, %v4293_v9  ;;  %v4296_v1 = vrot.slane %v6670_v55, 1  ;;  %v4295_v50 = vsel %vm3051_vm3, %v4292_v0, %v4294_v14 }
 0x135   : > { %v1435_v59 = vpop.f32.mrf.mxu0  ;;  %v1674_v27 = vpop.f32.mrf.mxu1 }
 0x136   : > { %v6847_v26 = vadd.f32 %v5557_v8, %v1492_v36  ;;  %v1490_v38 = vadd.f32 %v1435_v59, %v6719_v17  ;;  %v4297_v55 = vsel %vm3051_vm3, %v4294_v14, %v4296_v1  ;;  %v4109_v59 = vrot.slane %v7261_v47, 1 }
 0x137   : > { %v5536_v62 = vpop.f32.mrf.mxu0  ;;  %v5558_v21 = vpop.f32.mrf.mxu1 }
 0x138   : > { %v6851_v49 = vadd.f32 %v1674_v27, %v1490_v38  ;;  %v1493_v46 = vadd.f32 %v5536_v62, %v6728_v63 }
 0x139   : > { %v1438_v7 = vpop.f32.mrf.mxu0  ;;  %v1677_v53 = vpop.f32.mrf.mxu1 }
 0x13a   : > { %v6857_v57 = vadd.f32 %v5558_v21, %v1493_v46  ;;  %v1491_v17 = vadd.f32 %v1438_v7, %v6734_v28  ;;  %v7260_v28 = vld [vmem:[#allocation3_spill] sm:$0xff]  ;;  %v4110_v21 = vsel %vm3051_vm3, %v4107_v11, %v4109_v59 }
 0x13b   : > { %v5539_v30 = vpop.f32.mrf.mxu0  ;;  %5754 = vmatmul.mubr.msk.bf16.gmra.mxu0 %vm266_vm1, %v4102_v6  ;;  %v5561_v35 = vpop.f32.mrf.mxu1  ;;  %5776 = vmatmul.mubr.msk.bf16.gmra.mxu1 %vm266_vm1, %v4295_v50  ;;  %v4298_v58 = vrot.slane %v7260_v28, 1 }
 0x13c   : > { %v6862_v40 = vadd.f32 %v1677_v53, %v1491_v17  ;;  %v1496_v63 = vadd.f32 %v5539_v30, %v6746_v42  ;;  %5757 = vmatprep.mubr.msk.bf16.mxu0 %vm266_vm1, %v4104_v60  ;;  %5779 = vmatprep.mubr.msk.bf16.mxu1 %vm266_vm1, %v4297_v55  ;;  %v4300_v42 = vrot.slane %v6713_v20, 1 }
 0x13d   : > { %v1451_v4 = vpop.f32.mrf.mxu0  ;;  %v1690_v5 = vpop.f32.mrf.mxu1  ;;  %v4299_v41 = vsel %vm3051_vm3, %v4296_v1, %v4298_v58 }
 0x13e   : > { %v6871_v12 = vadd.f32 %v5561_v35, %v1496_v63  ;;  %v1494_v0 = vadd.f32 %v1451_v4, %v6753_v37  ;;  %v4301_v20 = vsel %vm3051_vm3, %v4298_v58, %v4300_v42 }
 0x13f   : > { %v5540_v13 = vpop.f32.mrf.mxu0  ;;  %v5562_v16 = vpop.f32.mrf.mxu1 }
 0x140   : > { %v6875_v22 = vadd.f32 %v1690_v5, %v1494_v0  ;;  %v1497_v33 = vadd.f32 %v5540_v13, %v6762_v31 }
 0x141   : > { %v1454_v44 = vpop.f32.mrf.mxu0  ;;  %v1693_v9 = vpop.f32.mrf.mxu1 }
 0x142   : > { %v6881_v19 = vadd.f32 %v5562_v16, %v1497_v33  ;;  %v1495_v37 = vadd.f32 %v1454_v44, %v6768_v43  ;;  %v4302_v43 = vrot.slane %v6744_v56, 1 }
 0x143   : > { %v5543_v48 = vpop.f32.mrf.mxu0  ;;  %5758 = vmatmul.mubr.msk.bf16.gmra.mxu0 %vm266_vm1, %v4106_v29  ;;  %v5565_v8 = vpop.f32.mrf.mxu1  ;;  %5780 = vmatmul.mubr.msk.bf16.gmra.mxu1 %vm266_vm1, %v4299_v41 }
 0x144   : > { %v6886_v36 = vadd.f32 %v1693_v9, %v1495_v37  ;;  %v1500_v31 = vadd.f32 %v5543_v48, %v6775_v32  ;;  %5761 = vmatprep.mubr.msk.bf16.mxu0 %vm266_vm1, %v4108_v23  ;;  %5783 = vmatprep.mubr.msk.bf16.mxu1 %vm266_vm1, %v4301_v20  ;;  %v4303_v7 = vsel %vm3051_vm3, %v4300_v42, %v4302_v43 }
 0x145   : > { %v1467_v14 = vpop.f32.mrf.mxu0  ;;  %v1706_v27 = vpop.f32.mrf.mxu1 }
 0x146   : > { %v6894_v2 = vadd.f32 %v5565_v8, %v1500_v31  ;;  %v1498_v38 = vadd.f32 %v1467_v14, %v6779_v18 }
 0x147   : > { %v5544_v1 = vpop.f32.mrf.mxu0  ;;  %v5566_v46 = vpop.f32.mrf.mxu1 }
 0x148   : > { %v6897_v62 = vadd.f32 %v1706_v27, %v1498_v38  ;;  %v1501_v32 = vadd.f32 %v5544_v1, %v6785_v61 }
 0x149   : > { %v1470_v6 = vpop.f32.mrf.mxu0  ;;  %v1709_v60 = vpop.f32.mrf.mxu1 }
 0x14a   : > { %v6902_v50 = vadd.f32 %v5566_v46, %v1501_v32  ;;  %v1499_v56 = vadd.f32 %v1470_v6, %v6790_v10 }
 0x14b   : > { %v5571_v17 = vpop.f32.mrf.mxu0  ;;  %5762 = vmatmul.mubr.msk.bf16.gmra.mxu0 %vm266_vm1, %v4110_v21  ;;  %v5593_v55 = vpop.f32.mrf.mxu1  ;;  %5784 = vmatmul.mubr.msk.bf16.gmra.mxu1 %vm266_vm1, %v4303_v7 }
 0x14c   : > { %v6906_v18 = vadd.f32 %v1709_v60, %v1499_v56  ;;  %v2049_v53 = vadd.f32 %v5571_v17, %v6799_v3 }
 0x14d   : > { %v1968_v61 = vpop.f32.mrf.mxu0  ;;  %v2294_v35 = vpop.f32.mrf.mxu1 }
 0x14e   : > { %v6910_v30 = vadd.f32 %v5593_v55, %v2049_v53  ;;  %v2047_v63 = vadd.f32 %v1968_v61, %v6803_v45 }
 0x14f   : > { %v5572_v34 = vpop.f32.mrf.mxu0  ;;  %v5594_v4 = vpop.f32.mrf.mxu1 }
 0x150   : > { %v6913_v54 = vadd.f32 %v2294_v35, %v2047_v63  ;;  %v2050_v10 = vadd.f32 %v5572_v34, %v6809_v52 }
 0x151   : > { %v1971_v28 = vpop.f32.mrf.mxu0  ;;  %v2297_v11 = vpop.f32.mrf.mxu1 }
 0x152   : > { %v6916_v58 = vadd.f32 %v5594_v4, %v2050_v10  ;;  %v2048_v3 = vadd.f32 %v1971_v28, %v6814_v15 }
 0x153   : > { %v5575_v0 = vpop.f32.mrf.mxu0  ;;  %v5597_v13 = vpop.f32.mrf.mxu1 }
 0x154   : > { %v6919_v5 = vadd.f32 %v2297_v11, %v2048_v3  ;;  %v2053_v42 = vadd.f32 %v5575_v0, %v6823_v39 }
 0x155   : > { %v1984_v45 = vpop.f32.mrf.mxu0  ;;  %v2310_v29 = vpop.f32.mrf.mxu1 }
 0x156   : > { %v6922_v33 = vadd.f32 %v5597_v13, %v2053_v42  ;;  %v2051_v16 = vadd.f32 %v1984_v45, %v6827_v51 }
 0x157   : > { %v5576_v52 = vpop.f32.mrf.mxu0  ;;  %v5598_v23 = vpop.f32.mrf.mxu1 }
 0x158   : > { %v6925_v44 = vadd.f32 %v2310_v29, %v2051_v16  ;;  %v2054_v41 = vadd.f32 %v5576_v52, %v6833_v24 }
 0x159   : > { %v1987_v15 = vpop.f32.mrf.mxu0  ;;  %v2313_v20 = vpop.f32.mrf.mxu1 }
 0x15a   : > { %v6928_v37 = vadd.f32 %v5598_v23, %v2054_v41  ;;  %v2052_v9 = vadd.f32 %v1987_v15, %v6838_v25 }
 0x15b   : > { %v5579_v39 = vpop.f32.mrf.mxu0  ;;  %v5601_v8 = vpop.f32.mrf.mxu1 }
 0x15c   : > { %v6931_v48 = vadd.f32 %v2313_v20, %v2052_v9  ;;  %v2057_v31 = vadd.f32 %v5579_v39, %v6847_v26 }
 0x15d   : > { %v2000_v51 = vpop.f32.mrf.mxu0  ;;  %v2326_v14 = vpop.f32.mrf.mxu1 }
 0x15e   : > { %v6934_v47 = vadd.f32 %v5601_v8, %v2057_v31  ;;  %v2055_v59 = vadd.f32 %v2000_v51, %v6851_v49 }
 0x15f   : > { %v5580_v24 = vpop.f32.mrf.mxu0  ;;  %v5602_v27 = vpop.f32.mrf.mxu1 }
 0x160   : > { %v6937_v43 = vadd.f32 %v2326_v14, %v2055_v59  ;;  %v2058_v38 = vadd.f32 %v5580_v24, %v6857_v57 }
 0x161   : > { %v2003_v25 = vpop.f32.mrf.mxu0  ;;  %v2329_v46 = vpop.f32.mrf.mxu1 }
 0x162   : > { %v6940_v1 = vadd.f32 %v5602_v27, %v2058_v38  ;;  %v2056_v32 = vadd.f32 %v2003_v25, %v6862_v40 }
 0x163   : > { %v5583_v26 = vpop.f32.mrf.mxu0  ;;  %v5605_v7 = vpop.f32.mrf.mxu1 }
 0x164   : > { %v6943_v21 = vadd.f32 %v2329_v46, %v2056_v32  ;;  %v2061_v6 = vadd.f32 %v5583_v26, %v6871_v12 }
 0x165   : > { %v2016_v49 = vpop.f32.mrf.mxu0  ;;  %v2342_v17 = vpop.f32.mrf.mxu1 }
 0x166   : > { %v6946_v56 = vadd.f32 %v5605_v7, %v2061_v6  ;;  %v2059_v60 = vadd.f32 %v2016_v49, %v6875_v22 }
 0x167   : > { %v5584_v57 = vpop.f32.mrf.mxu0  ;;  %v5606_v61 = vpop.f32.mrf.mxu1 }
 0x168   : > { %v6949_v53 = vadd.f32 %v2342_v17, %v2059_v60  ;;  %v2062_v55 = vadd.f32 %v5584_v57, %v6881_v19 }
 0x169   : > { %v2019_v40 = vpop.f32.mrf.mxu0  ;;  %v2345_v34 = vpop.f32.mrf.mxu1 }
 0x16a   : > { %v6952_v63 = vadd.f32 %v5606_v61, %v2062_v55  ;;  %v2060_v35 = vadd.f32 %v2019_v40, %v6886_v36 }
 0x16b   : > { %v5587_v12 = vpop.f32.mrf.mxu0  ;;  %v5609_v28 = vpop.f32.mrf.mxu1 }
 0x16c   : > { %v6955_v10 = vadd.f32 %v2345_v34, %v2060_v35  ;;  %v2065_v4 = vadd.f32 %v5587_v12, %v6894_v2 }
 0x16d   : > { %v2032_v22 = vpop.f32.mrf.mxu0  ;;  %v2358_v0 = vpop.f32.mrf.mxu1 }
 0x16e   : > { %v6958_v3 = vadd.f32 %v5609_v28, %v2065_v4  ;;  %v2063_v11 = vadd.f32 %v2032_v22, %v6897_v62 }
 0x16f   : > { %v5588_v19 = vpop.f32.mrf.mxu0  ;;  %v5610_v45 = vpop.f32.mrf.mxu1 }
 0x170   : > { %v6961_v42 = vadd.f32 %v2358_v0, %v2063_v11  ;;  %v2066_v13 = vadd.f32 %v5588_v19, %v6902_v50 }
 0x171   : > { %v2035_v36 = vpop.f32.mrf.mxu0  ;;  %v2361_v52 = vpop.f32.mrf.mxu1 }
 0x172   : > { %v6964_v16 = vadd.f32 %v5610_v45, %v2066_v13  ;;  %v2064_v29 = vadd.f32 %v2035_v36, %v6906_v18 }
 0x173   : > { %v5615_v2 = vpop.f32.mrf.mxu0  ;;  %v5637_v15 = vpop.f32.mrf.mxu1 }
 0x174   : > { %v6967_v41 = vadd.f32 %v2361_v52, %v2064_v29  ;;  %v2701_v23 = vadd.f32 %v5615_v2, %v6910_v30 }
 0x175   : > { %v2620_v62 = vpop.f32.mrf.mxu0  ;;  %v2946_v39 = vpop.f32.mrf.mxu1 }
 0x176   : > { %v6970_v9 = vadd.f32 %v5637_v15, %v2701_v23  ;;  %v2699_v20 = vadd.f32 %v2620_v62, %v6913_v54 }
 0x177   : > { %v5616_v50 = vpop.f32.mrf.mxu0  ;;  %v5638_v51 = vpop.f32.mrf.mxu1 }
 0x178   : > { %v6973_v31 = vadd.f32 %v2946_v39, %v2699_v20  ;;  %v2702_v8 = vadd.f32 %v5616_v50, %v6916_v58 }
 0x179   : > { %v2623_v18 = vpop.f32.mrf.mxu0  ;;  %v2949_v24 = vpop.f32.mrf.mxu1 }
 0x17a   : > { %v6976_v59 = vadd.f32 %v5638_v51, %v2702_v8  ;;  %v2700_v14 = vadd.f32 %v2623_v18, %v6919_v5 }
 0x17b   : > { %v5619_v30 = vpop.f32.mrf.mxu0  ;;  %v5641_v25 = vpop.f32.mrf.mxu1 }
 0x17c   : > { %v6979_v38 = vadd.f32 %v2949_v24, %v2700_v14  ;;  %v2705_v27 = vadd.f32 %v5619_v30, %v6922_v33 }
 0x17d   : > { %v2636_v54 = vpop.f32.mrf.mxu0  ;;  %v2962_v26 = vpop.f32.mrf.mxu1 }
 0x17e   : > { %v6982_v32 = vadd.f32 %v5641_v25, %v2705_v27  ;;  %v2703_v46 = vadd.f32 %v2636_v54, %v6925_v44 }
 0x17f   : > { %v5620_v58 = vpop.f32.mrf.mxu0  ;;  %v5642_v49 = vpop.f32.mrf.mxu1 }
 0x180   : > { %v6985_v6 = vadd.f32 %v2962_v26, %v2703_v46  ;;  %v2706_v7 = vadd.f32 %v5620_v58, %v6928_v37 }
 0x181   : > { %v2639_v5 = vpop.f32.mrf.mxu0  ;;  %v2965_v57 = vpop.f32.mrf.mxu1 }
 0x182   : > { %v6988_v60 = vadd.f32 %v5642_v49, %v2706_v7  ;;  %v2704_v17 = vadd.f32 %v2639_v5, %v6931_v48 }
 0x183   : > { %v5623_v33 = vpop.f32.mrf.mxu0  ;;  %v5645_v40 = vpop.f32.mrf.mxu1 }
 0x184   : > { %v6991_v55 = vadd.f32 %v2965_v57, %v2704_v17  ;;  %v2709_v61 = vadd.f32 %v5623_v33, %v6934_v47 }
 0x185   : > { %v2652_v44 = vpop.f32.mrf.mxu0  ;;  %v2978_v12 = vpop.f32.mrf.mxu1 }
 0x186   : > { %v6994_v35 = vadd.f32 %v5645_v40, %v2709_v61  ;;  %v2707_v34 = vadd.f32 %v2652_v44, %v6937_v43 }
 0x187   : > { %v5624_v37 = vpop.f32.mrf.mxu0  ;;  %v5646_v22 = vpop.f32.mrf.mxu1 }
 0x188   : > { %v6997_v4 = vadd.f32 %v2978_v12, %v2707_v34  ;;  %v2710_v28 = vadd.f32 %v5624_v37, %v6940_v1 }
 0x189   : > { %v2655_v48 = vpop.f32.mrf.mxu0  ;;  %v2981_v19 = vpop.f32.mrf.mxu1 }
 0x18a   : > { %v7000_v11 = vadd.f32 %v5646_v22, %v2710_v28  ;;  %v2708_v0 = vadd.f32 %v2655_v48, %v6943_v21 }
 0x18b   : > { %v5627_v47 = vpop.f32.mrf.mxu0  ;;  %v5649_v36 = vpop.f32.mrf.mxu1 }
 0x18c   : > { %v7003_v13 = vadd.f32 %v2981_v19, %v2708_v0  ;;  %v2713_v45 = vadd.f32 %v5627_v47, %v6946_v56 }
 0x18d   : > { %v2668_v43 = vpop.f32.mrf.mxu0  ;;  %v2994_v2 = vpop.f32.mrf.mxu1 }
 0x18e   : > { %v7006_v29 = vadd.f32 %v5649_v36, %v2713_v45  ;;  %v2711_v52 = vadd.f32 %v2668_v43, %v6949_v53 }
 0x18f   : > { %v5628_v1 = vpop.f32.mrf.mxu0  ;;  %v5650_v62 = vpop.f32.mrf.mxu1 }
 0x190   : > { %v7009_v23 = vadd.f32 %v2994_v2, %v2711_v52  ;;  %v2714_v15 = vadd.f32 %v5628_v1, %v6952_v63 }
 0x191   : > { %v2671_v21 = vpop.f32.mrf.mxu0  ;;  %v2997_v50 = vpop.f32.mrf.mxu1 }
 0x192   : > { %v7012_v20 = vadd.f32 %v5650_v62, %v2714_v15  ;;  %v2712_v39 = vadd.f32 %v2671_v21, %v6955_v10 }
 0x193   : > { %v5631_v56 = vpop.f32.mrf.mxu0  ;;  %v5653_v18 = vpop.f32.mrf.mxu1 }
 0x194   : > { %v7015_v8 = vadd.f32 %v2997_v50, %v2712_v39  ;;  %v2717_v51 = vadd.f32 %v5631_v56, %v6958_v3 }
 0x195   : > { %v2684_v53 = vpop.f32.mrf.mxu0  ;;  %v3010_v30 = vpop.f32.mrf.mxu1 }
 0x196   : > { %v7018_v14 = vadd.f32 %v5653_v18, %v2717_v51  ;;  %v2715_v24 = vadd.f32 %v2684_v53, %v6961_v42 }
 0x197   : > { %v5632_v63 = vpop.f32.mrf.mxu0  ;;  %v5654_v54 = vpop.f32.mrf.mxu1 }
 0x198   : > { %v7021_v27 = vadd.f32 %v3010_v30, %v2715_v24  ;;  %v2718_v25 = vadd.f32 %v5632_v63, %v6964_v16 }
 0x199   : > { %v2687_v10 = vpop.f32.mrf.mxu0  ;;  %v3013_v58 = vpop.f32.mrf.mxu1 }
 0x19a   : > { %v7024_v46 = vadd.f32 %v5654_v54, %v2718_v25  ;;  %v2716_v26 = vadd.f32 %v2687_v10, %v6967_v41 }
 0x19b   : > { %v5659_v3 = vpop.f32.mrf.mxu0  ;;  %v5681_v5 = vpop.f32.mrf.mxu1 }
 0x19c   : > { %v7027_v7 = vadd.f32 %v3013_v58, %v2716_v26  ;;  %v3221_v49 = vadd.f32 %v5659_v3, %v6970_v9 }
 0x19d   : > { %v3140_v42 = vpop.f32.mrf.mxu0  ;;  %v3333_v33 = vpop.f32.mrf.mxu1 }
 0x19e   : > { %v7030_v17 = vadd.f32 %v5681_v5, %v3221_v49  ;;  %v3219_v57 = vadd.f32 %v3140_v42, %v6973_v31 }
 0x19f   : > { %v5660_v16 = vpop.f32.mrf.mxu0  ;;  %v5682_v44 = vpop.f32.mrf.mxu1 }
 0x1a0   : > { %v7033_v61 = vadd.f32 %v3333_v33, %v3219_v57  ;;  %v3222_v40 = vadd.f32 %v5660_v16, %v6976_v59 }
 0x1a1   : > { %v3143_v41 = vpop.f32.mrf.mxu0  ;;  %v3336_v37 = vpop.f32.mrf.mxu1 }
 0x1a2   : > { %v7036_v34 = vadd.f32 %v5682_v44, %v3222_v40  ;;  %v3220_v12 = vadd.f32 %v3143_v41, %v6979_v38 }
 0x1a3   : > { %v5663_v9 = vpop.f32.mrf.mxu0  ;;  %v5685_v48 = vpop.f32.mrf.mxu1 }
 0x1a4   : > { %v7039_v28 = vadd.f32 %v3336_v37, %v3220_v12  ;;  %v3225_v22 = vadd.f32 %v5663_v9, %v6982_v32 }
 0x1a5   : > { %v3156_v31 = vpop.f32.mrf.mxu0  ;;  %v3349_v47 = vpop.f32.mrf.mxu1 }
 0x1a6   : > { %v7042_v0 = vadd.f32 %v5685_v48, %v3225_v22  ;;  %v3223_v19 = vadd.f32 %v3156_v31, %v6985_v6 }
 0x1a7   : > { %v5664_v59 = vpop.f32.mrf.mxu0  ;;  %v5686_v43 = vpop.f32.mrf.mxu1 }
 0x1a8   : > { %v7045_v45 = vadd.f32 %v3349_v47, %v3223_v19  ;;  %v3226_v36 = vadd.f32 %v5664_v59, %v6988_v60 }
 0x1a9   : > { %v3159_v38 = vpop.f32.mrf.mxu0  ;;  %v3352_v1 = vpop.f32.mrf.mxu1 }
 0x1aa   : > { %v7048_v52 = vadd.f32 %v5686_v43, %v3226_v36  ;;  %v3224_v2 = vadd.f32 %v3159_v38, %v6991_v55 }
 0x1ab   : > { %v5667_v32 = vpop.f32.mrf.mxu0  ;;  %v5689_v21 = vpop.f32.mrf.mxu1 }
 0x1ac   : > { %v7051_v15 = vadd.f32 %v3352_v1, %v3224_v2  ;;  %v3229_v62 = vadd.f32 %v5667_v32, %v6994_v35 }
 0x1ad   : > { %v3172_v6 = vpop.f32.mrf.mxu0  ;;  %v3365_v56 = vpop.f32.mrf.mxu1 }
 0x1ae   : > { %v7054_v39 = vadd.f32 %v5689_v21, %v3229_v62  ;;  %v3227_v50 = vadd.f32 %v3172_v6, %v6997_v4 }
 0x1af   : > { %v5668_v60 = vpop.f32.mrf.mxu0  ;;  %v5690_v53 = vpop.f32.mrf.mxu1 }
 0x1b0   : > { %v7057_v51 = vadd.f32 %v3365_v56, %v3227_v50  ;;  %v3230_v18 = vadd.f32 %v5668_v60, %v7000_v11 }
 0x1b1   : > { %v3175_v55 = vpop.f32.mrf.mxu0  ;;  %v3368_v63 = vpop.f32.mrf.mxu1 }
 0x1b2   : > { %v7060_v24 = vadd.f32 %v5690_v53, %v3230_v18  ;;  %v3228_v30 = vadd.f32 %v3175_v55, %v7003_v13 }
 0x1b3   : > { %v5671_v35 = vpop.f32.mrf.mxu0  ;;  %v5693_v10 = vpop.f32.mrf.mxu1 }
 0x1b4   : > { %v7063_v25 = vadd.f32 %v3368_v63, %v3228_v30  ;;  %v3233_v54 = vadd.f32 %v5671_v35, %v7006_v29 }
 0x1b5   : > { %v3188_v4 = vpop.f32.mrf.mxu0  ;;  %v3381_v3 = vpop.f32.mrf.mxu1 }
 0x1b6   : > { %v7066_v26 = vadd.f32 %v5693_v10, %v3233_v54  ;;  %v3231_v58 = vadd.f32 %v3188_v4, %v7009_v23 }
 0x1b7   : > { %v5672_v11 = vpop.f32.mrf.mxu0  ;;  %v5694_v42 = vpop.f32.mrf.mxu1 }
 0x1b8   : > { %v7069_v49 = vadd.f32 %v3381_v3, %v3231_v58  ;;  %v3234_v5 = vadd.f32 %v5672_v11, %v7012_v20 }
 0x1b9   : > { %v3191_v13 = vpop.f32.mrf.mxu0  ;;  %v3384_v16 = vpop.f32.mrf.mxu1 }
 0x1ba   : > { %v7072_v57 = vadd.f32 %v5694_v42, %v3234_v5  ;;  %v3232_v33 = vadd.f32 %v3191_v13, %v7015_v8 }
 0x1bb   : > { %v5675_v29 = vpop.f32.mrf.mxu0  ;;  %v5697_v41 = vpop.f32.mrf.mxu1 }
 0x1bc   : > { %v7075_v40 = vadd.f32 %v3384_v16, %v3232_v33  ;;  %v3237_v44 = vadd.f32 %v5675_v29, %v7018_v14 }
 0x1bd   : > { %v3204_v23 = vpop.f32.mrf.mxu0  ;;  %v3397_v9 = vpop.f32.mrf.mxu1 }
 0x1be   : > { %v7078_v12 = vadd.f32 %v5697_v41, %v3237_v44  ;;  %v3235_v37 = vadd.f32 %v3204_v23, %v7021_v27 }
 0x1bf   : > { %v5676_v20 = vpop.f32.mrf.mxu0  ;;  %v5698_v31 = vpop.f32.mrf.mxu1 }
 0x1c0   : > { %v7081_v22 = vadd.f32 %v3397_v9, %v3235_v37  ;;  %v3238_v48 = vadd.f32 %v5676_v20, %v7024_v46 }
 0x1c1   : > { %v3207_v8 = vpop.f32.mrf.mxu0  ;;  %v3400_v59 = vpop.f32.mrf.mxu1 }
 0x1c2   : > { %v7084_v19 = vadd.f32 %v5698_v31, %v3238_v48  ;;  %v3236_v47 = vadd.f32 %v3207_v8, %v7027_v7 }
 0x1c3   : > { %v5703_v14 = vpop.f32.mrf.mxu0  ;;  %v5725_v43 = vpop.f32.mrf.mxu1 }
 0x1c4   : > { %7262 = vst [vmem:[#allocation2_spill] sm:$0xff] %v7084_v19  ;;  %v7087_v36 = vadd.f32 %v3400_v59, %v3236_v47  ;;  %v3740_v23 = vadd.f32 %v5703_v14, %v7030_v17 }
 0x1c5   : > { %v3659_v38 = vpop.f32.mrf.mxu0  ;;  %v3985_v2 = vpop.f32.mrf.mxu1 }
 0x1c6   : > { %7263 = vst [vmem:[#allocation3_spill] sm:$0xff] %v7087_v36  ;;  %v3738_v20 = vadd.f32 %v3659_v38, %v7033_v61  ;;  %v4066_v8 = vadd.f32 %v5725_v43, %v3740_v23 }
 0x1c7   : > { %v5704_v27 = vpop.f32.mrf.mxu0  ;;  %v5726_v1 = vpop.f32.mrf.mxu1 }
 0x1c8   : > { %v3741_v47 = vadd.f32 %v5704_v27, %v7036_v34  ;;  %v4064_v14 = vadd.f32 %v3985_v2, %v3738_v20  ;;  %v7135_v34 = vld [vmem:[%s7251_s2] ss:$0 sm:$0xff] }
 0x1c9   : > { %v3662_v32 = vpop.f32.mrf.mxu0  ;;  %v3988_v62 = vpop.f32.mrf.mxu1 }
 0x1ca   : > { %v3739_v36 = vadd.f32 %v3662_v32, %v7039_v28 }
 0x1cb   : > { %v5707_v21 = vpop.f32.mrf.mxu0  ;;  %v5729_v6 = vpop.f32.mrf.mxu1 }
 0x1cd   : > { %v3675_v46 = vpop.f32.mrf.mxu0  ;;  %v4001_v50 = vpop.f32.mrf.mxu1 }
 0x1cf   : > { %v5708_v56 = vpop.f32.mrf.mxu0  ;;  %v5730_v60 = vpop.f32.mrf.mxu1 }
 0x1d0   : > { %v3745_v61 = vadd.f32 %v5708_v56, %v7048_v52 }
 0x1d1   : > { %v3678_v18 = vpop.f32.mrf.mxu0  ;;  %v4004_v53 = vpop.f32.mrf.mxu1 }
 0x1d2   : > { %v3743_v38 = vadd.f32 %v3678_v18, %v7051_v15  ;;  %v4071_v23 = vadd.f32 %v5730_v60, %v3745_v61 }
 0x1d3   : > { %v5711_v7 = vpop.f32.mrf.mxu0  ;;  %v5733_v55 = vpop.f32.mrf.mxu1 }
 0x1d4   : > { %v3748_v43 = vadd.f32 %v5711_v7, %v7054_v39  ;;  %v4069_v20 = vadd.f32 %v4004_v53, %v3743_v38 }
 0x1d5   : > { %v3691_v30 = vpop.f32.mrf.mxu0  ;;  %v4017_v63 = vpop.f32.mrf.mxu1 }
 0x1d7   : > { %v5712_v35 = vpop.f32.mrf.mxu0  ;;  %v7089_v54 = vpop.f32.mrf.mxu1 }
 0x1d9   : > { %v3694_v10 = vpop.f32.mrf.mxu0  ;;  %v7091_v4 = vpop.f32.mrf.mxu1 }
 0x1db   : > { %v5715_v58 = vpop.f32.mrf.mxu0  ;;  %v7093_v3 = vpop.f32.mrf.mxu1 }
 0x1dd   : > { %v7095_v11 = vpop.f32.mrf.mxu0  ;;  %v7097_v5 = vpop.f32.mrf.mxu1 }
 0x1df   : > { %v7099_v42 = vpop.f32.mrf.mxu0  ;;  %v7101_v13 = vpop.f32.mrf.mxu1 }
 0x1e1   : > { %v7103_v33 = vpop.f32.mrf.mxu0  ;;  %v7105_v16 = vpop.f32.mrf.mxu1 }
 0x1e3   : > { %v7107_v29 = vpop.f32.mrf.mxu0  ;;  %v7109_v44 = vpop.f32.mrf.mxu1 }
 0x1e4   : > { %7264 = vst [vmem:[#allocation4_spill] sm:$0xff] %v7109_v44  ;;  %v3744_v44 = vadd.f32 %v5707_v21, %v7042_v0  ;;  %v4067_v0 = vadd.f32 %v5726_v1, %v3741_v47 }
 0x1e5   : > { %v7111_v41 = vpop.f32.mrf.mxu0  ;;  %v7114_v37 = vpop.f32.mrf.mxu1 }
 0x1e6   : > { %7265 = vst [vmem:[#allocation5_spill] sm:$0xff] %v7114_v37  ;;  %v3742_v37 = vadd.f32 %v3675_v46, %v7045_v45  ;;  %v4065_v45 = vadd.f32 %v3988_v62, %v3739_v36  ;;  %v4070_v21 = vadd.f32 %v5729_v6, %v3744_v44  ;;  %v3746_v46 = vadd.f32 %v3691_v30, %v7057_v51 }
 0x1e7   : > { %v7116_v9 = vpop.f32.mrf.mxu0  ;;  %v7119_v48 = vpop.f32.mrf.mxu1  ;;  %v3747_v30 = vadd.f32 %v3694_v10, %v7063_v25  ;;  %v3752_v44 = vadd.f32 %v5715_v58, %v7066_v26 }
 0x1e8   : > { %7266 = vst [vmem:[#allocation6_spill] sm:$0xff] %v7116_v9  ;;  %v4068_v56 = vadd.f32 %v4001_v50, %v3742_v37  ;;  %v7144_v50 = vadd.f32 %v4017_v63, %v3746_v46 }
 0x1e9   : > { %v7121_v31 = vpop.f32.mrf.mxu0  ;;  %v7124_v59 = vpop.f32.mrf.mxu1  ;;  %v7158_v61 = vadd.f32 %v7091_v4, %v3747_v30 }
 0x1eb   : > { %v5747_v17 = vpop.f32.mrf.mxu0  ;;  %v5769_v19 = vpop.f32.mrf.mxu1 }
 0x1ec   : > { %v4259_v9 = vadd.f32 %v5747_v17, %v4066_v8  ;;  %v7140_v8 = vadd.f32 %v5733_v55, %v3748_v43 }
 0x1ed   : > { %v4178_v28 = vpop.f32.mrf.mxu0  ;;  %v4371_v32 = vpop.f32.mrf.mxu1 }
 0x1ee   : > { %v4452_v27 = vadd.f32 %v5769_v19, %v4259_v9  ;;  %v4257_v2 = vadd.f32 %v4178_v28, %v4064_v14  ;;  %v3749_v19 = vadd.f32 %v5712_v35, %v7060_v24 }
 0x1ef   : > { %v5748_v52 = vpop.f32.mrf.mxu0  ;;  %v5770_v7 = vpop.f32.mrf.mxu1 }
 0x1f0   : > { %v4479_v15 = vadd.f32 %v7135_v34, %v4452_v27  ;;  %v4450_v39 = vadd.f32 %v4371_v32, %v4257_v2  ;;  %v4260_v18 = vadd.f32 %v5748_v52, %v4067_v0  ;;  %v7155_v63 = vadd.f32 %v7089_v54, %v3749_v19 }
 0x1f1   : > { %v4181_v1 = vpop.f32.mrf.mxu0  ;;  %v4374_v6 = vpop.f32.mrf.mxu1  ;;  %v7164_v0 = vadd.f32 %v7093_v3, %v3752_v44 }
 0x1f2   : > { %vm4499_vm5 = vcmp.gt.f32.partialorder %v4479_v15, 0.0  ;;  %v4519_v36 = vmul.f32 0.2, %v4479_v15  ;;  %v4477_v51 = vadd.f32 %v7135_v34, %v4450_v39  ;;  %v4453_v62 = vadd.f32 %v5770_v7, %v4260_v18 }
 0x1f3   : > { %v4258_v37 = vadd.f32 %v4181_v1, %v4065_v45  ;;  %v5751_v60 = vpop.f32.mrf.mxu0  ;;  %v5773_v35 = vpop.f32.mrf.mxu1  ;;  %v3753_v7 = vadd.f32 %v7099_v42, %v7072_v57 }
 0x1f4   : > { %v4539_v24 = vsel %vm4499_vm5, %v4479_v15, %v4519_v36  ;;  %vm4497_vm6 = vcmp.gt.f32.partialorder %v4477_v51, 0.0  ;;  %v4517_v53 = vmul.f32 0.2, %v4477_v51  ;;  %v4480_v55 = vadd.f32 %v7135_v34, %v4453_v62 }
 0x1f5   : > { %v5241_v25 = vpack.c.bf16 %v4539_v24, %v4539_v24  ;;  %v4451_v10 = vadd.f32 %v4374_v6, %v4258_v37  ;;  %v4263_v26 = vadd.f32 %v5751_v60, %v4070_v21  ;;  %v4194_v58 = vpop.f32.mrf.mxu0  ;;  %v4387_v14 = vpop.f32.mrf.mxu1 }
 0x1f6   : > { %v4537_v9 = vsel %vm4497_vm6, %v4477_v51, %v4517_v53  ;;  %vm4500_vm7 = vcmp.gt.f32.partialorder %v4480_v55, 0.0  ;;  %v4520_v47 = vmul.f32 0.2, %v4480_v55  ;;  %v4261_v17 = vadd.f32 %v4194_v58, %v4068_v56 }
 0x1f7   : > { %4640 = vst.msk [vmem:[%s7151_s29 + $0x8] sm:$0xf] %vm4637_vm4, %v5241_v25  ;;  %v5239_v38 = vpack.c.bf16 %v4537_v9, %v4537_v9  ;;  %v4478_v43 = vadd.f32 %v7135_v34, %v4451_v10  ;;  %v4456_v54 = vadd.f32 %v5773_v35, %v4263_v26  ;;  %v5752_v28 = vpop.f32.mrf.mxu0  ;;  %v5774_v45 = vpop.f32.mrf.mxu1  ;;  %v3750_v56 = vadd.f32 %v7095_v11, %v7069_v49 }
 0x1f8   : > { %v4540_v27 = vsel %vm4500_vm7, %v4480_v55, %v4520_v47  ;;  %v4454_v2 = vadd.f32 %v4387_v14, %v4261_v17  ;;  %v4264_v32 = vadd.f32 %v5752_v28, %v4071_v23 }
 0x1f9   : > { %4638 = vst.msk [vmem:[%s7151_s29] sm:$0xf] %vm4637_vm4, %v5239_v38  ;;  %v5242_v21 = vpack.c.bf16 %v4540_v27, %v4540_v27  ;;  %vm4498_vm8 = vcmp.gt.f32.partialorder %v4478_v43, 0.0  ;;  %v4518_v4 = vmul.f32 0.2, %v4478_v43  ;;  %v4483_v46 = vadd.f32 %v7135_v34, %v4456_v54  ;;  %v4197_v52 = vpop.f32.mrf.mxu0  ;;  %v4390_v18 = vpop.f32.mrf.mxu1 }
 0x1fa   : > { %v4481_v15 = vadd.f32 %v7135_v34, %v4454_v2  ;;  %v4457_v3 = vadd.f32 %v5774_v45, %v4264_v32  ;;  %v4262_v39 = vadd.f32 %v4197_v52, %v4069_v20  ;;  %v3751_v20 = vadd.f32 %v7103_v33, %v7075_v40 }
 0x1fb   : > { %4641 = vst.msk [vmem:[%s7151_s29 + $0xc] sm:$0xf] %vm4637_vm4, %v5242_v21  ;;  %v4538_v23 = vsel %vm4498_vm8, %v4478_v43, %v4518_v4  ;;  %vm4503_vm9 = vcmp.gt.f32.partialorder %v4483_v46, 0.0  ;;  %v4523_v19 = vmul.f32 0.2, %v4483_v46  ;;  %v5755_v1 = vpop.f32.mrf.mxu0  ;;  %v5777_v11 = vpop.f32.mrf.mxu1  ;;  %v4076_v35 = vadd.f32 %v7097_v5, %v3750_v56  ;;  %v7267_v21 = vld [vmem:[#allocation2_spill] sm:$0xff] }
 0x1fc   : > { %v5240_v36 = vpack.c.bf16 %v4538_v23, %v4538_v23  ;;  %vm4501_vm10 = vcmp.gt.f32.partialorder %v4481_v15, 0.0  ;;  %v4521_v51 = vmul.f32 0.2, %v4481_v15  ;;  %v4484_v49 = vadd.f32 %v7135_v34, %v4457_v3  ;;  %v7268_v4 = vld [vmem:[#allocation6_spill] sm:$0xff]  ;;  %v7269_v23 = vld [vmem:[#allocation4_spill] sm:$0xff] }
 0x1fd   : > { %v4543_v62 = vsel %vm4503_vm9, %v4483_v46, %v4523_v19  ;;  %v4455_v6 = vadd.f32 %v4390_v18, %v4262_v39  ;;  %v4267_v57 = vadd.f32 %v5755_v1, %v7140_v8  ;;  %v4210_v42 = vpop.f32.mrf.mxu0  ;;  %v4403_v60 = vpop.f32.mrf.mxu1  ;;  %v4079_v8 = vadd.f32 %v7101_v13, %v3753_v7  ;;  %v7270_v1 = vld [vmem:[#allocation3_spill] sm:$0xff] }
 0x1fe   : > { %4639 = vst.msk [vmem:[%s7151_s29 + $0x4] sm:$0xf] %vm4637_vm4, %v5240_v36  ;;  %v5245_v30 = vpack.c.bf16 %v4543_v62, %v4543_v62  ;;  %v4541_v44 = vsel %vm4501_vm10, %v4481_v15, %v4521_v51  ;;  %vm4504_vm11 = vcmp.gt.f32.partialorder %v4484_v49, 0.0  ;;  %v4524_v37 = vmul.f32 0.2, %v4484_v49 }
 0x1ff   : > { %v5243_v24 = vpack.c.bf16 %v4541_v44, %v4541_v44  ;;  %v4482_v53 = vadd.f32 %v7135_v34, %v4455_v6  ;;  %v4460_v55 = vadd.f32 %v5777_v11, %v4267_v57  ;;  %v4265_v40 = vadd.f32 %v4210_v42, %v7144_v50  ;;  %v5756_v33 = vpop.f32.mrf.mxu0  ;;  %v5778_v26 = vpop.f32.mrf.mxu1 }
 0x200   : > { %4644 = vst.msk [vmem:[%s7151_s29 + $0x18] sm:$0xf] %vm4637_vm4, %v5245_v30  ;;  %v4544_v25 = vsel %vm4504_vm11, %v4484_v49, %v4524_v37  ;;  %v4268_v10 = vadd.f32 %v5756_v33, %v7155_v63  ;;  %v4077_v17 = vadd.f32 %v7105_v16, %v3751_v20  ;;  %v3756_v43 = vadd.f32 %v7107_v29, %v7078_v12 }
 0x201   : > { %4642 = vst.msk [vmem:[%s7151_s29 + $0x10] sm:$0xf] %vm4637_vm4, %v5243_v24  ;;  %v5246_v58 = vpack.c.bf16 %v4544_v25, %v4544_v25  ;;  %vm4502_vm12 = vcmp.gt.f32.partialorder %v4482_v53, 0.0  ;;  %v4522_v9 = vmul.f32 0.2, %v4482_v53  ;;  %v4487_v47 = vadd.f32 %v7135_v34, %v4460_v55  ;;  %v4213_v50 = vpop.f32.mrf.mxu0  ;;  %v4406_v38 = vpop.f32.mrf.mxu1 }
 0x202   : > { %v4458_v5 = vadd.f32 %v4403_v60, %v4265_v40  ;;  %v4461_v14 = vadd.f32 %v5778_v26, %v4268_v10  ;;  %v4266_v13 = vadd.f32 %v4213_v50, %v7158_v61  ;;  %v3754_v61 = vadd.f32 %v7111_v41, %v7081_v22  ;;  %v7271_v60 = vld [vmem:[#allocation5_spill] sm:$0xff] }
 0x203   : > { %4645 = vst.msk [vmem:[%s7151_s29 + $0x1c] sm:$0xf] %vm4637_vm4, %v5246_v58  ;;  %v4542_v63 = vsel %vm4502_vm12, %v4482_v53, %v4522_v9  ;;  %vm4507_vm13 = vcmp.gt.f32.partialorder %v4487_v47, 0.0  ;;  %v4527_v54 = vmul.f32 0.2, %v4487_v47  ;;  %v5759_v28 = vpop.f32.mrf.mxu0  ;;  %v5781_v45 = vpop.f32.mrf.mxu1  ;;  %v3757_v12 = vadd.f32 %v7268_v4, %v7267_v21 }
 0x204   : > { %v5244_v27 = vpack.c.bf16 %v4542_v63, %v4542_v63  ;;  %v4485_v2 = vadd.f32 %v7135_v34, %v4458_v5  ;;  %v4488_v16 = vadd.f32 %v7135_v34, %v4461_v14  ;;  %v4459_v32 = vadd.f32 %v4406_v38, %v4266_v13 }
 0x205   : > { %v4547_v29 = vsel %vm4507_vm13, %v4487_v47, %v4527_v54  ;;  %v4271_v46 = vadd.f32 %v5759_v28, %v7164_v0  ;;  %v4226_v52 = vpop.f32.mrf.mxu0  ;;  %v4419_v3 = vpop.f32.mrf.mxu1  ;;  %v4082_v19 = vadd.f32 %v7269_v23, %v3756_v43  ;;  %v3755_v36 = vadd.f32 %v7121_v31, %v7270_v1 }
 0x206   : > { %4643 = vst.msk [vmem:[%s7151_s29 + $0x14] sm:$0xf] %vm4637_vm4, %v5244_v27  ;;  %v5249_v56 = vpack.c.bf16 %v4547_v29, %v4547_v29  ;;  %vm4505_vm14 = vcmp.gt.f32.partialorder %v4485_v2, 0.0  ;;  %v4525_v15 = vmul.f32 0.2, %v4485_v2  ;;  %vm4508_vm15 = vcmp.gt.f32.partialorder %v4488_v16, 0.0 }
 0x207   : > { %v4528_v39 = vmul.f32 0.2, %v4488_v16  ;;  %v4486_v18 = vadd.f32 %v7135_v34, %v4459_v32  ;;  %v4464_v7 = vadd.f32 %v5781_v45, %v4271_v46  ;;  %v4269_v22 = vadd.f32 %v4226_v52, %v4076_v35  ;;  %v5760_v41 = vpop.f32.mrf.mxu0  ;;  %v5782_v49 = vpop.f32.mrf.mxu1 }
 0x208   : > { %4648 = vst.msk [vmem:[%s7151_s29 + $0x28] sm:$0xf] %vm4637_vm4, %v5249_v56  ;;  %v4545_v0 = vsel %vm4505_vm14, %v4485_v2, %v4525_v15  ;;  %v4272_v51 = vadd.f32 %v5760_v41, %v4079_v8  ;;  %v4080_v31 = vadd.f32 %v7271_v60, %v3754_v61  ;;  %v4083_v24 = vadd.f32 %v7119_v48, %v3757_v12 }
 0x209   : > { %v5247_v11 = vpack.c.bf16 %v4545_v0, %v4545_v0  ;;  %v4548_v20 = vsel %vm4508_vm15, %v4488_v16, %v4528_v39  ;;  %vm4506_vm0 = vcmp.gt.f32.partialorder %v4486_v18, 0.0  ;;  %v4526_v62 = vmul.f32 0.2, %v4486_v18  ;;  %v4229_v6 = vpop.f32.mrf.mxu0  ;;  %v4422_v37 = vpop.f32.mrf.mxu1 }
 0x20a   : > { %v5250_v57 = vpack.c.bf16 %v4548_v20, %v4548_v20  ;;  %v4491_v42 = vadd.f32 %v7135_v34, %v4464_v7  ;;  %v4462_v30 = vadd.f32 %v4419_v3, %v4269_v22  ;;  %v4465_v44 = vadd.f32 %v5782_v49, %v4272_v51 }
 0x20b   : > { %4646 = vst.msk [vmem:[%s7151_s29 + $0x20] sm:$0xf] %vm4637_vm4, %v5247_v11  ;;  %v4546_v53 = vsel %vm4506_vm0, %v4486_v18, %v4526_v62  ;;  %v4270_v55 = vadd.f32 %v4229_v6, %v4077_v17  ;;  %v5763_v40 = vpop.f32.mrf.mxu0  ;;  %v5785_v25 = vpop.f32.mrf.mxu1  ;;  %v4081_v10 = vadd.f32 %v7124_v59, %v3755_v36 }
 0x20c   : > { %4649 = vst.msk [vmem:[%s7151_s29 + $0x2c] sm:$0xf] %vm4637_vm4, %v5250_v57  ;;  %v5248_v33 = vpack.c.bf16 %v4546_v53, %v4546_v53  ;;  %vm4511_vm1 = vcmp.gt.f32.partialorder %v4491_v42, 0.0  ;;  %v4531_v35 = vmul.f32 0.2, %v4491_v42  ;;  %v4489_v8 = vadd.f32 %v7135_v34, %v4462_v30 }
 0x20d   : > { %v4492_v26 = vadd.f32 %v7135_v34, %v4465_v44  ;;  %v4463_v58 = vadd.f32 %v4422_v37, %v4270_v55  ;;  %v4275_v48 = vadd.f32 %v5763_v40, %v4082_v19  ;;  %v4242_v9 = vpop.f32.mrf.mxu0  ;;  %v4435_v5 = vpop.f32.mrf.mxu1 }
 0x20e   : > { %4647 = vst.msk [vmem:[%s7151_s29 + $0x24] sm:$0xf] %vm4637_vm4, %v5248_v33  ;;  %v4551_v47 = vsel %vm4511_vm1, %v4491_v42, %v4531_v35  ;;  %vm4509_vm2 = vcmp.gt.f32.partialorder %v4489_v8, 0.0  ;;  %v4529_v50 = vmul.f32 0.2, %v4489_v8  ;;  %v4273_v17 = vadd.f32 %v4242_v9, %v4080_v31 }
 0x20f   : > { %v5253_v14 = vpack.c.bf16 %v4551_v47, %v4551_v47  ;;  %vm4512_vm3 = vcmp.gt.f32.partialorder %v4492_v26, 0.0  ;;  %v4532_v13 = vmul.f32 0.2, %v4492_v26  ;;  %v4490_v38 = vadd.f32 %v7135_v34, %v4463_v58  ;;  %v5764_v43 = vpop.f32.mrf.mxu0  ;;  %v5786_v27 = vpop.f32.mrf.mxu1 }
 0x210   : > { %v4549_v59 = vsel %vm4509_vm2, %v4489_v8, %v4529_v50  ;;  %v4468_v63 = vadd.f32 %v5785_v25, %v4275_v48  ;;  %v4466_v54 = vadd.f32 %v4435_v5, %v4273_v17  ;;  %v4276_v28 = vadd.f32 %v5764_v43, %v4083_v24 }
 0x211   : > { %4652 = vst.msk [vmem:[%s7151_s29 + $0x38] sm:$0xf] %vm4637_vm4, %v5253_v14  ;;  %v5251_v2 = vpack.c.bf16 %v4549_v59, %v4549_v59  ;;  %v4552_v16 = vsel %vm4512_vm3, %v4492_v26, %v4532_v13  ;;  %vm4510_vm5 = vcmp.gt.f32.partialorder %v4490_v38, 0.0  ;;  %v4530_v32 = vmul.f32 0.2, %v4490_v38  ;;  %v4245_v45 = vpop.f32.mrf.mxu0  ;;  %v4438_v15 = vpop.f32.mrf.mxu1 }
 0x212   : > { %v5254_v61 = vpack.c.bf16 %v4552_v16, %v4552_v16  ;;  %v4495_v21 = vadd.f32 %v7135_v34, %v4468_v63  ;;  %v4493_v4 = vadd.f32 %v7135_v34, %v4466_v54  ;;  %v4469_v12 = vadd.f32 %v5786_v27, %v4276_v28 }
 0x213   : > { %4650 = vst.msk [vmem:[%s7151_s29 + $0x30] sm:$0xf] %vm4637_vm4, %v5251_v2  ;;  %v4550_v29 = vsel %vm4510_vm5, %v4490_v38, %v4530_v32  ;;  %v4274_v46 = vadd.f32 %v4245_v45, %v4081_v10 }
 0x214   : > { %4653 = vst.msk [vmem:[%s7151_s29 + $0x3c] sm:$0xf] %vm4637_vm4, %v5254_v61  ;;  %v5252_v52 = vpack.c.bf16 %v4550_v29, %v4550_v29  ;;  %vm4515_vm6 = vcmp.gt.f32.partialorder %v4495_v21, 0.0  ;;  %v4535_v56 = vmul.f32 0.2, %v4495_v21  ;;  %vm4513_vm7 = vcmp.gt.f32.partialorder %v4493_v4, 0.0 }
 0x215   : > { %v4533_v3 = vmul.f32 0.2, %v4493_v4  ;;  %v4496_v39 = vadd.f32 %v7135_v34, %v4469_v12  ;;  %v4467_v18 = vadd.f32 %v4438_v15, %v4274_v46 }
 0x216   : > { %4651 = vst.msk [vmem:[%s7151_s29 + $0x34] sm:$0xf] %vm4637_vm4, %v5252_v52  ;;  %v4555_v7 = vsel %vm4515_vm6, %v4495_v21, %v4535_v56 }
 0x217   : > { %v5257_v22 = vpack.c.bf16 %v4555_v7, %v4555_v7  ;;  %v4553_v41 = vsel %vm4513_vm7, %v4493_v4, %v4533_v3  ;;  %vm4516_vm8 = vcmp.gt.f32.partialorder %v4496_v39, 0.0  ;;  %v4536_v23 = vmul.f32 0.2, %v4496_v39 }
 0x218   : > { %v5255_v19 = vpack.c.bf16 %v4553_v41, %v4553_v41  ;;  %v4494_v1 = vadd.f32 %v7135_v34, %v4467_v18 }
 0x219   : > { %4656 = vst.msk [vmem:[%s7151_s29 + $0x48] sm:$0xf] %vm4637_vm4, %v5257_v22  ;;  %v4556_v36 = vsel %vm4516_vm8, %v4496_v39, %v4536_v23 }
 0x21a   : > { %4654 = vst.msk [vmem:[%s7151_s29 + $0x40] sm:$0xf] %vm4637_vm4, %v5255_v19  ;;  %v5258_v0 = vpack.c.bf16 %v4556_v36, %v4556_v36  ;;  %vm4514_vm9 = vcmp.gt.f32.partialorder %v4494_v1, 0.0  ;;  %v4534_v51 = vmul.f32 0.2, %v4494_v1 }
 0x21c   : > { %4657 = vst.msk [vmem:[%s7151_s29 + $0x4c] sm:$0xf] %vm4637_vm4, %v5258_v0  ;;  %v4554_v49 = vsel %vm4514_vm9, %v4494_v1, %v4534_v51 }
 0x21d   : > { %v5256_v11 = vpack.c.bf16 %v4554_v49, %v4554_v49 }
 0x21f   : > { %4655 = vst.msk [vmem:[%s7151_s29 + $0x44] sm:$0xf] %vm4637_vm4, %v5256_v11 }
 0x220 PF: > { %s13_s12 = sadd.s32 1, %s5951_s12  }
 0x221   : > { %p10_p4 = scmp.ge.s32.totalorder %s13_s12, 4  }
 0x223   :  { %12 = sbr.rel (!%p10_p4) target bundleno = 1 (0x1), region = 80 }

// kernel: deterministic_policy_forward.6
= control target key start
LH: loop header
LB: loop body
LE: loop exit
PB: predicated region body
PF: predicated region fallthrough
CT: control target
= control target key end

     0   :  { %s1734_s12 = smov 0   ;;  %s1952_s0 = inlined_call_operand.vmem [shape: bf16[2,4,24,16], index: 0, kind: input, shape index: {}]   ;;  %s1953_s1 = inlined_call_operand.vmem [shape: bf16[16,16,32], index: 1, kind: input, shape index: {}]   ;;  %s1954_s2 = inlined_call_operand.vmem [shape: f32[1,32], index: 2, kind: input, shape index: {}]   ;;  %s1955_s3 = inlined_call_operand.vmem [shape: bf16[2,8,32], index: 3, kind: output, shape index: {}]  }
   0x1 LB: > { %s1400_s13 = sadd.s32 4294967295, %s1710_s12   ;;  %p1404_p0 = scmp.ge.s32.totalorder %s1710_s12, 1  ;;  %s1710_s12 = sphi %s1734_s12, %s13_s12  }
   0x2   : > { %p137_p1 = scmp.lt.s32.totalorder %s1710_s12, 3 }
   0x4   : > { %p138_p2 = pnand %p1404_p0, %p137_p1 }
   0x5   : > { %p160_p3 = scmp.lt.s32.totalorder (!%p138_p2), %s1400_s13, 1 }
   0x6   : > { %141 = sbr.rel (%p138_p2) target bundleno = 286 (0x11e), region = 32 }
   0xb   : > { %v1664_v0 = vld [vmem:[%s1953_s1 + $0x8] sm:$0xff]   ;;  %v1712_v1 = vmov 0.0   ;;  %v1665_v2 = vld [vmem:[%s1953_s1] sm:$0xff]   ;;  %vm1713_vm0 = vmmov 0   ;;  %s1957_s13 = smov (!%p160_p3, %s1400_s13), 1  ;;  %v1668_v3 = vld [vmem:[%s1953_s1 + $0x10] sm:$0xff]  }
   0xc   : > { %1557 = vmatprep.subr.bf16.mxu0 %v1712_v1  ;;  %1563 = vmatprep.subr.bf16.mxu1 %v1712_v1  ;;  %s1653_s18 = smul.u32 48, %s1957_s13  ;;  %vm191_vm1 = vcmask 130048   ;;  %v1669_v4 = vld [vmem:[%s1953_s1 + $0x18] sm:$0xff]   ;;  %vm305_vm2 = vsmask.f32 7424  ;;  %v1674_v23 = vld [vmem:[%s1953_s1 + $0x20] sm:$0xff]  }
   0xd   : > { %1558 = vmatpush3.bf16.msra.mxu0 %v1664_v0  ;;  %1559 = vmatprep.mubr.msk.bf16.mxu0 %vm1713_vm0, %v1712_v1  ;;  %v1675_v35 = vld [vmem:[%s1953_s1 + $0x28] sm:$0xff]   ;;  %v1678_v42 = vld [vmem:[%s1953_s1 + $0x30] sm:$0xff]   ;;  %v1679_v54 = vld [vmem:[%s1953_s1 + $0x38] sm:$0xff]   ;;  %vm741_vm3 = vsmask.f32 6400  ;;  %vm898_vm4 = vcmask 1045504  }
   0xe   : > { %1564 = vmatpush3.bf16.msra.mxu1 %v1665_v2  ;;  %1565 = vmatprep.mubr.msk.bf16.mxu1 %vm1713_vm0, %v1712_v1  ;;  %s1765_s23 = scalar_lea.vmem %s1952_s0, %s1653_s18  ;;  %s1406_s27 = sshll.u32 %s1957_s13, 2  ;;  %vm1310_vm5 = vcmask 253952   ;;  %vm1330_vm6 = vcmask 256002   ;;  %vm1325_vm7 = vcmask 254977   ;;  %vm1345_vm8 = vcmask 257027  }
   0xf   : > { %1569 = vmatprep.subr.bf16.mxu0 %v1712_v1  ;;  %1575 = vmatprep.subr.bf16.mxu1 %v1712_v1  ;;  %v1666_v5 = vld [vmem:[%s1765_s23 + $0xc] sm:$0xff]   ;;  %v1667_v6 = vld [vmem:[%s1765_s23] sm:$0xff]   ;;  %v1671_v10 = vld [vmem:[%s1765_s23 + $0x8] ss:$0 sps:$4 sm:$0x11]   ;;  %s168_s30 = scalar_lea.vmem %s1955_s3, %s1406_s27 }
  0x10   : > { %1560 = vmatmul.mubr.msk.bf16.vlgmr.msra.gmra.mxu0 %vm191_vm1, %v1666_v5  ;;  %v291_v7 = vld [vmem:[%s1765_s23] sm:$0xf]  ;;  %v1775_v8 = vld [vmem:[%s1765_s23 + $0x4] sm:$0xf]  ;;  %v1423_v11 = vld [vmem:[%s1765_s23 + $0xc] sm:$0xf] }
  0x11   : > { %1566 = vmatmul.mubr.msk.bf16.vlgmr.msra.gmra.mxu1 %vm191_vm1, %v1667_v6  ;;  %1570 = vmatpush3.bf16.msra.mxu0 %v1668_v3  ;;  %v1419_v9 = vcombine.low %v291_v7, %v1775_v8  ;;  %v1784_v12 = vld [vmem:[%s1765_s23 + $0x10] sm:$0xf]  ;;  %v314_v15 = vshll.u32 %v1671_v10, 16  ;;  %v1673_v17 = vld [vmem:[%s1765_s23 + $0x14] ss:$0 sps:$4 sm:$0x11]  }
  0x12   : > { %1576 = vmatpush3.bf16.msra.mxu1 %v1669_v4  ;;  %1571 = vmatprep.mubr.msk.bf16.mxu0 %vm1713_vm0, %v1712_v1  ;;  %v1428_v16 = vcombine.low %v1423_v11, %v1784_v12  ;;  %v392_v22 = vshll.u32 %v1673_v17, 16  ;;  %v1446_v24 = vld [vmem:[%s1765_s23 + $0x18] sm:$0xf]  ;;  %v1797_v25 = vld [vmem:[%s1765_s23 + $0x1c] sm:$0xf]  ;;  %v1677_v52 = vld [vmem:[%s1765_s23 + $0x24] sm:$0xff]  }
  0x13   : > { %1577 = vmatprep.mubr.msk.bf16.mxu1 %vm1713_vm0, %v1712_v1  ;;  %1581 = vmatprep.subr.bf16.mxu0 %v1712_v1  ;;  %v307_v13 = vshrl.u32 %v1419_v9, 16  ;;  %v309_v14 = vshll.u32 %v1419_v9, 16  ;;  %v316_v19 = vrot.slane %v314_v15, 1  ;;  %v1451_v28 = vcombine.low %v1446_v24, %v1797_v25  ;;  %v1681_v29 = vld [vmem:[%s1765_s23 + $0x20] ss:$0 sps:$4 sm:$0x11]  }
  0x14   : > { %1587 = vmatprep.subr.bf16.mxu1 %v1712_v1  ;;  %v385_v20 = vshrl.u32 %v1428_v16, 16  ;;  %v387_v21 = vshll.u32 %v1428_v16, 16  ;;  %v394_v30 = vrot.slane %v392_v22, 1  ;;  %v1455_v31 = vld [vmem:[%s1765_s23 + $0x24] sm:$0xf]  ;;  %v1676_v41 = vld [vmem:[%s1765_s23 + $0x18] sm:$0xff]  }
  0x15   : > { %v311_v18 = vrot.slane %v309_v14, 1  ;;  %v1803_v32 = vld [vmem:[%s1765_s23 + $0x28] sm:$0xf]  ;;  %v591_v36 = vshll.u32 %v1451_v28, 16  ;;  %v730_v40 = vld [vmem:[%s1765_s23] sm:$0xe] }
  0x16   : > { %v389_v27 = vrot.slane %v387_v21, 1  ;;  %v1460_v37 = vcombine.low %v1455_v31, %v1803_v32  ;;  %v1683_v38 = vld [vmem:[%s1765_s23 + $0x2c] ss:$0 sps:$4 sm:$0x11]   ;;  %v589_v43 = vshrl.u32 %v1451_v28, 16  ;;  %v596_v44 = vshll.u32 %v1681_v29, 16 }
  0x17   : > { %v312_v26 = vor.u32 %v311_v18, %v307_v13  ;;  %v593_v46 = vrot.slane %v591_v36, 1  ;;  %v674_v47 = vshll.u32 %v1683_v38, 16  ;;  %v1470_v48 = vld [vmem:[%s1765_s23 + $0xc] sm:$0xe]  ;;  %v1466_v49 = vcombine.low %v730_v40, %v1775_v8  ;;  %v1684_v7 = vld [vmem:[%s1953_s1 + $0x40] sm:$0xff]   ;;  %v1690_v31 = vld [vmem:[%s1953_s1 + $0x50] sm:$0xff]  }
  0x18   : > { %v390_v34 = vor.u32 %v389_v27, %v385_v20  ;;  %v669_v45 = vshll.u32 %v1460_v37, 16  ;;  %v1828_v50 = vld [vmem:[%s1765_s23 + $0x8] ss:$0 sps:$4 sm:$0x33]   ;;  %v1474_v53 = vcombine.low %v1470_v48, %v1784_v12  ;;  %v667_v55 = vshrl.u32 %v1460_v37, 16  ;;  %v1691_v37 = vld [vmem:[%s1953_s1 + $0x58] sm:$0xff]  }
  0x19   : > { %v317_v33 = vsel %vm305_vm2, %v312_v26, %v316_v19  ;;  %v1831_v51 = vld [vmem:[%s1765_s23 + $0x14] ss:$0 sps:$4 sm:$0x33]   ;;  %v594_v57 = vor.u32 %v593_v46, %v589_v43  ;;  %v598_v58 = vrot.slane %v596_v44, 1  ;;  %v676_v59 = vrot.slane %v674_v47, 1  ;;  %v1685_v14 = vld [vmem:[%s1953_s1 + $0x48] sm:$0xff]  }
  0x1a   : > { %1572 = vmatmul.mubr.msk.bf16.vlgmr.msra.gmra.mxu0 %vm191_vm1, %v317_v33  ;;  %v395_v39 = vsel %vm305_vm2, %v390_v34, %v394_v30  ;;  %v671_v56 = vrot.slane %v669_v45, 1  ;;  %v743_v60 = vshrl.u32 %v1466_v49, 16  ;;  %v746_v61 = vshll.u32 %v1466_v49, 16  ;;  %v891_v22 = vld [vmem:[%s1765_s23] sm:$0xc] }
  0x1b   : > { %1582 = vmatpush3.bf16.msra.mxu0 %v1674_v23  ;;  %1583 = vmatprep.mubr.msk.bf16.mxu0 %vm1713_vm0, %v1712_v1  ;;  %v751_v62 = vshrl.u32 %v1828_v50, 16  ;;  %v754_v63 = vshll.u32 %v1828_v50, 16  ;;  %v823_v0 = vshrl.u32 %v1474_v53, 16  ;;  %v831_v2 = vshrl.u32 %v1831_v51, 16  ;;  %v1489_v23 = vld [vmem:[%s1765_s23 + $0x18] sm:$0xe] }
  0x1c   : > { %1578 = vmatmul.mubr.msk.bf16.vlgmr.msra.gmra.mxu1 %vm191_vm1, %v395_v39  ;;  %1593 = vmatprep.subr.bf16.mxu0 %v1712_v1  ;;  %v672_v3 = vor.u32 %v671_v56, %v667_v55  ;;  %v826_v4 = vshll.u32 %v1474_v53, 16  ;;  %v834_v5 = vshll.u32 %v1831_v51, 16  ;;  %v599_v6 = vsel %vm305_vm2, %v594_v57, %v598_v58  ;;  %v1483_v27 = vld [vmem:[%s1765_s23 + $0xc] sm:$0xc]  ;;  %v1497_v29 = vld [vmem:[%s1765_s23 + $0x24] sm:$0xe] }
  0x1d   : > { %1588 = vmatpush3.bf16.msra.mxu1 %v1675_v35  ;;  %1589 = vmatprep.mubr.msk.bf16.mxu1 %vm1713_vm0, %v1712_v1  ;;  %v745_v9 = vrot.slane %v743_v60, 1  ;;  %v748_v10 = vrot.slane %v746_v61, 2  ;;  %v753_v11 = vrot.slane %v751_v62, 1  ;;  %v756_v13 = vrot.slane %v754_v63, 2  ;;  %v1695_v57 = vld [vmem:[%s1953_s1 + $0x68] sm:$0xff]  }
  0x1e   : > { %1599 = vmatprep.subr.bf16.mxu1 %v1712_v1  ;;  %v825_v15 = vrot.slane %v823_v0, 1  ;;  %v833_v16 = vrot.slane %v831_v2, 1  ;;  %v677_v17 = vsel %vm305_vm2, %v672_v3, %v676_v59  ;;  %v828_v18 = vrot.slane %v826_v4, 2  ;;  %v1877_v34 = vld [vmem:[%s1765_s23 + $0x20] ss:$0 sps:$4 sm:$0x33]  }
  0x1f   : > { %v836_v19 = vrot.slane %v834_v5, 2  ;;  %v749_v20 = vor.u32 %v748_v10, %v745_v9  ;;  %v757_v21 = vor.u32 %v756_v13, %v753_v11  ;;  %v1480_v28 = vcombine.low %v891_v22, %v1775_v8  ;;  %v1886_v38 = vld [vmem:[%s1765_s23 + $0x2c] ss:$0 sps:$4 sm:$0x33]   ;;  %v1505_v0 = vld [vmem:[%s1765_s23 + $0x18] sm:$0xc] }
  0x20   : > { %v829_v24 = vor.u32 %v828_v18, %v825_v15  ;;  %v1493_v33 = vcombine.low %v1489_v23, %v1797_v25  ;;  %v1486_v35 = vcombine.low %v1483_v27, %v1784_v12  ;;  %v1501_v8 = vcombine.low %v1497_v29, %v1803_v32  ;;  %v1511_v4 = vld [vmem:[%s1765_s23 + $0x24] sm:$0xc]  ;;  %v1701_v10 = vld [vmem:[%s1953_s1 + $0x78] sm:$0xff]  }
  0x21   : > { %v837_v26 = vor.u32 %v836_v19, %v833_v16  ;;  %v758_v30 = vsel %vm741_vm3, %v749_v20, %v757_v21  ;;  %v899_v39 = vrot.slane %v1480_v28, 2  ;;  %v900_v40 = vrot.slane %v1828_v50, 2 }
  0x22   : > { %1584 = vmatmul.mubr.msk.bf16.vlgmr.msra.gmra.mxu0 %vm191_vm1, %v1676_v41  ;;  %v1028_v12 = vshrl.u32 %v1493_v33, 16  ;;  %v1031_v41 = vshll.u32 %v1493_v33, 16  ;;  %v1039_v43 = vshll.u32 %v1877_v34, 16  ;;  %v961_v44 = vrot.slane %v1486_v35, 2 }
  0x23   : > { %1594 = vmatpush3.bf16.msra.mxu0 %v1678_v42  ;;  %1595 = vmatprep.mubr.msk.bf16.mxu0 %vm1713_vm0, %v1712_v1  ;;  %v838_v36 = vsel %vm741_vm3, %v829_v24, %v837_v26  ;;  %v1036_v42 = vshrl.u32 %v1877_v34, 16  ;;  %v962_v45 = vrot.slane %v1831_v51, 2  ;;  %v1108_v46 = vshrl.u32 %v1501_v8, 16 }
  0x24   : > { %1590 = vmatmul.mubr.msk.bf16.vlgmr.msra.gmra.mxu1 %vm191_vm1, %v1677_v52  ;;  %1605 = vmatprep.subr.bf16.mxu0 %v1712_v1  ;;  %v1111_v47 = vshll.u32 %v1501_v8, 16  ;;  %v1116_v48 = vshrl.u32 %v1886_v38, 16  ;;  %v1119_v49 = vshll.u32 %v1886_v38, 16  ;;  %v901_v50 = vsel %vm898_vm4, %v899_v39, %v900_v40  ;;  %v1694_v52 = vld [vmem:[%s1953_s1 + $0x60] sm:$0xff]  }
  0x25   : > { %1600 = vmatpush3.bf16.msra.mxu1 %v1679_v54  ;;  %1601 = vmatprep.mubr.msk.bf16.mxu1 %vm1713_vm0, %v1712_v1  ;;  %v1030_v53 = vrot.slane %v1028_v12, 1  ;;  %v1033_v51 = vrot.slane %v1031_v41, 2  ;;  %v1038_v54 = vrot.slane %v1036_v42, 1  ;;  %v1041_v55 = vrot.slane %v1039_v43, 2 }
  0x26   : > { %1611 = vmatprep.subr.bf16.mxu1 %v1712_v1  ;;  %v963_v56 = vsel %vm898_vm4, %v961_v44, %v962_v45  ;;  %v1110_v58 = vrot.slane %v1108_v46, 1  ;;  %v1113_v59 = vrot.slane %v1111_v47, 2  ;;  %v1118_v60 = vrot.slane %v1116_v48, 1 }
  0x27   : > { %v1121_v61 = vrot.slane %v1119_v49, 2  ;;  %v1034_v62 = vor.u32 %v1033_v51, %v1030_v53  ;;  %v1042_v63 = vor.u32 %v1041_v55, %v1038_v54  ;;  %v1514_v11 = vcombine.low %v1511_v4, %v1803_v32 }
  0x28   : > { %v1114_v2 = vor.u32 %v1113_v59, %v1110_v58  ;;  %v1246_v15 = vrot.slane %v1886_v38, 2 }
  0x29   : > { %v1122_v3 = vor.u32 %v1121_v61, %v1118_v60  ;;  %v1043_v5 = vsel %vm741_vm3, %v1034_v62, %v1042_v63 }
  0x2a   : > { %1596 = vmatmul.mubr.msk.bf16.vlgmr.msra.gmra.mxu0 %vm191_vm1, %v599_v6  ;;  %v1700_v6 = vld [vmem:[%s1953_s1 + $0x70] sm:$0xff]  }
  0x2b   : > { %1606 = vmatpush3.bf16.msra.mxu0 %v1684_v7  ;;  %1607 = vmatprep.mubr.msk.bf16.mxu0 %vm1713_vm0, %v1712_v1  ;;  %v1508_v7 = vcombine.low %v1505_v0, %v1797_v25  ;;  %v1123_v9 = vsel %vm741_vm3, %v1114_v2, %v1122_v3  ;;  %v1245_v25 = vrot.slane %v1514_v11, 2 }
  0x2c   : > { %1602 = vmatmul.mubr.msk.bf16.vlgmr.msra.gmra.mxu1 %vm191_vm1, %v677_v17  ;;  %1617 = vmatprep.subr.bf16.mxu0 %v1712_v1 }
  0x2d   : > { %1612 = vmatpush3.bf16.msra.mxu1 %v1685_v14  ;;  %1613 = vmatprep.mubr.msk.bf16.mxu1 %vm1713_vm0, %v1712_v1  ;;  %v1183_v13 = vrot.slane %v1508_v7, 2  ;;  %v1184_v14 = vrot.slane %v1877_v34, 2  ;;  %v1247_v16 = vsel %vm898_vm4, %v1245_v25, %v1246_v15 }
  0x2e   : > { %1623 = vmatprep.subr.bf16.mxu1 %v1712_v1 }
  0x2f   : > { %v1185_v32 = vsel %vm898_vm4, %v1183_v13, %v1184_v14 }
  0x32   : > { %1608 = vmatmul.mubr.msk.bf16.vlgmr.msra.gmra.mxu0 %vm191_vm1, %v758_v30 }
  0x33   : > { %1618 = vmatpush3.bf16.msra.mxu0 %v1690_v31  ;;  %1619 = vmatprep.mubr.msk.bf16.mxu0 %vm1713_vm0, %v1712_v1 }
  0x34   : > { %1614 = vmatmul.mubr.msk.bf16.vlgmr.msra.gmra.mxu1 %vm191_vm1, %v838_v36  ;;  %1629 = vmatprep.subr.bf16.mxu0 %v1712_v1 }
  0x35   : > { %1624 = vmatpush3.bf16.msra.mxu1 %v1691_v37  ;;  %1625 = vmatprep.mubr.msk.bf16.mxu1 %vm1713_vm0, %v1712_v1 }
  0x36   : > { %1635 = vmatprep.subr.bf16.mxu1 %v1712_v1 }
  0x3a   : > { %1620 = vmatmul.mubr.msk.bf16.vlgmr.msra.gmra.mxu0 %vm191_vm1, %v901_v50 }
  0x3b   : > { %1630 = vmatpush3.bf16.msra.mxu0 %v1694_v52  ;;  %1631 = vmatprep.mubr.msk.bf16.mxu0 %vm1713_vm0, %v1712_v1 }
  0x3c   : > { %1626 = vmatmul.mubr.msk.bf16.vlgmr.msra.gmra.mxu1 %vm191_vm1, %v963_v56  ;;  %1641 = vmatprep.subr.bf16.mxu0 %v1712_v1 }
  0x3d   : > { %1636 = vmatpush3.bf16.msra.mxu1 %v1695_v57  ;;  %1637 = vmatprep.mubr.msk.bf16.mxu1 %vm1713_vm0, %v1712_v1 }
  0x3e   : > { %1647 = vmatprep.subr.bf16.mxu1 %v1712_v1 }
  0x42   : > { %1632 = vmatmul.mubr.msk.bf16.vlgmr.msra.gmra.mxu0 %vm191_vm1, %v1043_v5 }
  0x43   : > { %1642 = vmatpush3.bf16.msra.mxu0 %v1700_v6  ;;  %1643 = vmatprep.mubr.msk.bf16.mxu0 %vm1713_vm0, %v1712_v1 }
  0x44   : > { %1638 = vmatmul.mubr.msk.bf16.vlgmr.msra.gmra.mxu1 %vm191_vm1, %v1123_v9 }
  0x45   : > { %1648 = vmatpush3.bf16.msra.mxu1 %v1701_v10  ;;  %1649 = vmatprep.mubr.msk.bf16.mxu1 %vm1713_vm0, %v1712_v1 }
  0x4a   : > { %1644 = vmatmul.mubr.msk.bf16.vlgmr.msra.gmra.mxu0 %vm191_vm1, %v1185_v32 }
  0x4c   : > { %1650 = vmatmul.mubr.msk.bf16.vlgmr.msra.gmra.mxu1 %vm191_vm1, %v1247_v16 }
  0xd0   : > { %v229_v17 = vpop.f32.mrf.mxu0 }
  0xd1   : > { %v284_v18 = vpop.f32.mrf.mxu1 }
  0xd2   : > { %v1561_v19 = vpop.f32.mrf.mxu0  ;;  %v285_v37 = vadd.f32 %v284_v18, %v229_v17 }
  0xd3   : > { %v1567_v20 = vpop.f32.mrf.mxu1 }
  0xd4   : > { %v232_v21 = vpop.f32.mrf.mxu0 }
  0xd5   : > { %v287_v22 = vpop.f32.mrf.mxu1 }
  0xd6   : > { %v1562_v23 = vpop.f32.mrf.mxu0  ;;  %v288_v41 = vadd.f32 %v287_v22, %v232_v21 }
  0xd7   : > { %v1568_v24 = vpop.f32.mrf.mxu1 }
  0xda   : > { %v361_v1 = vpop.f32.mrf.mxu0 }
  0xdb   : > { %v368_v39 = vadd.f32 %v361_v1, %v285_v37 }
  0xdc   : > { %v439_v26 = vpop.f32.mrf.mxu1  ;;  %v1573_v27 = vpop.f32.mrf.mxu0 }
  0xdd   : > { %v446_v44 = vadd.f32 %v439_v26, %v368_v39 }
  0xde   : > { %v1579_v28 = vpop.f32.mrf.mxu1  ;;  %v364_v29 = vpop.f32.mrf.mxu0 }
  0xdf   : > { %v369_v45 = vadd.f32 %v364_v29, %v288_v41 }
  0xe0   : > { %v442_v30 = vpop.f32.mrf.mxu1  ;;  %v1574_v31 = vpop.f32.mrf.mxu0 }
  0xe1   : > { %v447_v52 = vadd.f32 %v442_v30, %v369_v45 }
  0xe2   : > { %v1580_v33 = vpop.f32.mrf.mxu1  ;;  %v502_v34 = vpop.f32.mrf.mxu0 }
  0xe3   : > { %v509_v48 = vadd.f32 %v502_v34, %v446_v44 }
  0xe4   : > { %v565_v35 = vpop.f32.mrf.mxu1  ;;  %v1585_v36 = vpop.f32.mrf.mxu0 }
  0xe5   : > { %v572_v54 = vadd.f32 %v565_v35, %v509_v48 }
  0xe6   : > { %v1591_v8 = vpop.f32.mrf.mxu1  ;;  %v505_v38 = vpop.f32.mrf.mxu0 }
  0xe7   : > { %v510_v55 = vadd.f32 %v505_v38, %v447_v52  ;;  %v1517_v8 = vld [vmem:[%s1954_s2] ss:$0 sm:$0xff] }
  0xe8   : > { %v568_v40 = vpop.f32.mrf.mxu1  ;;  %v1586_v12 = vpop.f32.mrf.mxu0 }
  0xe9   : > { %v573_v61 = vadd.f32 %v568_v40, %v510_v55 }
  0xea   : > { %v1592_v42 = vpop.f32.mrf.mxu1  ;;  %v643_v43 = vpop.f32.mrf.mxu0 }
  0xeb   : > { %v650_v58 = vadd.f32 %v643_v43, %v572_v54 }
  0xec   : > { %v721_v46 = vpop.f32.mrf.mxu1  ;;  %v1597_v47 = vpop.f32.mrf.mxu0 }
  0xed   : > { %v728_v0 = vadd.f32 %v721_v46, %v650_v58 }
  0xee   : > { %v1603_v49 = vpop.f32.mrf.mxu1  ;;  %v646_v50 = vpop.f32.mrf.mxu0 }
  0xef   : > { %v651_v2 = vadd.f32 %v646_v50, %v573_v61 }
  0xf0   : > { %v724_v53 = vpop.f32.mrf.mxu1  ;;  %v1598_v51 = vpop.f32.mrf.mxu0 }
  0xf1   : > { %v729_v9 = vadd.f32 %v724_v53, %v651_v2 }
  0xf2   : > { %v1604_v56 = vpop.f32.mrf.mxu1  ;;  %v802_v57 = vpop.f32.mrf.mxu0 }
  0xf3   : > { %v809_v5 = vadd.f32 %v802_v57, %v728_v0 }
  0xf4   : > { %v882_v59 = vpop.f32.mrf.mxu1  ;;  %v1609_v60 = vpop.f32.mrf.mxu0 }
  0xf5   : > { %v889_v13 = vadd.f32 %v882_v59, %v809_v5 }
  0xf6   : > { %v1615_v62 = vpop.f32.mrf.mxu1  ;;  %v805_v63 = vpop.f32.mrf.mxu0 }
  0xf7   : > { %v810_v14 = vadd.f32 %v805_v63, %v729_v9 }
  0xf8   : > { %v885_v3 = vpop.f32.mrf.mxu1  ;;  %v1610_v4 = vpop.f32.mrf.mxu0 }
  0xf9   : > { %v890_v18 = vadd.f32 %v885_v3, %v810_v14 }
  0xfa   : > { %v1616_v6 = vpop.f32.mrf.mxu1  ;;  %v945_v7 = vpop.f32.mrf.mxu0 }
  0xfb   : > { %v952_v32 = vadd.f32 %v945_v7, %v889_v13 }
  0xfc   : > { %v1007_v10 = vpop.f32.mrf.mxu1  ;;  %v1621_v11 = vpop.f32.mrf.mxu0 }
  0xfd   : > { %v1014_v21 = vadd.f32 %v1007_v10, %v952_v32 }
  0xfe   : > { %v1627_v25 = vpop.f32.mrf.mxu1  ;;  %v948_v15 = vpop.f32.mrf.mxu0 }
  0xff   : > { %v953_v22 = vadd.f32 %v948_v15, %v890_v18 }
 0x100   : > { %v1010_v16 = vpop.f32.mrf.mxu1  ;;  %v1622_v17 = vpop.f32.mrf.mxu0 }
 0x101   : > { %v1015_v28 = vadd.f32 %v1010_v16, %v953_v22 }
 0x102   : > { %v1628_v19 = vpop.f32.mrf.mxu1  ;;  %v1087_v20 = vpop.f32.mrf.mxu0 }
 0x103   : > { %v1094_v1 = vadd.f32 %v1087_v20, %v1014_v21 }
 0x104   : > { %v1167_v23 = vpop.f32.mrf.mxu1  ;;  %v1633_v24 = vpop.f32.mrf.mxu0 }
 0x105   : > { %v1174_v31 = vadd.f32 %v1167_v23, %v1094_v1 }
 0x106   : > { %v1639_v26 = vpop.f32.mrf.mxu1  ;;  %v1090_v27 = vpop.f32.mrf.mxu0 }
 0x107   : > { %v1095_v33 = vadd.f32 %v1090_v27, %v1015_v28 }
 0x108   : > { %v1170_v29 = vpop.f32.mrf.mxu1  ;;  %v1634_v30 = vpop.f32.mrf.mxu0 }
 0x109   : > { %v1175_v39 = vadd.f32 %v1170_v29, %v1095_v33 }
 0x10a   : > { %v1640_v34 = vpop.f32.mrf.mxu1  ;;  %v1229_v35 = vpop.f32.mrf.mxu0 }
 0x10b   : > { %v1236_v36 = vadd.f32 %v1229_v35, %v1174_v31 }
 0x10c   : > { %v1291_v37 = vpop.f32.mrf.mxu1  ;;  %v1645_v38 = vpop.f32.mrf.mxu0 }
 0x10d   : > { %v1298_v40 = vadd.f32 %v1291_v37, %v1236_v36 }
 0x10e   : > { %v1651_v12 = vpop.f32.mrf.mxu1  ;;  %v1232_v41 = vpop.f32.mrf.mxu0 }
 0x10f   : > { %v1307_v42 = vadd.f32 %v1517_v8, %v1298_v40  ;;  %v1237_v43 = vadd.f32 %v1232_v41, %v1175_v39 }
 0x110   : > { %v1294_v44 = vpop.f32.mrf.mxu1  ;;  %v1646_v45 = vpop.f32.mrf.mxu0 }
 0x111   : > { %v1309_v46 = vpack.c.bf16 %v1307_v42, %v1307_v42  ;;  %v1299_v47 = vadd.f32 %v1294_v44, %v1237_v43 }
 0x112   : > { %v1652_v48 = vpop.f32.mrf.mxu1 }
 0x113   : > { %1311 = vst.msk [vmem:[%s168_s30] sm:$0x1] %vm1310_vm5, %v1309_v46  ;;  %v1316_v49 = vshrl.u32 %v1309_v46, 16  ;;  %v1319_v50 = vshll.u32 %v1309_v46, 16  ;;  %v1519_v52 = vrot.slane %v1309_v46, 9  ;;  %v1308_v53 = vadd.f32 %v1517_v8, %v1299_v47 }
 0x115   : > { %v1318_v51 = vrot.slane %v1316_v49, 4  ;;  %v1321_v54 = vrot.slane %v1319_v50, 5  ;;  %1331 = vst.msk [vmem:[%s168_s30] sm:$0x4] %vm1330_vm6, %v1519_v52  ;;  %v1524_v55 = vpack.c.bf16 %v1308_v53, %v1308_v53 }
 0x117   : > { %v1322_v56 = vor.u32 %v1321_v54, %v1318_v51  ;;  %v1337_v57 = vshrl.u32 %v1524_v55, 16  ;;  %v1340_v58 = vshll.u32 %v1524_v55, 16 }
 0x119   : > { %v1323_v59 = vrot.slane %v1322_v56, 4  ;;  %v1339_v60 = vrot.slane %v1337_v57, 5  ;;  %v1342_v61 = vrot.slane %v1340_v58, 6 }
 0x11b   : > { %1326 = vst.msk [vmem:[%s168_s30] sm:$0x2] %vm1325_vm7, %v1323_v59  ;;  %v1343_v62 = vor.u32 %v1342_v61, %v1339_v60 }
 0x11d   : > { %1346 = vst.msk [vmem:[%s168_s30] sm:$0x8] %vm1345_vm8, %v1343_v62 }
 0x11e PF: > { %s13_s12 = sadd.s32 1, %s1710_s12  }
 0x11f   : > { %p10_p4 = scmp.ge.s32.totalorder %s13_s12, 4  }
 0x121   :  { %12 = sbr.rel (!%p10_p4) target bundleno = 1 (0x1), region = 80 }

// kernel: deterministic_policy_forward.7
= control target key start
LH: loop header
LB: loop body
LE: loop exit
PB: predicated region body
PF: predicated region fallthrough
CT: control target
= control target key end

     0   :  { %vm70_vm0 = vcmask 1043456   ;;  %v886_v0 = vmov 0.0   ;;  %vm887_vm1 = vmmov 0   ;;  %vm66_vm2 = vcmask 64512   ;;  %s1128_s2 = inlined_call_operand.vmem [shape: bf16[8,32], index: 2, kind: input, shape index: {}]   ;;  %s1129_s0 = inlined_call_operand.vmem [shape: bf16[8,8], index: 0, kind: input, shape index: {}]   ;;  %s1130_s4 = inlined_call_operand.vmem [shape: bf16[32,32], index: 4, kind: input, shape index: {}]   ;;  %s1131_s7 = inlined_call_operand.vmem [shape: bf16[256,32], index: 7, kind: input, shape index: {}]   ;;  %s1132_s3 = inlined_call_operand.vmem [shape: f32[1,32], index: 3, kind: input, shape index: {}]   ;;  %s1133_s1 = inlined_call_operand.vmem [shape: bf16[8,256], index: 1, kind: input, shape index: {}]   ;;  %s1134_s6 = inlined_call_operand.vmem [shape: bf16[32,32], index: 6, kind: input, shape index: {}]   ;;  %s1135_s9 = inlined_call_operand.vmem [shape: bf16[32,32], index: 9, kind: input, shape index: {}]   ;;  %s1136_s5 = inlined_call_operand.vmem [shape: f32[1,32], index: 5, kind: input, shape index: {}]   ;;  %s1137_s11 = inlined_call_operand.vmem [shape: bf16[32,32], index: 11, kind: input, shape index: {}]   ;;  %s1138_s8 = inlined_call_operand.vmem [shape: f32[1,32], index: 8, kind: input, shape index: {}]   ;;  %s1139_s13 = inlined_call_operand.vmem [shape: bf16[32,32], index: 13, kind: input, shape index: {}]   ;;  %s1140_s10 = inlined_call_operand.vmem [shape: f32[1,32], index: 10, kind: input, shape index: {}]   ;;  %s1141_s15 = inlined_call_operand.vmem [shape: bf16[32,128], index: 15, kind: input, shape index: {}]   ;;  %s1142_s12 = inlined_call_operand.vmem [shape: f32[1,32], index: 12, kind: input, shape index: {}]   ;;  %s1143_s14 = inlined_call_operand.vmem [shape: f32[1,32], index: 14, kind: input, shape index: {}]   ;;  %s1144_s16 = inlined_call_operand.vmem [shape: f32[1,128], index: 16, kind: input, shape index: {}]   ;;  %s1145_s17 = inlined_call_operand.vmem [shape: f32[8,128], index: 17, kind: output, shape index: {}]  }
   0x1   :  { %1146 = sst [smem:[#allocation2_spill]] %s1128_s2  ;;  %800 = vmatprep.subr.bf16.mxu0 %v886_v0  ;;  %802 = vmatprep.mubr.msk.bf16.mxu0 %vm887_vm1, %v886_v0  ;;  %v856_v4 = vld [vmem:[%s1130_s4 + $0x8] sm:$0xff]   ;;  %v857_v5 = vld [vmem:[%s1130_s4] sm:$0xff]   ;;  %v858_v6 = vld [vmem:[%s1131_s7 + $0x78] sm:$0xff]   ;;  %vm141_vm4 = vcmask 261120  }
   0x2   :  { %1147 = sst [smem:[#allocation3_spill]] %s1129_s0  ;;  %806 = vmatprep.subr.bf16.mxu1 %v886_v0  ;;  %810 = vmatprep.mubr.msk.bf16.mxu1 %vm887_vm1, %v886_v0  ;;  %v714_v7 = vld [vmem:[%s1132_s3] ss:$0 sm:$0xff]  ;;  %v859_v15 = vld [vmem:[%s1131_s7 + $0x38] sm:$0xff]   ;;  %v860_v19 = vld [vmem:[%s1131_s7 + $0x70] sm:$0xff]  }
   0x3   :  { %s1148_s26 = sld [smem:[#allocation2_spill]]  ;;  %807 = vmatpush3.bf16.msra.mxu1 %v856_v4  ;;  %v188_v11 = vld [vmem:[%s1133_s1] sm:$0xff]  ;;  %v861_v20 = vld [vmem:[%s1131_s7 + $0x30] sm:$0xff]   ;;  %v862_v21 = vld [vmem:[%s1131_s7 + $0x68] sm:$0xff]  }
   0x4   :  { %s1149_s29 = sld [smem:[#allocation3_spill]]  ;;  %808 = vmatprep.subr.bf16.mxu1 %v886_v0  ;;  %v724_v16 = vcombine.high %v188_v11, %v188_v11  ;;  %v863_v22 = vld [vmem:[%s1131_s7 + $0x28] sm:$0xff]   ;;  %v864_v23 = vld [vmem:[%s1131_s7 + $0x60] sm:$0xff]   ;;  %v866_v25 = vld [vmem:[%s1131_s7 + $0x58] sm:$0xff]   ;;  %v723_v33 = vcombine.low %v188_v11, %v188_v11 }
   0x5   :  { %v865_v24 = vld [vmem:[%s1131_s7 + $0x20] sm:$0xff]   ;;  %v867_v26 = vld [vmem:[%s1131_s7 + $0x18] sm:$0xff]   ;;  %v868_v27 = vld [vmem:[%s1131_s7 + $0x50] sm:$0xff]  }
   0x6   :  { %v869_v28 = vld [vmem:[%s1131_s7 + $0x10] sm:$0xff]   ;;  %v870_v29 = vld [vmem:[%s1131_s7 + $0x48] sm:$0xff]   ;;  %v872_v31 = vld [vmem:[%s1131_s7 + $0x40] sm:$0xff]  }
   0x7   :  { %809 = vmatpush3.bf16.msra.mxu1 %v857_v5  ;;  %v871_v30 = vld [vmem:[%s1131_s7 + $0x8] sm:$0xff]   ;;  %v873_v32 = vld [vmem:[%s1131_s7] sm:$0xff]  }
   0x8   :  { %766 = vmatprep.subr.bf16.mxu1 %v858_v6  ;;  %v876_v34 = vld [vmem:[%s1134_s6 + $0x8] sm:$0xff]   ;;  %v877_v35 = vld [vmem:[%s1134_s6] sm:$0xff]  }
   0x9   :  { %v58_v1 = vld [vmem:[%s1148_s26] sm:$0xf]  ;;  %v878_v43 = vld [vmem:[%s1135_s9 + $0x8] sm:$0xff]  }
   0xa   :  { %v72_v2 = vsel %vm70_vm0, %v58_v1, 0  ;;  %v57_v3 = vld [vmem:[%s1149_s29] sm:$0xf]  ;;  %v880_v58 = vld [vmem:[%s1137_s11 + $0x8] sm:$0xff]  }
   0xb   :  { %801 = vmatpush3.bf16.msra.mxu0 %v72_v2  ;;  %v716_v36 = vld [vmem:[%s1136_s5] ss:$0 sm:$0xff]  ;;  %v882_v5 = vld [vmem:[%s1139_s13 + $0x8] sm:$0xff]  }
   0xc   :  { %814 = vmatprep.subr.bf16.mxu0 %v886_v0  ;;  %v879_v51 = vld [vmem:[%s1135_s9] sm:$0xff]  }
   0xd   :  { %v741_v53 = vld [vmem:[%s1138_s8] ss:$0 sm:$0xff] }
   0xe   :  { %803 = vmatmul.mubr.msk.bf16.vlgmr.msra.gmra.mxu0 %vm66_vm2, %v57_v3  ;;  %v881_v61 = vld [vmem:[%s1137_s11] sm:$0xff]  }
   0xf   :  { %818 = vmatprep.mubr.msk.bf16.mxu0 %vm887_vm1, %v886_v0  ;;  %815 = vmatpush3.bf16.msra.mxu0 %v876_v34  ;;  %v742_v62 = vld [vmem:[%s1140_s10] ss:$0 sm:$0xff] }
  0x10   :  { %816 = vmatprep.subr.bf16.mxu0 %v886_v0 }
  0x13   :  { %817 = vmatpush3.bf16.msra.mxu0 %v877_v35 }
  0x14   :  { %822 = vmatprep.subr.bf16.mxu0 %v886_v0 }
  0xce   :  { %v108_v8 = vpop.f32.mrf.mxu0 }
  0xcf   :  { %v109_v9 = vadd.f32 %v714_v7, %v108_v8  ;;  %v883_v8 = vld [vmem:[%s1139_s13] sm:$0xff]  }
  0xd0   :  { %v804_v10 = vpop.f32.mrf.mxu0 }
  0xd1   :  { %vm114_vm3 = vcmp.gt.f32.partialorder %v109_v9, 0.0  ;;  %v115_v12 = vmul.f32 0.2, %v109_v9 }
  0xd2   :  { %v111_v13 = vpop.f32.mrf.mxu0 }
  0xd3   :  { %v116_v14 = vsel %vm114_vm3, %v109_v9, %v115_v12  ;;  %v746_v9 = vld [vmem:[%s1142_s12] ss:$0 sm:$0xff] }
  0xd4   :  { %v117_v17 = vpack.c.bf16 %v116_v14, %v116_v14  ;;  %v805_v18 = vpop.f32.mrf.mxu0 }
  0xd5   :  { %v885_v18 = vld [vmem:[%s1141_s15] sm:$0xff]  }
  0xd6   :  { %811 = vmatmul.mubr.msk.bf16.vlgmr.msra.gmra.mxu1 %vm141_vm4, %v117_v17 }
  0xd7   :  { %767 = vmatpush3.bf16.msra.mxu1 %v859_v15  ;;  %416 = vmatprep.mubr.bf16.mxu1 %v724_v16  ;;  %v884_v15 = vld [vmem:[%s1141_s15 + $0x8] sm:$0xff]  }
  0xd8   :  { %768 = vmatprep.subr.bf16.mxu1 %v860_v19  ;;  %v750_v19 = vld [vmem:[%s1143_s14] ss:$0 sm:$0xff] }
  0xdb   :  { %769 = vmatpush3.bf16.msra.mxu1 %v861_v20 }
  0xdc   :  { %770 = vmatprep.subr.bf16.mxu1 %v862_v21 }
  0xdf   :  { %771 = vmatpush3.bf16.msra.mxu1 %v863_v22 }
  0xe0   :  { %772 = vmatprep.subr.bf16.mxu1 %v864_v23 }
  0xe3   :  { %773 = vmatpush3.bf16.msra.mxu1 %v865_v24 }
  0xe4   :  { %774 = vmatprep.subr.bf16.mxu1 %v866_v25 }
  0xe7   :  { %775 = vmatpush3.bf16.msra.mxu1 %v867_v26 }
  0xe8   :  { %776 = vmatprep.subr.bf16.mxu1 %v868_v27  ;;  %v705_v27 = vlaneseq }
  0xeb   :  { %777 = vmatpush3.bf16.msra.mxu1 %v869_v28 }
  0xec   :  { %778 = vmatprep.subr.bf16.mxu1 %v870_v29  ;;  %v706_v29 = vand.u32 127, %v705_v27 }
  0xee   :  { %vm707_vm6 = vcmp.eq.s32.totalorder %v706_v29, 1 }
  0xef   :  { %779 = vmatpush3.bf16.msra.mxu1 %v871_v30 }
  0xf0   :  { %780 = vmatprep.subr.bf16.mxu1 %v872_v31 }
  0xf3   :  { %781 = vmatpush3.bf16.msra.mxu1 %v873_v32 }
  0xf6   :  { %417 = vmatmul.mubr.bf16.vlgmr.msra.gmra.mxu1 %v723_v33 }
 0x196   :  { %v179_v37 = vpop.f32.mrf.mxu1 }
 0x197   :  { %v180_v38 = vadd.f32 %v716_v36, %v179_v37 }
 0x198   :  { %v812_v39 = vpop.f32.mrf.mxu1 }
 0x199   :  { %vm185_vm5 = vcmp.gt.f32.partialorder %v180_v38, 0.0  ;;  %v186_v40 = vmul.f32 0.2, %v180_v38 }
 0x19a   :  { %v182_v41 = vpop.f32.mrf.mxu1 }
 0x19b   :  { %v187_v42 = vsel %vm185_vm5, %v180_v38, %v186_v40 }
 0x19c   :  { %v221_v44 = vpack.c.bf16 %v187_v42, %v187_v42  ;;  %v813_v45 = vpop.f32.mrf.mxu1 }
 0x19e   :  { %819 = vmatmul.mubr.msk.bf16.vlgmr.msra.gmra.mxu0 %vm141_vm4, %v221_v44 }
 0x19f   :  { %823 = vmatpush3.bf16.msra.mxu0 %v878_v43  ;;  %826 = vmatprep.mubr.msk.bf16.mxu0 %vm887_vm1, %v886_v0 }
 0x1a0   :  { %824 = vmatprep.subr.bf16.mxu0 %v886_v0 }
 0x1a3   :  { %825 = vmatpush3.bf16.msra.mxu0 %v879_v51 }
 0x1a4   :  { %830 = vmatprep.subr.bf16.mxu0 %v886_v0 }
 0x1b6   :  { %v782_v46 = vpop.f32.mrf.mxu1 }
 0x1b8   :  { %v783_v47 = vpop.f32.mrf.mxu1 }
 0x1b9   :  { %v784_v48 = vadd.f32 %v783_v47, %v782_v46 }
 0x1ba   :  { %v785_v49 = vpop.f32.mrf.mxu1 }
 0x1bc   :  { %v786_v50 = vpop.f32.mrf.mxu1 }
 0x25e   :  { %v275_v52 = vpop.f32.mrf.mxu0 }
 0x25f   :  { %v419_v54 = vadd.f32 %v784_v48, %v275_v52 }
 0x260   :  { %v820_v55 = vpop.f32.mrf.mxu0 }
 0x261   :  { %v431_v56 = vadd.f32 %v741_v53, %v419_v54 }
 0x262   :  { %v278_v57 = vpop.f32.mrf.mxu0 }
 0x263   :  { %v432_v59 = vpack.c.bf16 %v431_v56, %v431_v56 }
 0x264   :  { %v821_v60 = vpop.f32.mrf.mxu0 }
 0x265   :  { %827 = vmatmul.mubr.msk.bf16.vlgmr.msra.gmra.mxu0 %vm141_vm4, %v432_v59 }
 0x266   :  { %831 = vmatpush3.bf16.msra.mxu0 %v880_v58  ;;  %834 = vmatprep.mubr.msk.bf16.mxu0 %vm887_vm1, %v886_v0 }
 0x267   :  { %832 = vmatprep.subr.bf16.mxu0 %v886_v0 }
 0x26a   :  { %833 = vmatpush3.bf16.msra.mxu0 %v881_v61 }
 0x26b   :  { %838 = vmatprep.subr.bf16.mxu0 %v886_v0 }
 0x325   :  { %v493_v63 = vpop.f32.mrf.mxu0 }
 0x326   :  { %v494_v1 = vadd.f32 %v742_v62, %v493_v63 }
 0x327   :  { %v828_v2 = vpop.f32.mrf.mxu0 }
 0x328   :  { %v499_v3 = vmax.f32 %v494_v1, 0.0 }
 0x329   :  { %v496_v4 = vpop.f32.mrf.mxu0 }
 0x32a   :  { %v500_v6 = vpack.c.bf16 %v499_v3, %v499_v3 }
 0x32b   :  { %v829_v7 = vpop.f32.mrf.mxu0 }
 0x32c   :  { %835 = vmatmul.mubr.msk.bf16.vlgmr.msra.gmra.mxu0 %vm141_vm4, %v500_v6 }
 0x32d   :  { %839 = vmatpush3.bf16.msra.mxu0 %v882_v5  ;;  %842 = vmatprep.mubr.msk.bf16.mxu0 %vm887_vm1, %v886_v0 }
 0x32e   :  { %840 = vmatprep.subr.bf16.mxu0 %v886_v0 }
 0x331   :  { %841 = vmatpush3.bf16.msra.mxu0 %v883_v8 }
 0x332   :  { %846 = vmatprep.subr.bf16.mxu0 %v886_v0 }
 0x3ec   :  { %v561_v10 = vpop.f32.mrf.mxu0 }
 0x3ed   :  { %v562_v11 = vadd.f32 %v746_v9, %v561_v10 }
 0x3ee   :  { %v836_v12 = vpop.f32.mrf.mxu0 }
 0x3ef   :  { %v567_v13 = vmax.f32 %v562_v11, 0.0 }
 0x3f0   :  { %v564_v14 = vpop.f32.mrf.mxu0 }
 0x3f1   :  { %v568_v16 = vpack.c.bf16 %v567_v13, %v567_v13 }
 0x3f2   :  { %v837_v17 = vpop.f32.mrf.mxu0 }
 0x3f3   :  { %843 = vmatmul.mubr.msk.bf16.vlgmr.msra.gmra.mxu0 %vm141_vm4, %v568_v16 }
 0x3f4   :  { %847 = vmatpush3.bf16.msra.mxu0 %v884_v15  ;;  %850 = vmatprep.mubr.msk.bf16.mxu0 %vm887_vm1, %v886_v0 }
 0x3f5   :  { %848 = vmatprep.subr.bf16.mxu0 %v886_v0  ;;  %v754_v0 = vld [vmem:[%s1144_s16] ss:$0 sm:$0xff] }
 0x3f8   :  { %849 = vmatpush3.bf16.msra.mxu0 %v885_v18 }
 0x4b3   :  { %v629_v20 = vpop.f32.mrf.mxu0 }
 0x4b4   :  { %v630_v21 = vadd.f32 %v750_v19, %v629_v20 }
 0x4b5   :  { %v844_v22 = vpop.f32.mrf.mxu0 }
 0x4b6   :  { %v635_v23 = vmax.f32 %v630_v21, 0.0 }
 0x4b7   :  { %v632_v24 = vpop.f32.mrf.mxu0 }
 0x4b8   :  { %v636_v25 = vpack.c.bf16 %v635_v23, %v635_v23 }
 0x4b9   :  { %v845_v26 = vpop.f32.mrf.mxu0 }
 0x4ba   :  { %851 = vmatmul.mubr.msk.bf16.vlgmr.msra.gmra.mxu0 %vm141_vm4, %v636_v25 }
 0x57a   :  { %v697_v28 = vpop.f32.mrf.mxu0 }
 0x57b   :  { %v698_v30 = vadd.f32 %v754_v0, %v697_v28 }
 0x57c   :  { %v852_v31 = vpop.f32.mrf.mxu0 }
 0x57d   :  { %v703_v32 = vmul.f32 %v698_v30, %v698_v30 }
 0x57e   :  { %v700_v33 = vpop.f32.mrf.mxu0 }
 0x57f   :  { %v704_v34 = vmul.f32 %v703_v32, %v698_v30 }
 0x580   :  { %v853_v35 = vpop.f32.mrf.mxu0 }
 0x581   :  { %v708_v36 = vsel %vm707_vm6, %v704_v34, %v698_v30 }
 0x582   :  { %709 = vst [vmem:[%s1145_s17] sm:$0xff] %v708_v36 }

</bundles_post_ra>
